<compile_context>
chip_gen: v6e
topology: v6e:2x2x1
jax: 0.10.0
libtpu: 0.0.40
codegen_flags: <defaults>
</compile_context>

<pallas_src>
import functools

import jax
import jax.numpy as jnp
from jax import lax
from jax.experimental import pallas as pl
from jax.experimental.pallas import tpu as pltpu


def _supcon_tile_kernel(q_ref, k_ref, rlab_ref, clab_ref, out_ref,
                        m_ref, l_ref, sp_ref, cp_ref, *,
                        block_m, block_k, n_valid_cols, n_col_tiles, col_pad, eps):
    ri = pl.program_id(0)      # anchor-row tile index   (parallel)
    ci = pl.program_id(1)      # contrast-col tile index (reduction, last)

    @pl.when(ci == 0)
    def _init():
        m_ref[...] = jnp.full(m_ref.shape, -jnp.inf, dtype=jnp.float32)
        l_ref[...] = jnp.zeros(l_ref.shape, dtype=jnp.float32)
        sp_ref[...] = jnp.zeros(sp_ref.shape, dtype=jnp.float32)
        cp_ref[...] = jnp.zeros(cp_ref.shape, dtype=jnp.float32)

    # logits tile = q . k^T, contracting D directly (MXU, f32 accumulate,
    # bf16 operands on the default path).
    s = lax.dot_general(q_ref[...], k_ref[...],
                        dimension_numbers=(((1,), (1,)), ((), ())),
                        preferred_element_type=jnp.float32)          # [bm, bk] f32

    # positive-pair mask rebuilt from label vectors (no [N,N] mask DMA).
    same_label = rlab_ref[...] == clab_ref[...]                      # [bm,1]==[1,bk]

    m_prev = m_ref[...]
    m_new = jnp.maximum(m_prev, jnp.max(s, axis=1, keepdims=True))   # any valid shift

    row0 = ri * block_m
    col0 = ci * block_k
    # Scalar test: does this tile touch the self-contrast diagonal?
    needs_mask = jnp.logical_and(row0 < col0 + block_k, col0 < row0 + block_m)
    if col_pad:                                    # static: padded columns exist
        needs_mask = jnp.logical_or(needs_mask, ci == n_col_tiles - 1)

    def _masked():
        # 1-D iotas + broadcast compare (cheaper than two full [bm,bk] iotas).
        rows = lax.broadcasted_iota(jnp.int32, (block_m, 1), 0) + row0
        cols = lax.broadcasted_iota(jnp.int32, (1, block_k), 1) + col0
        keep = rows != cols                        # self-contrast exclusion
        if col_pad:
            keep = jnp.logical_and(keep, cols < n_valid_cols)
        e_ = jnp.where(keep, jnp.exp(s - m_new), 0.0)
        p_ = jnp.logical_and(same_label, keep).astype(jnp.float32)
        return e_, p_

    def _plain():                                  # >90% of tiles: no mask work
        return jnp.exp(s - m_new), same_label.astype(jnp.float32)

    e, pos = lax.cond(needs_mask, _masked, _plain)

    # Online log-sum-exp over the contrast axis + positive-pair running sums.
    # TODO(synk): if a bundle dump shows the 2 XLUs binding on these lane
    # reductions, fold the three sums into one MXU matmul against a ones/selector.
    alpha = jnp.exp(m_prev - m_new)
    l_ref[...] = alpha * l_ref[...] + jnp.sum(e, axis=1, keepdims=True)
    m_ref[...] = m_new
    sp_ref[...] += jnp.sum(pos * s, axis=1, keepdims=True)
    cp_ref[...] += jnp.sum(pos, axis=1, keepdims=True)

    @pl.when(ci == n_col_tiles - 1)
    def _finalize():
        lse = m_ref[...] + jnp.log(l_ref[...])                       # [bm, 1]
        num = sp_ref[...] - lse * cp_ref[...]
        inv = pl.reciprocal(cp_ref[...] + eps, approx=False)
        out_ref[...] = num * inv                                     # mean_log_prob_pos


_ROW_CANDS = (1024, 512, 384, 256, 128, 64, 32, 16, 8)
_COL_CANDS = (4096, 2048, 1536, 1024, 768, 512, 384, 256, 128)


def _round_up(x, m):
    return (x + m - 1) // m * m


def _pick_tile(padded_dim, target, cands):
    for c in cands:
        if c <= target and c <= padded_dim and padded_dim % c == 0:
            return c
    return padded_dim


def _vmem_limit_bytes():
    """Per-generation scoped-VMEM cap: ~48 MiB on v7x (64 MiB physical),
    up to 96 MiB on v5e/v6e (128 MiB physical)."""
    cap = 64 * 1024 * 1024
    try:
        info = pltpu.get_tpu_info()
        cap = int(getattr(info, "vmem_capacity_bytes", cap) or cap)
    except Exception:
        pass
    return int(min(cap * 3 // 4, 96 * 1024 * 1024))


def _estimate_tile_vmem(bm, bk, d, in_itemsize):
    io = 2 * (bm + bk) * d * in_itemsize        # double-buffered q/k tiles
    io += 2 * 8 * (bk + 128) * 4                # label tiles (sublane-padded)
    temps = 6 * bm * bk * 4                     # compiler [bm,bk] f32 temporaries
    acc = 5 * bm * 4                            # scratch accumulators + out tile
    return io + temps + acc


def supcon_loss(features, labels=None, mask=None, *,
                temperature=0.07, contrast_mode="all", base_temperature=0.07,
                block_m=512, block_k=2048, use_bf16=True):
    """Pallas TPU implementation of SupConLoss.forward."""
    features = jnp.asarray(features)
    if features.ndim < 3:
        features = features[:, None, :]
    if features.ndim > 3:
        features = features.reshape(features.shape[0], features.shape[1], -1)
    B, V, D = features.shape
    N = B * V

    if labels is not None and mask is not None:
        raise ValueError("Cannot define both `labels` and `mask`")
    if mask is not None:
        # TODO(synk): arbitrary user-supplied [B,B] masks (not expressible as label
        # equality) would need a tiled mask-input path; not wired up here.
        raise NotImplementedError("explicit `mask` argument not supported")
    if labels is None:
        base_labels = jnp.arange(B, dtype=jnp.int32)          # eye(B) positive mask
    else:
        base_labels = jnp.asarray(labels).reshape(-1).astype(jnp.int32)
        if base_labels.shape[0] != B:
            raise ValueError("Num of labels does not match num of features")

    # contrast feature == torch.cat(torch.unbind(features, 1), 0): view-major rows.
    contrast = jnp.transpose(features, (1, 0, 2)).reshape(N, D).astype(jnp.float32)
    contrast_labels = jnp.tile(base_labels, V)                 # [N]

    if contrast_mode == "all":
        anchor, anchor_labels = contrast, contrast_labels
    elif contrast_mode == "one":
        anchor, anchor_labels = contrast[:B], contrast_labels[:B]
    else:
        raise ValueError(f"Unknown mode: {contrast_mode}")
    M = anchor.shape[0]

    # Fold 1/temperature into the anchor operand once (O(M*D), not O(M*N)).
    compute_dtype = jnp.bfloat16 if use_bf16 else jnp.float32
    q = (anchor * jnp.float32(1.0 / temperature)).astype(compute_dtype)
    k = contrast.astype(compute_dtype)
    itemsize = jnp.dtype(compute_dtype).itemsize

    # --- tile selection: lane/sublane aligned, megacore- and VMEM-budget aware ---
    block_m = max(int(block_m), 8)
    block_k = max(int(block_k), 128)
    M_pad = _round_up(M, 8)                 # sublane unit
    N_pad = _round_up(N, 128)               # lane unit
    bm = _pick_tile(M_pad, block_m, _ROW_CANDS)
    bk = _pick_tile(N_pad, block_k, _COL_CANDS)

    # Keep >= 2 row tiles when possible so both v7x TensorCores get work.
    if M_pad // bm < 2:
        for c in _ROW_CANDS:
            if c < bm and M_pad % c == 0 and M_pad // c >= 2:
                bm = c
                break

    vmem_limit = _vmem_limit_bytes()
    budget = int(vmem_limit * 0.7)
    while _estimate_tile_vmem(bm, bk, D, itemsize) > budget:
        smaller_k = [c for c in _COL_CANDS if c < bk and N_pad % c == 0]
        if smaller_k:
            bk = smaller_k[0]
            continue
        smaller_m = [c for c in _ROW_CANDS if c < bm and M_pad % c == 0]
        if smaller_m:
            bm = smaller_m[0]
            continue
        break

    grid_m, grid_k = M_pad // bm, N_pad // bk
    col_pad = (N_pad != N)

    def _pad_rows(x, rows):
        return x if x.shape[0] == rows else jnp.pad(x, ((0, rows - x.shape[0]), (0, 0)))

    q = _pad_rows(q, M_pad)
    k = _pad_rows(k, N_pad)
    rlab = _pad_rows(anchor_labels.reshape(M, 1), M_pad)
    clab = jnp.pad(contrast_labels, (0, N_pad - N)).reshape(1, N_pad)

    kernel = functools.partial(
        _supcon_tile_kernel, block_m=bm, block_k=bk,
        n_valid_cols=N, n_col_tiles=grid_k, col_pad=col_pad, eps=1e-8)

    # TODO(synk): on v5e (lowest HBM BW) pipeline_mode=pl.Buffered(3) on the
    # contrast BlockSpec would hide exposed k DMAs at negligible VMEM cost.
    mean_log_prob_pos = pl.pallas_call(
        kernel,
        out_shape=jax.ShapeDtypeStruct((M_pad, 1), jnp.float32),
        grid=(grid_m, grid_k),
        in_specs=[
            pl.BlockSpec((bm, D), lambda i, j: (i, 0)),       # anchor rows (pre-scaled)
            pl.BlockSpec((bk, D), lambda i, j: (j, 0)),       # contrast cols
            pl.BlockSpec((bm, 1), lambda i, j: (i, 0)),       # row labels
            pl.BlockSpec((1, bk), lambda i, j: (0, j)),       # col labels
        ],
        out_specs=pl.BlockSpec((bm, 1), lambda i, j: (i, 0)),
        scratch_shapes=[
            pltpu.VMEM((bm, 1), jnp.float32),                 # running max m
            pltpu.VMEM((bm, 1), jnp.float32),                 # running exp-sum l
            pltpu.VMEM((bm, 1), jnp.float32),                 # sum(pos * logits)
            pltpu.VMEM((bm, 1), jnp.float32),                 # sum(pos)
        ],
        compiler_params=pltpu.CompilerParams(
            dimension_semantics=("parallel", "arbitrary"),
            vmem_limit_bytes=vmem_limit,
        ),
    )(q, k, rlab, clab)

    # -(temperature / base_temperature) folded into the final scalar mean.
    return -(temperature / base_temperature) * jnp.mean(mean_log_prob_pos[:M, 0])


def _supcon_loss_ref(features, labels=None, temperature=0.07,
                     contrast_mode="all", base_temperature=0.07):
    """Pure-JAX reference mirroring the PyTorch module."""
    if features.ndim < 3:
        features = features[:, None, :]
    B, V, D = features.shape
    N = B * V
    if labels is None:
        base_mask = jnp.eye(B, dtype=jnp.float32)
    else:
        lab = jnp.asarray(labels).reshape(-1, 1)
        base_mask = (lab == lab.T).astype(jnp.float32)
    contrast = jnp.transpose(features, (1, 0, 2)).reshape(N, D).astype(jnp.float32)
    if contrast_mode == "one":
        anchor = features[:, 0].astype(jnp.float32)
        anchor_count = 1
    else:
        anchor = contrast
        anchor_count = V
    M = anchor.shape[0]
    logits = anchor @ contrast.T / temperature
    logits = logits - jnp.max(logits, axis=1, keepdims=True)
    msk = jnp.tile(base_mask, (anchor_count, V))
    logits_mask = jnp.ones((M, N), jnp.float32).at[jnp.arange(M), jnp.arange(M)].set(0.0)
    msk = msk * logits_mask
    exp_logits = jnp.exp(logits) * logits_mask
    log_prob = logits - jnp.log(jnp.sum(exp_logits, axis=1, keepdims=True))
    mean_log_prob_pos = jnp.sum(msk * log_prob, axis=1) / (jnp.sum(msk, axis=1) + 1e-8)
    return jnp.mean(-(temperature / base_temperature) * mean_log_prob_pos)


if __name__ == "__main__":
    key = jax.random.PRNGKey(0)
    k1, k2, k3 = jax.random.split(key, 3)

    # Case 1: labels=None (SimCLR-style eye mask), exact f32 path, default tiles.
    B, V, D = 128, 2, 64
    f1 = jax.random.normal(k1, (B, V, D), dtype=jnp.float32)
    f1 = f1 / jnp.linalg.norm(f1, axis=-1, keepdims=True)
    out1 = jax.block_until_ready(supcon_loss(f1, use_bf16=False))
    ref1 = _supcon_loss_ref(f1)
    assert jnp.allclose(out1, ref1, rtol=1e-4, atol=1e-4), (out1, ref1)

    # Case 2: same data, default bf16 path, small column tiles -> multi-tile online
    # LSE and both the diagonal-masked and mask-free lax.cond branches.
    out2 = jax.block_until_ready(supcon_loss(f1, block_m=128, block_k=128))
    assert jnp.allclose(out2, ref1, rtol=2e-2, atol=2e-2), (out2, ref1)

    # Case 3: supervised labels, odd sizes -> lane padding + boundary-tile masking.
    B2, V2, D2 = 24, 2, 48
    f2 = jax.random.normal(k2, (B2, V2, D2), dtype=jnp.float32)
    f2 = f2 / jnp.linalg.norm(f2, axis=-1, keepdims=True)
    lab2 = jax.random.randint(k3, (B2,), 0, 5)
    out3 = jax.block_until_ready(supcon_loss(f2, labels=lab2))
    ref3 = _supcon_loss_ref(f2, labels=lab2)
    assert jnp.allclose(out3, ref3, rtol=2e-2, atol=2e-2), (out3, ref3)

    # Case 4: contrast_mode='one' (single anchor view), bf16 default path.
    out4 = jax.block_until_ready(supcon_loss(f1, contrast_mode="one"))
    ref4 = _supcon_loss_ref(f1, contrast_mode="one")
    assert jnp.allclose(out4, ref4, rtol=2e-2, atol=2e-2), (out4, ref4)

    print("KERNEL_OK")
</pallas_src>

<mosaic_0001>
module attributes {stable_mosaic.version = 11 : i64} {
  func.func @_supcon_tile_kernel(%arg0: i32, %arg1: i32, %arg2: memref<128x64xf32, #tpu.memory_space<vmem>>, %arg3: memref<256x64xf32, #tpu.memory_space<vmem>>, %arg4: memref<128x1xi32, #tpu.memory_space<vmem>>, %arg5: memref<1x256xi32, #tpu.memory_space<vmem>>, %arg6: memref<128x1xf32, #tpu.memory_space<vmem>>, %arg7: memref<128x1xf32, #tpu.memory_space<vmem>>, %arg8: memref<128x1xf32, #tpu.memory_space<vmem>>, %arg9: memref<128x1xf32, #tpu.memory_space<vmem>>, %arg10: memref<128x1xf32, #tpu.memory_space<vmem>>) attributes {dimension_semantics = [#tpu.dimension_semantics<parallel>, #tpu.dimension_semantics<arbitrary>], iteration_bounds = array<i64: 2, 1>, scalar_prefetch = 0 : i64, scratch_operands = 4 : i64, tpu.core_type = #tpu.core_type<tc>, window_params = [{transform_indices = @transform_0, window_bounds = array<i64: 128, 64>}, {transform_indices = @transform_1, window_bounds = array<i64: 256, 64>}, {transform_indices = @transform_2, window_bounds = array<i64: 128, 1>}, {transform_indices = @transform_3, window_bounds = array<i64: 1, 256>}, {transform_indices = @transform_4, window_bounds = array<i64: 128, 1>}]} {
    %c0_i32 = arith.constant 0 : i32
    %0 = arith.cmpi eq, %arg1, %c0_i32 : i32
    %1 = arith.extui %0 : i1 to i32
    %c0_i32_0 = arith.constant 0 : i32
    %2 = arith.cmpi ne, %1, %c0_i32_0 : i32
    scf.if %2 {
      %cst_33 = arith.constant 0xFF800000 : f32
      %48 = vector.broadcast %cst_33 : f32 to vector<128x1xf32>
      %c0_34 = arith.constant 0 : index
      %c0_35 = arith.constant 0 : index
      %49 = vector.load %arg7[%c0_34, %c0_35] : memref<128x1xf32, #tpu.memory_space<vmem>>, vector<128x1xf32>
      tpu.vector_store %arg7[%c0_34, %c0_35], %48 {strides = array<i32>} : memref<128x1xf32, #tpu.memory_space<vmem>>, vector<128x1xf32>,
      %cst_36 = arith.constant 0.000000e+00 : f32
      %50 = vector.broadcast %cst_36 : f32 to vector<128x1xf32>
      %c0_37 = arith.constant 0 : index
      %c0_38 = arith.constant 0 : index
      %51 = vector.load %arg8[%c0_37, %c0_38] : memref<128x1xf32, #tpu.memory_space<vmem>>, vector<128x1xf32>
      tpu.vector_store %arg8[%c0_37, %c0_38], %50 {strides = array<i32>} : memref<128x1xf32, #tpu.memory_space<vmem>>, vector<128x1xf32>,
      %cst_39 = arith.constant 0.000000e+00 : f32
      %52 = vector.broadcast %cst_39 : f32 to vector<128x1xf32>
      %c0_40 = arith.constant 0 : index
      %c0_41 = arith.constant 0 : index
      %53 = vector.load %arg9[%c0_40, %c0_41] : memref<128x1xf32, #tpu.memory_space<vmem>>, vector<128x1xf32>
      tpu.vector_store %arg9[%c0_40, %c0_41], %52 {strides = array<i32>} : memref<128x1xf32, #tpu.memory_space<vmem>>, vector<128x1xf32>,
      %cst_42 = arith.constant 0.000000e+00 : f32
      %54 = vector.broadcast %cst_42 : f32 to vector<128x1xf32>
      %c0_43 = arith.constant 0 : index
      %c0_44 = arith.constant 0 : index
      %55 = vector.load %arg10[%c0_43, %c0_44] : memref<128x1xf32, #tpu.memory_space<vmem>>, vector<128x1xf32>
      tpu.vector_store %arg10[%c0_43, %c0_44], %54 {strides = array<i32>} : memref<128x1xf32, #tpu.memory_space<vmem>>, vector<128x1xf32>,
    } else {
    }
    %c0 = arith.constant 0 : index
    %c0_1 = arith.constant 0 : index
    %3 = vector.load %arg2[%c0, %c0_1] : memref<128x64xf32, #tpu.memory_space<vmem>>, vector<128x64xf32>
    %c0_2 = arith.constant 0 : index
    %c0_3 = arith.constant 0 : index
    %4 = vector.load %arg3[%c0_2, %c0_3] : memref<256x64xf32, #tpu.memory_space<vmem>>, vector<256x64xf32>
    %cst = arith.constant dense<0.000000e+00> : vector<128x256xf32>
    %5 = tpu.matmul %3, %4, %cst {dimension_numbers = #tpu.dot_dimension_numbers<[1], [1], [0], [0], [0, 0, 1, 0], [], []>} : vector<128x64xf32>, vector<256x64xf32>, vector<128x256xf32> -> vector<128x256xf32>
    %c0_4 = arith.constant 0 : index
    %c0_5 = arith.constant 0 : index
    %6 = vector.load %arg4[%c0_4, %c0_5] : memref<128x1xi32, #tpu.memory_space<vmem>>, vector<128x1xi32>
    %c0_6 = arith.constant 0 : index
    %c0_7 = arith.constant 0 : index
    %7 = vector.load %arg5[%c0_6, %c0_7] : memref<1x256xi32, #tpu.memory_space<vmem>>, vector<1x256xi32>
    %8 = vector.broadcast %6 : vector<128x1xi32> to vector<128x256xi32>
    %9 = vector.broadcast %7 : vector<1x256xi32> to vector<128x256xi32>
    %10 = arith.cmpi eq, %8, %9 : vector<128x256xi32>
    %c0_8 = arith.constant 0 : index
    %c0_9 = arith.constant 0 : index
    %11 = vector.load %arg7[%c0_8, %c0_9] : memref<128x1xf32, #tpu.memory_space<vmem>>, vector<128x1xf32>
    %cst_10 = arith.constant dense<0xFF800000> : vector<128xf32>
    %12 = vector.multi_reduction <maximumf>, %5, %cst_10 [1] : vector<128x256xf32> to vector<128xf32>
    %13 = vector.shape_cast %12 : vector<128xf32> to vector<128x1xf32>
    %14 = arith.maximumf %11, %13 : vector<128x1xf32>
    %c128_i32 = arith.constant 128 : i32
    %15 = arith.muli %arg0, %c128_i32 : i32
    %c256_i32 = arith.constant 256 : i32
    %16 = arith.muli %arg1, %c256_i32 : i32
    %c256_i32_11 = arith.constant 256 : i32
    %17 = arith.addi %16, %c256_i32_11 : i32
    %18 = arith.cmpi slt, %15, %17 : i32
    %c128_i32_12 = arith.constant 128 : i32
    %19 = arith.addi %15, %c128_i32_12 : i32
    %20 = arith.cmpi slt, %16, %19 : i32
    %21 = arith.andi %18, %20 : i1
    %22 = arith.extui %21 : i1 to i32
    %c0_i32_13 = arith.constant 0 : i32
    %23 = arith.cmpi ne, %22, %c0_i32_13 : i32
    %24:2 = scf.if %23 -> (vector<128x256xf32>, vector<128x256xf32>) {
      %48 = tpu.iota {dimensions = array<i32: 0>} : vector<128x1xi32>
      %49 = vector.broadcast %15 : i32 to vector<128x1xi32>
      %50 = arith.addi %48, %49 : vector<128x1xi32>
      %51 = tpu.iota {dimensions = array<i32: 1>} : vector<1x256xi32>
      %52 = vector.broadcast %16 : i32 to vector<1x256xi32>
      %53 = arith.addi %51, %52 : vector<1x256xi32>
      %54 = vector.broadcast %50 : vector<128x1xi32> to vector<128x256xi32>
      %55 = vector.broadcast %53 : vector<1x256xi32> to vector<128x256xi32>
      %56 = arith.cmpi ne, %54, %55 : vector<128x256xi32>
      %57 = vector.broadcast %14 : vector<128x1xf32> to vector<128x256xf32>
      %58 = arith.subf %5, %57 : vector<128x256xf32>
      %59 = math.exp %58 : vector<128x256xf32>
      %cst_33 = arith.constant 0.000000e+00 : f32
      %60 = vector.broadcast %cst_33 : f32 to vector<128x256xf32>
      %61 = arith.select %56, %59, %60 : vector<128x256xi1>, vector<128x256xf32>
      %62 = arith.andi %10, %56 : vector<128x256xi1>
      %63 = arith.extui %62 : vector<128x256xi1> to vector<128x256xi32>
      %64 = arith.sitofp %63 : vector<128x256xi32> to vector<128x256xf32>
      scf.yield %61, %64 : vector<128x256xf32>, vector<128x256xf32>
    } else {
      %48 = vector.broadcast %14 : vector<128x1xf32> to vector<128x256xf32>
      %49 = arith.subf %5, %48 : vector<128x256xf32>
      %50 = math.exp %49 : vector<128x256xf32>
      %51 = arith.extui %10 : vector<128x256xi1> to vector<128x256xi32>
      %52 = arith.sitofp %51 : vector<128x256xi32> to vector<128x256xf32>
      scf.yield %50, %52 : vector<128x256xf32>, vector<128x256xf32>
    }
    %25 = arith.subf %11, %14 : vector<128x1xf32>
    %26 = math.exp %25 : vector<128x1xf32>
    %c0_14 = arith.constant 0 : index
    %c0_15 = arith.constant 0 : index
    %27 = vector.load %arg8[%c0_14, %c0_15] : memref<128x1xf32, #tpu.memory_space<vmem>>, vector<128x1xf32>
    %28 = arith.mulf %26, %27 : vector<128x1xf32>
    %cst_16 = arith.constant dense<0.000000e+00> : vector<128xf32>
    %29 = vector.multi_reduction <add>, %24#0, %cst_16 [1] : vector<128x256xf32> to vector<128xf32>
    %30 = vector.shape_cast %29 : vector<128xf32> to vector<128x1xf32>
    %31 = arith.addf %28, %30 : vector<128x1xf32>
    %c0_17 = arith.constant 0 : index
    %c0_18 = arith.constant 0 : index
    %32 = vector.load %arg8[%c0_17, %c0_18] : memref<128x1xf32, #tpu.memory_space<vmem>>, vector<128x1xf32>
    tpu.vector_store %arg8[%c0_17, %c0_18], %31 {strides = array<i32>} : memref<128x1xf32, #tpu.memory_space<vmem>>, vector<128x1xf32>,
    %c0_19 = arith.constant 0 : index
    %c0_20 = arith.constant 0 : index
    %33 = vector.load %arg7[%c0_19, %c0_20] : memref<128x1xf32, #tpu.memory_space<vmem>>, vector<128x1xf32>
    tpu.vector_store %arg7[%c0_19, %c0_20], %14 {strides = array<i32>} : memref<128x1xf32, #tpu.memory_space<vmem>>, vector<128x1xf32>,
    %c0_21 = arith.constant 0 : index
    %c0_22 = arith.constant 0 : index
    %34 = vector.load %arg9[%c0_21, %c0_22] : memref<128x1xf32, #tpu.memory_space<vmem>>, vector<128x1xf32>
    %35 = arith.mulf %24#1, %5 : vector<128x256xf32>
    %cst_23 = arith.constant dense<0.000000e+00> : vector<128xf32>
    %36 = vector.multi_reduction <add>, %35, %cst_23 [1] : vector<128x256xf32> to vector<128xf32>
    %37 = vector.shape_cast %36 : vector<128xf32> to vector<128x1xf32>
    %38 = arith.addf %34, %37 : vector<128x1xf32>
    %c0_24 = arith.constant 0 : index
    %c0_25 = arith.constant 0 : index
    %39 = vector.load %arg9[%c0_24, %c0_25] : memref<128x1xf32, #tpu.memory_space<vmem>>, vector<128x1xf32>
    tpu.vector_store %arg9[%c0_24, %c0_25], %38 {strides = array<i32>} : memref<128x1xf32, #tpu.memory_space<vmem>>, vector<128x1xf32>,
    %c0_26 = arith.constant 0 : index
    %c0_27 = arith.constant 0 : index
    %40 = vector.load %arg10[%c0_26, %c0_27] : memref<128x1xf32, #tpu.memory_space<vmem>>, vector<128x1xf32>
    %cst_28 = arith.constant dense<0.000000e+00> : vector<128xf32>
    %41 = vector.multi_reduction <add>, %24#1, %cst_28 [1] : vector<128x256xf32> to vector<128xf32>
    %42 = vector.shape_cast %41 : vector<128xf32> to vector<128x1xf32>
    %43 = arith.addf %40, %42 : vector<128x1xf32>
    %c0_29 = arith.constant 0 : index
    %c0_30 = arith.constant 0 : index
    %44 = vector.load %arg10[%c0_29, %c0_30] : memref<128x1xf32, #tpu.memory_space<vmem>>, vector<128x1xf32>
    tpu.vector_store %arg10[%c0_29, %c0_30], %43 {strides = array<i32>} : memref<128x1xf32, #tpu.memory_space<vmem>>, vector<128x1xf32>,
    %c0_i32_31 = arith.constant 0 : i32
    %45 = arith.cmpi eq, %arg1, %c0_i32_31 : i32
    %46 = arith.extui %45 : i1 to i32
    %c0_i32_32 = arith.constant 0 : i32
    %47 = arith.cmpi ne, %46, %c0_i32_32 : i32
    scf.if %47 {
      %c0_33 = arith.constant 0 : index
      %c0_34 = arith.constant 0 : index
      %48 = vector.load %arg7[%c0_33, %c0_34] : memref<128x1xf32, #tpu.memory_space<vmem>>, vector<128x1xf32>
      %c0_35 = arith.constant 0 : index
      %c0_36 = arith.constant 0 : index
      %49 = vector.load %arg8[%c0_35, %c0_36] : memref<128x1xf32, #tpu.memory_space<vmem>>, vector<128x1xf32>
      %50 = math.log %49 : vector<128x1xf32>
      %51 = arith.addf %48, %50 : vector<128x1xf32>
      %c0_37 = arith.constant 0 : index
      %c0_38 = arith.constant 0 : index
      %52 = vector.load %arg9[%c0_37, %c0_38] : memref<128x1xf32, #tpu.memory_space<vmem>>, vector<128x1xf32>
      %c0_39 = arith.constant 0 : index
      %c0_40 = arith.constant 0 : index
      %53 = vector.load %arg10[%c0_39, %c0_40] : memref<128x1xf32, #tpu.memory_space<vmem>>, vector<128x1xf32>
      %54 = arith.mulf %51, %53 : vector<128x1xf32>
      %55 = arith.subf %52, %54 : vector<128x1xf32>
      %c0_41 = arith.constant 0 : index
      %c0_42 = arith.constant 0 : index
      %56 = vector.load %arg10[%c0_41, %c0_42] : memref<128x1xf32, #tpu.memory_space<vmem>>, vector<128x1xf32>
      %cst_43 = arith.constant 9.99999993E-9 : f32
      %57 = vector.broadcast %cst_43 : f32 to vector<128x1xf32>
      %58 = arith.addf %56, %57 : vector<128x1xf32>
      %59 = tpu.reciprocal %58 : vector<128x1xf32> -> vector<128x1xf32>
      %60 = arith.mulf %55, %59 : vector<128x1xf32>
      %c0_44 = arith.constant 0 : index
      %c0_45 = arith.constant 0 : index
      %61 = vector.load %arg6[%c0_44, %c0_45] : memref<128x1xf32, #tpu.memory_space<vmem>>, vector<128x1xf32>
      tpu.vector_store %arg6[%c0_44, %c0_45], %60 {strides = array<i32>} : memref<128x1xf32, #tpu.memory_space<vmem>>, vector<128x1xf32>,
    } else {
    }
    return
  }
  func.func @transform_0(%arg0: i32, %arg1: i32) -> (i32, i32) {
    %c0_i32 = arith.constant 0 : i32
    %c0_i32_0 = arith.constant 0 : i32
    return %arg0, %c0_i32 : i32, i32
  }
  func.func @transform_1(%arg0: i32, %arg1: i32) -> (i32, i32) {
    %c0_i32 = arith.constant 0 : i32
    %c0_i32_0 = arith.constant 0 : i32
    return %arg1, %c0_i32 : i32, i32
  }
  func.func @transform_2(%arg0: i32, %arg1: i32) -> (i32, i32) {
    %c0_i32 = arith.constant 0 : i32
    %c0_i32_0 = arith.constant 0 : i32
    return %arg0, %c0_i32 : i32, i32
  }
  func.func @transform_3(%arg0: i32, %arg1: i32) -> (i32, i32) {
    %c0_i32 = arith.constant 0 : i32
    %c0_i32_0 = arith.constant 0 : i32
    return %c0_i32, %arg1 : i32, i32
  }
  func.func @transform_4(%arg0: i32, %arg1: i32) -> (i32, i32) {
    %c0_i32 = arith.constant 0 : i32
    %c0_i32_0 = arith.constant 0 : i32
    return %arg0, %c0_i32 : i32, i32
  }
}

</mosaic_0001>

<bundles_post_ra>
// kernel: tpu_custom_call.1
= control target key start
LH: loop header
LB: loop body
LE: loop exit
PB: predicated region body
PF: predicated region fallthrough
CT: control target
= control target key end

     0   :  { %s4947_s15 = smov 0   ;;  %s4949_s16 = smov 0   ;;  %s7807_s0 = inlined_call_operand.vmem [shape: f32[256,64], index: 0, kind: input, shape index: {}]   ;;  %s7808_s1 = inlined_call_operand.vmem [shape: f32[256,64], index: 1, kind: input, shape index: {}]   ;;  %s7809_s2 = inlined_call_operand.vmem [shape: s32[256,1], index: 2, kind: input, shape index: {}]   ;;  %s7810_s3 = inlined_call_operand.vmem [shape: s32[1,256], index: 3, kind: input, shape index: {}]   ;;  %s7811_s4 = inlined_call_operand.vmem [shape: f32[256,1], index: 4, kind: output, shape index: {}]  }
   0x1   :  { %s4951_s17 = smov 0  }
   0x2 LB: > { %s26_s18 = sadd.s32 1, %s4397_s16  ;;  %p2363_p0 = scmp.ge.s32.totalorder %s4401_s17, 1  ;;  %s4401_s17 = sphi %s4951_s17, %s14_s17   ;;  %s4397_s16 = sphi %s4949_s16, %s8555_s16   ;;  %s4393_s15 = sphi %s4947_s15, %s8554_s15  }
   0x3   : > { %p28_p1 = scmp.ge.s32.totalorder %s26_s18, 2  ;;  %p207_p2 = scmp.lt.s32.totalorder %s4401_s17, 3 }
   0x5   : > { %s8557_s18 = smov (%p28_p1, %s26_s18), 0  ;;  %p208_p3 = pnand %p2363_p0, %p207_p2 }
   0x7   : > { %211 = sbr.rel (%p208_p3) target bundleno = 1077 (0x435), region = 36 }
   0xc   : > { %v392_v0 = vld [vmem:[%s7808_s1 + $0xf8] sm:$0xff]  ;;  %vm393_vm0 = vcmask 523264   ;;  %v391_v2 = vld [vmem:[%s7808_s1 + $0xf0] sm:$0xff]  ;;  %s2364_s25 = sshll.u32 %s4393_s15, 4  ;;  %v390_v4 = vld [vmem:[%s7808_s1 + $0xe8] sm:$0xff]  ;;  %v4915_v5 = vmov 0   ;;  %v7813_v63 = vlaneseq }
   0xd   : > { %v376_v1 = vld [vmem:[%s7808_s1 + $0x78] sm:$0xff]  ;;  %2486 = vmatprep.subr.msk.mxu0 %vm393_vm0, %v392_v0  ;;  %2550 = vmatprep.subr.msk.mxu1 %vm393_vm0, %v392_v0  ;;  %p248_p4 = scmp.lt.s32.totalorder %s2364_s25, 31  ;;  %v375_v3 = vld [vmem:[%s7808_s1 + $0x70] sm:$0xff]  ;;  %v374_v6 = vld [vmem:[%s7808_s1 + $0x68] sm:$0xff]  ;;  %vm7812_vm9 = vcmask 7168  }
   0xe   : > { %2487 = vmatpush3.xpose.msk.msra.mxu0 %vm393_vm0, %v376_v1  ;;  %2566 = vmatpush3.xpose.msk.msra.mxu1 %vm393_vm0, %v376_v1  ;;  %v389_v7 = vld [vmem:[%s7808_s1 + $0xe0] sm:$0xff]  ;;  %v388_v11 = vld [vmem:[%s7808_s1 + $0xd8] sm:$0xff]  ;;  %v387_v13 = vld [vmem:[%s7808_s1 + $0xd0] sm:$0xff]  ;;  %v5214_v0 = vshrl.u32 %v7813_v63, 7 }
   0xf   : > { %2488 = vmatprep.subr.msk.mxu0 %vm393_vm0, %v391_v2  ;;  %2551 = vmatprep.subr.msk.mxu1 %vm393_vm0, %v391_v2  ;;  %s8559_s25 = smov (!%p248_p4, %s2364_s25), 31  ;;  %v373_v9 = vld [vmem:[%s7808_s1 + $0x60] sm:$0xff]  ;;  %v372_v12 = vld [vmem:[%s7808_s1 + $0x58] sm:$0xff]  ;;  %v371_v17 = vld [vmem:[%s7808_s1 + $0x50] sm:$0xff] }
  0x10   : > { %3638 = vset.pattern.permute.xlu1 %v4915_v5  ;;  %3637 = vset.pattern.permute.xlu0 %v4915_v5  ;;  %s2365_s30 = sshll.u32 %s8559_s25, 3  ;;  %v386_v18 = vld [vmem:[%s7808_s1 + $0xc8] sm:$0xff]  ;;  %v385_v22 = vld [vmem:[%s7808_s1 + $0xc0] sm:$0xff]  ;;  %v384_v26 = vld [vmem:[%s7808_s1 + $0xb8] sm:$0xff]  ;;  %7980 = vst [vmem:[#allocation6_spill] sm:$0xff] %v5214_v0  ;;  %v766_v2 = vsub.s32 0, %v5214_v0 }
  0x11   : > { %s4994_s7 = scalar_lea.vmem %s7811_s4, %s2365_s30  ;;  %s5004_s12 = scalar_lea.vmem %s7807_s0, %s2365_s30  ;;  %v370_v21 = vld [vmem:[%s7808_s1 + $0x48] sm:$0xff]  ;;  %v369_v25 = vld [vmem:[%s7808_s1 + $0x40] sm:$0xff]  ;;  %v368_v29 = vld [vmem:[%s7808_s1 + $0x38] sm:$0xff] }
  0x12   : > { %2489 = vmatpush3.xpose.msk.msra.mxu0 %vm393_vm0, %v375_v3  ;;  %2567 = vmatpush3.xpose.msk.msra.mxu1 %vm393_vm0, %v375_v3  ;;  %v5012_v8 = vld [vmem:[%s5004_s12] sm:$0xff]  ;;  %s5032_s25 = scalar_lea.vmem %s7809_s2, %s2365_s30  ;;  %v383_v30 = vld [vmem:[%s7808_s1 + $0xb0] sm:$0xff]  ;;  %v382_v34 = vld [vmem:[%s7808_s1 + $0xa8] sm:$0xff]  ;;  %v770_v3 = vsub.s32 1, %v5214_v0  ;;  %v5706_v0 = vmov 0  }
  0x13   : > { %2490 = vmatprep.subr.msk.mxu0 %vm393_vm0, %v390_v4  ;;  %2552 = vmatprep.subr.msk.mxu1 %vm393_vm0, %v390_v4  ;;  %v5020_v10 = vld [vmem:[%s5004_s12 + $0x40] sm:$0xff]  ;;  %v701_v14 = vld [vmem:[%s5032_s25 + $0x10] sm:$0xff]  ;;  %v702_v16 = vld [vmem:[%s5032_s25 + $0x18] sm:$0xff] }
  0x14   : > { %2518 = vmatprep.mubr.msk.f32.mxu0 %vm393_vm0, %v5012_v8  ;;  %2534 = vmatprep.mubr.msk.f32.mxu1 %vm393_vm0, %v5020_v10  ;;  %v699_v15 = vld [vmem:[%s5032_s25] sm:$0xff]  ;;  %v700_v19 = vld [vmem:[%s5032_s25 + $0x8] sm:$0xff]  ;;  %v706_v24 = vld [vmem:[%s5032_s25 + $0x38] sm:$0xff] }
  0x15   : > { %723 = vperm.xlu1 %3638, %v701_v14   ;;  %717 = vperm.xlu0 %3637, %v699_v15   ;;  %v704_v20 = vld [vmem:[%s5032_s25 + $0x28] sm:$0xff]  ;;  %v703_v23 = vld [vmem:[%s5032_s25 + $0x20] sm:$0xff]  ;;  %v705_v27 = vld [vmem:[%s5032_s25 + $0x30] sm:$0xff] }
  0x16   : > { %2491 = vmatpush3.xpose.msk.msra.mxu0 %vm393_vm0, %v374_v6  ;;  %2568 = vmatpush3.xpose.msk.msra.mxu1 %vm393_vm0, %v374_v6  ;;  %v708_v28 = vld [vmem:[%s5032_s25 + $0x48] sm:$0xff]  ;;  %v707_v31 = vld [vmem:[%s5032_s25 + $0x40] sm:$0xff]  ;;  %v709_v32 = vld [vmem:[%s5032_s25 + $0x50] sm:$0xff] }
  0x17   : > { %2492 = vmatprep.subr.msk.mxu0 %vm393_vm0, %v389_v7  ;;  %2553 = vmatprep.subr.msk.mxu1 %vm393_vm0, %v389_v7  ;;  %v367_v33 = vld [vmem:[%s7808_s1 + $0x30] sm:$0xff]  ;;  %v710_v35 = vld [vmem:[%s5032_s25 + $0x58] sm:$0xff]  ;;  %v711_v36 = vld [vmem:[%s5032_s25 + $0x60] sm:$0xff] }
  0x18   : > { %v366_v37 = vld [vmem:[%s7808_s1 + $0x28] sm:$0xff]  ;;  %v381_v38 = vld [vmem:[%s7808_s1 + $0xa0] sm:$0xff]  ;;  %v380_v41 = vld [vmem:[%s7808_s1 + $0x98] sm:$0xff] }
  0x19   : > { %726 = vperm.xlu1 %3638, %v702_v16   ;;  %720 = vperm.xlu0 %3637, %v700_v19   ;;  %v712_v39 = vld [vmem:[%s5032_s25 + $0x68] sm:$0xff]  ;;  %v365_v40 = vld [vmem:[%s7808_s1 + $0x20] sm:$0xff]  ;;  %v364_v42 = vld [vmem:[%s7808_s1 + $0x18] sm:$0xff] }
  0x1a   : > { %2493 = vmatpush3.xpose.msk.msra.mxu0 %vm393_vm0, %v373_v9  ;;  %2569 = vmatpush3.xpose.msk.msra.mxu1 %vm393_vm0, %v373_v9  ;;  %v379_v43 = vld [vmem:[%s7808_s1 + $0x90] sm:$0xff]  ;;  %v378_v45 = vld [vmem:[%s7808_s1 + $0x88] sm:$0xff]  ;;  %v377_v47 = vld [vmem:[%s7808_s1 + $0x80] sm:$0xff] }
  0x1b   : > { %2494 = vmatprep.subr.msk.mxu0 %vm393_vm0, %v388_v11  ;;  %2554 = vmatprep.subr.msk.mxu1 %vm393_vm0, %v388_v11  ;;  %v363_v44 = vld [vmem:[%s7808_s1 + $0x10] sm:$0xff]  ;;  %v362_v46 = vld [vmem:[%s7808_s1 + $0x8] sm:$0xff]  ;;  %v361_v48 = vld [vmem:[%s7808_s1] sm:$0xff] }
  0x1c   : > { %v346_v49 = vld [vmem:[%s5004_s12 + $0x8] sm:$0xff]  ;;  %v347_v51 = vld [vmem:[%s5004_s12 + $0x10] sm:$0xff]  ;;  %v348_v53 = vld [vmem:[%s5004_s12 + $0x18] sm:$0xff] }
  0x1d   : > { %732 = vperm.xlu1 %3638, %v704_v20   ;;  %729 = vperm.xlu0 %3637, %v703_v23   ;;  %v354_v50 = vld [vmem:[%s5004_s12 + $0x48] sm:$0xff]  ;;  %v355_v52 = vld [vmem:[%s5004_s12 + $0x50] sm:$0xff]  ;;  %v356_v54 = vld [vmem:[%s5004_s12 + $0x58] sm:$0xff] }
  0x1e   : > { %2495 = vmatpush3.xpose.msk.msra.mxu0 %vm393_vm0, %v372_v12  ;;  %2570 = vmatpush3.xpose.msk.msra.mxu1 %vm393_vm0, %v372_v12  ;;  %v349_v55 = vld [vmem:[%s5004_s12 + $0x20] sm:$0xff]  ;;  %v350_v57 = vld [vmem:[%s5004_s12 + $0x28] sm:$0xff]  ;;  %v351_v59 = vld [vmem:[%s5004_s12 + $0x30] sm:$0xff]  ;;  %v4916_v12 = vmov -inf  }
  0x1f   : > { %2496 = vmatprep.subr.msk.mxu0 %vm393_vm0, %v387_v13  ;;  %2555 = vmatprep.subr.msk.mxu1 %vm393_vm0, %v387_v13  ;;  %v357_v56 = vld [vmem:[%s5004_s12 + $0x60] sm:$0xff]  ;;  %v358_v58 = vld [vmem:[%s5004_s12 + $0x68] sm:$0xff]  ;;  %v359_v60 = vld [vmem:[%s5004_s12 + $0x70] sm:$0xff]  ;;  %289 = vst.msk [vmem:[#allocation2 + $0x40] sm:$0xff] %vm7812_vm9, %v4916_v12  ;;  %v4917_v13 = vmov 0.0  }
  0x20   : > { %v352_v61 = vld [vmem:[%s5004_s12 + $0x38] sm:$0xff]  ;;  %v715_v1 = vld [vmem:[%s7810_s3] sm:$0x3]  ;;  %297 = vst.msk [vmem:[#allocation3] sm:$0xff] %vm7812_vm9, %v4917_v13  ;;  %298 = vst.msk [vmem:[#allocation3 + $0x8] sm:$0xff] %vm7812_vm9, %v4917_v13 }
  0x21   : > { %738 = vperm.xlu1 %3638, %v706_v24   ;;  %735 = vperm.xlu0 %3637, %v705_v27   ;;  %v360_v62 = vld [vmem:[%s5004_s12 + $0x78] sm:$0xff]  ;;  %v5221_v4 = vrot.slane %v715_v1, %v766_v2  ;;  %v5223_v5 = vrot.slane %v715_v1, %v770_v3  ;;  %299 = vst.msk [vmem:[#allocation3 + $0x10] sm:$0xff] %vm7812_vm9, %v4917_v13  ;;  %300 = vst.msk [vmem:[#allocation3 + $0x18] sm:$0xff] %vm7812_vm9, %v4917_v13  ;;  %s5487_s12 = sshll.u32 %s4393_s15, 7 }
  0x22   : > { %2497 = vmatpush3.xpose.msk.msra.mxu0 %vm393_vm0, %v371_v17  ;;  %2571 = vmatpush3.xpose.msk.msra.mxu1 %vm393_vm0, %v371_v17  ;;  %301 = vst.msk [vmem:[#allocation3 + $0x20] sm:$0xff] %vm7812_vm9, %v4917_v13  ;;  %302 = vst.msk [vmem:[#allocation3 + $0x28] sm:$0xff] %vm7812_vm9, %v4917_v13  ;;  %s888_s11 = sadd.s32 128, %s5487_s12  ;;  %p887_p5 = scmp.lt.s32.totalorder %s5487_s12, 256 }
  0x23   : > { %2498 = vmatprep.subr.msk.mxu0 %vm393_vm0, %v386_v18  ;;  %2556 = vmatprep.subr.msk.mxu1 %vm393_vm0, %v386_v18  ;;  %7981 = vst [vmem:[#allocation7_spill] sm:$0xff] %v5221_v4  ;;  %7982 = vst [vmem:[#allocation8_spill] sm:$0xff] %v5223_v5  ;;  %p2419_p6 = scmp.gt.s32.totalorder %s888_s11, 0 }
  0x24   : > { %303 = vst.msk [vmem:[#allocation3 + $0x30] sm:$0xff] %vm7812_vm9, %v4917_v13  ;;  %304 = vst.msk [vmem:[#allocation3 + $0x38] sm:$0xff] %vm7812_vm9, %v4917_v13 }
  0x25   : > { %744 = vperm.xlu1 %3638, %v708_v28   ;;  %741 = vperm.xlu0 %3637, %v707_v31   ;;  %305 = vst.msk [vmem:[#allocation3 + $0x40] sm:$0xff] %vm7812_vm9, %v4917_v13  ;;  %306 = vst.msk [vmem:[#allocation3 + $0x48] sm:$0xff] %vm7812_vm9, %v4917_v13  ;;  %p5491_p7 = pnand %p2419_p6, %p887_p5 }
  0x26   : > { %2499 = vmatpush3.xpose.msk.msra.mxu0 %vm393_vm0, %v370_v21  ;;  %2572 = vmatpush3.xpose.msk.msra.mxu1 %vm393_vm0, %v370_v21  ;;  %307 = vst.msk [vmem:[#allocation3 + $0x50] sm:$0xff] %vm7812_vm9, %v4917_v13  ;;  %308 = vst.msk [vmem:[#allocation3 + $0x58] sm:$0xff] %vm7812_vm9, %v4917_v13 }
  0x27   : > { %2500 = vmatprep.subr.msk.mxu0 %vm393_vm0, %v385_v22  ;;  %2557 = vmatprep.subr.msk.mxu1 %vm393_vm0, %v385_v22  ;;  %309 = vst.msk [vmem:[#allocation3 + $0x60] sm:$0xff] %vm7812_vm9, %v4917_v13  ;;  %310 = vst.msk [vmem:[#allocation3 + $0x68] sm:$0xff] %vm7812_vm9, %v4917_v13 }
  0x28   : > { %311 = vst.msk [vmem:[#allocation3 + $0x70] sm:$0xff] %vm7812_vm9, %v4917_v13  ;;  %312 = vst.msk [vmem:[#allocation3 + $0x78] sm:$0xff] %vm7812_vm9, %v4917_v13 }
  0x29   : > { %747 = vperm.xlu1 %3638, %v709_v32   ;;  %750 = vperm.xlu0 %3637, %v710_v35   ;;  %313 = vst.msk [vmem:[#allocation4] sm:$0xff] %vm7812_vm9, %v4917_v13  ;;  %314 = vst.msk [vmem:[#allocation4 + $0x8] sm:$0xff] %vm7812_vm9, %v4917_v13 }
  0x2a   : > { %2501 = vmatpush3.xpose.msk.msra.mxu0 %vm393_vm0, %v369_v25  ;;  %2573 = vmatpush3.xpose.msk.msra.mxu1 %vm393_vm0, %v369_v25  ;;  %315 = vst.msk [vmem:[#allocation4 + $0x10] sm:$0xff] %vm7812_vm9, %v4917_v13  ;;  %316 = vst.msk [vmem:[#allocation4 + $0x18] sm:$0xff] %vm7812_vm9, %v4917_v13 }
  0x2b   : > { %2502 = vmatprep.subr.msk.mxu0 %vm393_vm0, %v384_v26  ;;  %2558 = vmatprep.subr.msk.mxu1 %vm393_vm0, %v384_v26  ;;  %317 = vst.msk [vmem:[#allocation4 + $0x20] sm:$0xff] %vm7812_vm9, %v4917_v13  ;;  %318 = vst.msk [vmem:[#allocation4 + $0x28] sm:$0xff] %vm7812_vm9, %v4917_v13 }
  0x2c   : > { %319 = vst.msk [vmem:[#allocation4 + $0x30] sm:$0xff] %vm7812_vm9, %v4917_v13  ;;  %320 = vst.msk [vmem:[#allocation4 + $0x38] sm:$0xff] %vm7812_vm9, %v4917_v13 }
  0x2d   : > { %753 = vperm.xlu1 %3638, %v711_v36   ;;  %321 = vst.msk [vmem:[#allocation4 + $0x40] sm:$0xff] %vm7812_vm9, %v4917_v13  ;;  %322 = vst.msk [vmem:[#allocation4 + $0x48] sm:$0xff] %vm7812_vm9, %v4917_v13 }
  0x2e   : > { %2503 = vmatpush3.xpose.msk.msra.mxu0 %vm393_vm0, %v368_v29  ;;  %2574 = vmatpush3.xpose.msk.msra.mxu1 %vm393_vm0, %v368_v29  ;;  %323 = vst.msk [vmem:[#allocation4 + $0x50] sm:$0xff] %vm7812_vm9, %v4917_v13  ;;  %324 = vst.msk [vmem:[#allocation4 + $0x58] sm:$0xff] %vm7812_vm9, %v4917_v13 }
  0x2f   : > { %2504 = vmatprep.subr.msk.mxu0 %vm393_vm0, %v383_v30  ;;  %2559 = vmatprep.subr.msk.mxu1 %vm393_vm0, %v383_v30  ;;  %325 = vst.msk [vmem:[#allocation4 + $0x60] sm:$0xff] %vm7812_vm9, %v4917_v13  ;;  %326 = vst.msk [vmem:[#allocation4 + $0x68] sm:$0xff] %vm7812_vm9, %v4917_v13 }
  0x30   : > { %327 = vst.msk [vmem:[#allocation4 + $0x70] sm:$0xff] %vm7812_vm9, %v4917_v13  ;;  %328 = vst.msk [vmem:[#allocation4 + $0x78] sm:$0xff] %vm7812_vm9, %v4917_v13 }
  0x31   : > { %756 = vperm.xlu1 %3638, %v712_v39   ;;  %329 = vst.msk [vmem:[#allocation5] sm:$0xff] %vm7812_vm9, %v4917_v13  ;;  %330 = vst.msk [vmem:[#allocation5 + $0x8] sm:$0xff] %vm7812_vm9, %v4917_v13 }
  0x32   : > { %2505 = vmatpush3.xpose.msk.msra.mxu0 %vm393_vm0, %v367_v33  ;;  %2575 = vmatpush3.xpose.msk.msra.mxu1 %vm393_vm0, %v367_v33  ;;  %331 = vst.msk [vmem:[#allocation5 + $0x10] sm:$0xff] %vm7812_vm9, %v4917_v13  ;;  %332 = vst.msk [vmem:[#allocation5 + $0x18] sm:$0xff] %vm7812_vm9, %v4917_v13 }
  0x33   : > { %2506 = vmatprep.subr.msk.mxu0 %vm393_vm0, %v382_v34  ;;  %2560 = vmatprep.subr.msk.mxu1 %vm393_vm0, %v382_v34  ;;  %333 = vst.msk [vmem:[#allocation5 + $0x20] sm:$0xff] %vm7812_vm9, %v4917_v13  ;;  %334 = vst.msk [vmem:[#allocation5 + $0x28] sm:$0xff] %vm7812_vm9, %v4917_v13 }
  0x34   : > { %335 = vst.msk [vmem:[#allocation5 + $0x30] sm:$0xff] %vm7812_vm9, %v4917_v13  ;;  %336 = vst.msk [vmem:[#allocation5 + $0x38] sm:$0xff] %vm7812_vm9, %v4917_v13 }
  0x35   : > { %337 = vst.msk [vmem:[#allocation5 + $0x40] sm:$0xff] %vm7812_vm9, %v4917_v13  ;;  %338 = vst.msk [vmem:[#allocation5 + $0x48] sm:$0xff] %vm7812_vm9, %v4917_v13 }
  0x36   : > { %2507 = vmatpush3.xpose.msk.msra.mxu0 %vm393_vm0, %v366_v37  ;;  %2576 = vmatpush3.xpose.msk.msra.mxu1 %vm393_vm0, %v366_v37  ;;  %339 = vst.msk [vmem:[#allocation5 + $0x50] sm:$0xff] %vm7812_vm9, %v4917_v13  ;;  %340 = vst.msk [vmem:[#allocation5 + $0x58] sm:$0xff] %vm7812_vm9, %v4917_v13 }
  0x37   : > { %2508 = vmatprep.subr.msk.mxu0 %vm393_vm0, %v381_v38  ;;  %2561 = vmatprep.subr.msk.mxu1 %vm393_vm0, %v381_v38  ;;  %341 = vst.msk [vmem:[#allocation5 + $0x60] sm:$0xff] %vm7812_vm9, %v4917_v13  ;;  %342 = vst.msk [vmem:[#allocation5 + $0x68] sm:$0xff] %vm7812_vm9, %v4917_v13 }
  0x38   : > { %343 = vst.msk [vmem:[#allocation5 + $0x70] sm:$0xff] %vm7812_vm9, %v4917_v13  ;;  %344 = vst.msk [vmem:[#allocation5 + $0x78] sm:$0xff] %vm7812_vm9, %v4917_v13 }
  0x39   : > { %281 = vst.msk [vmem:[#allocation2] sm:$0xff] %vm7812_vm9, %v4916_v12  ;;  %282 = vst.msk [vmem:[#allocation2 + $0x8] sm:$0xff] %vm7812_vm9, %v4916_v12 }
  0x3a   : > { %2509 = vmatpush3.xpose.msk.msra.mxu0 %vm393_vm0, %v365_v40  ;;  %2577 = vmatpush3.xpose.msk.msra.mxu1 %vm393_vm0, %v365_v40  ;;  %283 = vst.msk [vmem:[#allocation2 + $0x10] sm:$0xff] %vm7812_vm9, %v4916_v12  ;;  %284 = vst.msk [vmem:[#allocation2 + $0x18] sm:$0xff] %vm7812_vm9, %v4916_v12 }
  0x3b   : > { %2510 = vmatprep.subr.msk.mxu0 %vm393_vm0, %v380_v41  ;;  %2562 = vmatprep.subr.msk.mxu1 %vm393_vm0, %v380_v41  ;;  %285 = vst.msk [vmem:[#allocation2 + $0x20] sm:$0xff] %vm7812_vm9, %v4916_v12  ;;  %286 = vst.msk [vmem:[#allocation2 + $0x28] sm:$0xff] %vm7812_vm9, %v4916_v12 }
  0x3c   : > { %287 = vst.msk [vmem:[#allocation2 + $0x30] sm:$0xff] %vm7812_vm9, %v4916_v12  ;;  %288 = vst.msk [vmem:[#allocation2 + $0x38] sm:$0xff] %vm7812_vm9, %v4916_v12 }
  0x3d   : > { %290 = vst.msk [vmem:[#allocation2 + $0x48] sm:$0xff] %vm7812_vm9, %v4916_v12  ;;  %291 = vst.msk [vmem:[#allocation2 + $0x50] sm:$0xff] %vm7812_vm9, %v4916_v12 }
  0x3e   : > { %2511 = vmatpush3.xpose.msk.msra.mxu0 %vm393_vm0, %v364_v42  ;;  %2578 = vmatpush3.xpose.msk.msra.mxu1 %vm393_vm0, %v364_v42  ;;  %292 = vst.msk [vmem:[#allocation2 + $0x58] sm:$0xff] %vm7812_vm9, %v4916_v12  ;;  %293 = vst.msk [vmem:[#allocation2 + $0x60] sm:$0xff] %vm7812_vm9, %v4916_v12 }
  0x3f   : > { %2512 = vmatprep.subr.msk.mxu0 %vm393_vm0, %v379_v43  ;;  %2563 = vmatprep.subr.msk.mxu1 %vm393_vm0, %v379_v43  ;;  %294 = vst.msk [vmem:[#allocation2 + $0x68] sm:$0xff] %vm7812_vm9, %v4916_v12  ;;  %295 = vst.msk [vmem:[#allocation2 + $0x70] sm:$0xff] %vm7812_vm9, %v4916_v12 }
  0x40   : > { %296 = vst.msk [vmem:[#allocation2 + $0x78] sm:$0xff] %vm7812_vm9, %v4916_v12 }
  0x42   : > { %2513 = vmatpush3.xpose.msk.msra.mxu0 %vm393_vm0, %v363_v44  ;;  %2579 = vmatpush3.xpose.msk.msra.mxu1 %vm393_vm0, %v363_v44 }
  0x43   : > { %2514 = vmatprep.subr.msk.mxu0 %vm393_vm0, %v378_v45  ;;  %2564 = vmatprep.subr.msk.mxu1 %vm393_vm0, %v378_v45 }
  0x46   : > { %2515 = vmatpush3.xpose.msk.msra.mxu0 %vm393_vm0, %v362_v46  ;;  %2580 = vmatpush3.xpose.msk.msra.mxu1 %vm393_vm0, %v362_v46 }
  0x47   : > { %2516 = vmatprep.subr.msk.mxu0 %vm393_vm0, %v377_v47  ;;  %2565 = vmatprep.subr.msk.mxu1 %vm393_vm0, %v377_v47 }
  0x4a   : > { %2517 = vmatpush3.xpose.msk.msra.mxu0 %vm393_vm0, %v361_v48  ;;  %2581 = vmatpush3.xpose.msk.msra.mxu1 %vm393_vm0, %v361_v48 }
  0x4d   : > { %2519 = vmatmul.mubr.msk.f32.vlgmr.msra.gmra.mxu0 %vm393_vm0, %v5012_v8  ;;  %2535 = vmatmul.mubr.msk.f32.vlgmr.msra.gmra.mxu1 %vm393_vm0, %v5020_v10 }
  0x4e   : > { %2520 = vmatprep.mubr.msk.f32.mxu0 %vm393_vm0, %v346_v49  ;;  %2536 = vmatprep.mubr.msk.f32.mxu1 %vm393_vm0, %v354_v50 }
  0x51   : > { %2521 = vmatmul.mubr.msk.f32.gmra.mxu0 %vm393_vm0, %v346_v49  ;;  %2537 = vmatmul.mubr.msk.f32.gmra.mxu1 %vm393_vm0, %v354_v50 }
  0x52   : > { %2522 = vmatprep.mubr.msk.f32.mxu0 %vm393_vm0, %v347_v51  ;;  %2538 = vmatprep.mubr.msk.f32.mxu1 %vm393_vm0, %v355_v52 }
  0x55   : > { %2523 = vmatmul.mubr.msk.f32.gmra.mxu0 %vm393_vm0, %v347_v51  ;;  %2539 = vmatmul.mubr.msk.f32.gmra.mxu1 %vm393_vm0, %v355_v52 }
  0x56   : > { %2524 = vmatprep.mubr.msk.f32.mxu0 %vm393_vm0, %v348_v53  ;;  %2540 = vmatprep.mubr.msk.f32.mxu1 %vm393_vm0, %v356_v54 }
  0x59   : > { %2525 = vmatmul.mubr.msk.f32.gmra.mxu0 %vm393_vm0, %v348_v53  ;;  %2541 = vmatmul.mubr.msk.f32.gmra.mxu1 %vm393_vm0, %v356_v54 }
  0x5a   : > { %2526 = vmatprep.mubr.msk.f32.mxu0 %vm393_vm0, %v349_v55  ;;  %2542 = vmatprep.mubr.msk.f32.mxu1 %vm393_vm0, %v357_v56 }
  0x5d   : > { %2527 = vmatmul.mubr.msk.f32.gmra.mxu0 %vm393_vm0, %v349_v55  ;;  %2543 = vmatmul.mubr.msk.f32.gmra.mxu1 %vm393_vm0, %v357_v56 }
  0x5e   : > { %2528 = vmatprep.mubr.msk.f32.mxu0 %vm393_vm0, %v350_v57  ;;  %2544 = vmatprep.mubr.msk.f32.mxu1 %vm393_vm0, %v358_v58 }
  0x61   : > { %2529 = vmatmul.mubr.msk.f32.gmra.mxu0 %vm393_vm0, %v350_v57  ;;  %2545 = vmatmul.mubr.msk.f32.gmra.mxu1 %vm393_vm0, %v358_v58 }
  0x62   : > { %2530 = vmatprep.mubr.msk.f32.mxu0 %vm393_vm0, %v351_v59  ;;  %2546 = vmatprep.mubr.msk.f32.mxu1 %vm393_vm0, %v359_v60 }
  0x65   : > { %2531 = vmatmul.mubr.msk.f32.gmra.mxu0 %vm393_vm0, %v351_v59  ;;  %2547 = vmatmul.mubr.msk.f32.gmra.mxu1 %vm393_vm0, %v359_v60 }
  0x66   : > { %2532 = vmatprep.mubr.msk.f32.mxu0 %vm393_vm0, %v352_v61  ;;  %2548 = vmatprep.mubr.msk.f32.mxu1 %vm393_vm0, %v360_v62 }
  0x69   : > { %2533 = vmatmul.mubr.msk.f32.gmra.mxu0 %vm393_vm0, %v352_v61  ;;  %2549 = vmatmul.mubr.msk.f32.gmra.mxu1 %vm393_vm0, %v360_v62 }
  0x90   : > { %v5225_v6 = vpop.permute.xlu1 %723  ;;  %v5233_v8 = vpop.permute.xlu0 %717 }
  0x91   : > { %7983 = vst [vmem:[#allocation9_spill] sm:$0xff] %v5225_v6  ;;  %vm7934_vm1 = vcmp.eq.s32.totalorder %v5225_v6, %v5221_v4  ;;  %vm7935_vm2 = vcmp.eq.s32.totalorder %v5225_v6, %v5223_v5  ;;  %7985 = vst [vmem:[#allocation11_spill] sm:$0xff] %v5233_v8  ;;  %vm7937_vm5 = vcmp.eq.s32.totalorder %v5233_v8, %v5221_v4  ;;  %v5696_v6 = vmov 0  }
  0x92   : > { %vm7936_vm6 = vcmp.eq.s32.totalorder %v5233_v8, %v5223_v5  ;;  %v5686_v8 = vmov 0  }
  0x94   : > { %v5231_v7 = vpop.permute.xlu1 %726  ;;  %v5251_v11 = vpop.permute.xlu0 %720 }
  0x95   : > { %7984 = vst [vmem:[#allocation10_spill] sm:$0xff] %v5231_v7  ;;  %vm7938_vm3 = vcmp.eq.s32.totalorder %v5231_v7, %v5221_v4  ;;  %vm7939_vm4 = vcmp.eq.s32.totalorder %v5231_v7, %v5223_v5  ;;  %7988 = vst [vmem:[#allocation14_spill] sm:$0xff] %v5251_v11  ;;  %vm7940_vm12 = vcmp.eq.s32.totalorder %v5251_v11, %v5221_v4  ;;  %v5680_v7 = vmov 0  }
  0x96   : > { %vm7941_vm13 = vcmp.eq.s32.totalorder %v5251_v11, %v5223_v5  ;;  %v5678_v11 = vmov 0  }
  0x98   : > { %v5243_v9 = vpop.permute.xlu1 %732  ;;  %v5343_v15 = vpop.permute.xlu0 %729 }
  0x99   : > { %7986 = vst [vmem:[#allocation12_spill] sm:$0xff] %v5243_v9  ;;  %vm7944_vm7 = vcmp.eq.s32.totalorder %v5243_v9, %v5221_v4  ;;  %vm7943_vm8 = vcmp.eq.s32.totalorder %v5243_v9, %v5223_v5  ;;  %7990 = vst [vmem:[#allocation16_spill] sm:$0xff] %v5343_v15  ;;  %v5666_v15 = vmov 0   ;;  %v5672_v9 = vmov 0  }
  0x9a   : > { %v5688_v5 = vmov 0  }
  0x9c   : > { %v5249_v10 = vpop.permute.xlu1 %738  ;;  %v5355_v17 = vpop.permute.xlu0 %735 }
  0x9d   : > { %7987 = vst [vmem:[#allocation13_spill] sm:$0xff] %v5249_v10  ;;  %7992 = vst [vmem:[#allocation18_spill] sm:$0xff] %v5355_v17  ;;  %v5662_v17 = vmov 0   ;;  %v5664_v10 = vmov 0  }
  0xa0   : > { %v5341_v14 = vpop.permute.xlu1 %744  ;;  %v5367_v19 = vpop.permute.xlu0 %741 }
  0xa1   : > { %7989 = vst [vmem:[#allocation15_spill] sm:$0xff] %v5341_v14  ;;  %7994 = vst [vmem:[#allocation20_spill] sm:$0xff] %v5367_v19  ;;  %vm7953_vm9 = vcmp.eq.s32.totalorder %v5367_v19, %v5221_v4  ;;  %v5658_v19 = vmov 0   ;;  %v5660_v14 = vmov 0   ;;  %v5694_v4 = vmov 0  }
  0xa4   : > { %v5353_v16 = vpop.permute.xlu1 %747  ;;  %v5379_v21 = vpop.permute.xlu0 %750 }
  0xa5   : > { %7991 = vst [vmem:[#allocation17_spill] sm:$0xff] %v5353_v16  ;;  %7996 = vst [vmem:[#allocation22_spill] sm:$0xff] %v5379_v21  ;;  %v5654_v16 = vmov 0   ;;  %v5656_v21 = vmov 0  }
  0xa8   : > { %v5365_v18 = vpop.permute.xlu1 %753 }
  0xa9   : > { %7993 = vst [vmem:[#allocation19_spill] sm:$0xff] %v5365_v18  ;;  %v5650_v18 = vmov 0  }
  0xac   : > { %v5377_v20 = vpop.permute.xlu1 %756 }
  0xad   : > { %7995 = vst [vmem:[#allocation21_spill] sm:$0xff] %v5377_v20  ;;  %v5652_v20 = vmov 0  }
 0x10d   : > { %v5389_v22 = vpop.f32.mrf.mxu0  ;;  %v5391_v23 = vpop.f32.mrf.mxu1 }
 0x10e   : > { %7997 = vst [vmem:[#allocation23_spill] sm:$0xff] %v5389_v22  ;;  %7998 = vst [vmem:[#allocation24_spill] sm:$0xff] %v5391_v23 }
 0x10f   : > { %v5393_v24 = vpop.f32.mrf.mxu0  ;;  %v5395_v25 = vpop.f32.mrf.mxu1 }
 0x110   : > { %7999 = vst [vmem:[#allocation25_spill] sm:$0xff] %v5393_v24  ;;  %8000 = vst [vmem:[#allocation26_spill] sm:$0xff] %v5395_v25  ;;  %v820_v26 = vmax.f32 %v5389_v22, %v5393_v24  ;;  %v844_v27 = vmax.f32 %v5391_v23, %v5395_v25  ;;  %v5606_v25 = vmov 0   ;;  %v5608_v23 = vmov 0  }
 0x111   : > { %v5401_v28 = vpop.f32.mrf.mxu0  ;;  %v5403_v29 = vpop.f32.mrf.mxu1  ;;  %v5638_v24 = vmov 0   ;;  %v5640_v22 = vmov 0  }
 0x112   : > { %8001 = vst [vmem:[#allocation27_spill] sm:$0xff] %v5401_v28  ;;  %8002 = vst [vmem:[#allocation28_spill] sm:$0xff] %v5403_v29  ;;  %845 = vmax.xlane.f32.xlu1 %v844_v27  ;;  %821 = vmax.xlane.f32.xlu0 %v820_v26 }
 0x113   : > { %v5405_v30 = vpop.f32.mrf.mxu0  ;;  %v5407_v31 = vpop.f32.mrf.mxu1 }
 0x114   : > { %8003 = vst [vmem:[#allocation29_spill] sm:$0xff] %v5405_v30  ;;  %8004 = vst [vmem:[#allocation30_spill] sm:$0xff] %v5407_v31  ;;  %v823_v32 = vmax.f32 %v5401_v28, %v5405_v30  ;;  %v847_v33 = vmax.f32 %v5403_v29, %v5407_v31  ;;  %v5610_v31 = vmov 0   ;;  %v5612_v29 = vmov 0  }
 0x115   : > { %v5413_v34 = vpop.f32.mrf.mxu0  ;;  %v5415_v35 = vpop.f32.mrf.mxu1  ;;  %v5630_v30 = vmov 0   ;;  %v5632_v28 = vmov 0  }
 0x116   : > { %8005 = vst [vmem:[#allocation31_spill] sm:$0xff] %v5413_v34  ;;  %8006 = vst [vmem:[#allocation32_spill] sm:$0xff] %v5415_v35  ;;  %848 = vmax.xlane.f32.xlu0 %v847_v33  ;;  %824 = vmax.xlane.f32.xlu1 %v823_v32  ;;  %v714_v32 = vld [vmem:[%s5032_s25 + $0x78] sm:$0xff]  ;;  %v713_v33 = vld [vmem:[%s5032_s25 + $0x70] sm:$0xff] }
 0x117   : > { %v5417_v36 = vpop.f32.mrf.mxu0  ;;  %v5419_v37 = vpop.f32.mrf.mxu1 }
 0x118   : > { %8007 = vst [vmem:[#allocation33_spill] sm:$0xff] %v5417_v36  ;;  %8008 = vst [vmem:[#allocation34_spill] sm:$0xff] %v5419_v37  ;;  %v826_v38 = vmax.f32 %v5413_v34, %v5417_v36  ;;  %v850_v39 = vmax.f32 %v5415_v35, %v5419_v37  ;;  %v5571_v37 = vld [vmem:[#allocation2 + $0x78] sm:$0xff]  ;;  %v5642_v36 = vmov 0   ;;  %v5644_v34 = vmov 0  }
 0x119   : > { %v5425_v40 = vpop.f32.mrf.mxu0  ;;  %v5427_v41 = vpop.f32.mrf.mxu1  ;;  %8060 = vst [vmem:[#allocation85_spill] sm:$0xff] %v5571_v37 }
 0x11a   : > { %8009 = vst [vmem:[#allocation35_spill] sm:$0xff] %v5425_v40  ;;  %8010 = vst [vmem:[#allocation36_spill] sm:$0xff] %v5427_v41  ;;  %827 = vmax.xlane.f32.xlu0 %v826_v38  ;;  %851 = vmax.xlane.f32.xlu1 %v850_v39  ;;  %v5496_v38 = vld [vmem:[#allocation2 + $0x40] sm:$0xff] }
 0x11b   : > { %v5429_v42 = vpop.f32.mrf.mxu0  ;;  %v5431_v43 = vpop.f32.mrf.mxu1  ;;  %8030 = vst [vmem:[#allocation55_spill] sm:$0xff] %v5496_v38  ;;  %v5498_v39 = vld [vmem:[#allocation2] sm:$0xff] }
 0x11c   : > { %8011 = vst [vmem:[#allocation37_spill] sm:$0xff] %v5429_v42  ;;  %8012 = vst [vmem:[#allocation38_spill] sm:$0xff] %v5431_v43  ;;  %v829_v44 = vmax.f32 %v5425_v40, %v5429_v42  ;;  %v853_v49 = vmax.f32 %v5427_v41, %v5431_v43  ;;  %v5602_v43 = vmov 0   ;;  %v5604_v41 = vmov 0  }
 0x11d   : > { %v5435_v45 = vpop.f32.mrf.mxu0  ;;  %v5437_v46 = vpop.f32.mrf.mxu1  ;;  %8031 = vst [vmem:[#allocation56_spill] sm:$0xff] %v5498_v39  ;;  %v5634_v42 = vmov 0   ;;  %v5636_v40 = vmov 0  }
 0x11e   : > { %8013 = vst [vmem:[#allocation39_spill] sm:$0xff] %v5435_v45  ;;  %8014 = vst [vmem:[#allocation40_spill] sm:$0xff] %v5437_v46  ;;  %830 = vmax.xlane.f32.xlu0 %v829_v44 }
 0x11f   : > { %v5439_v47 = vpop.f32.mrf.mxu0  ;;  %v5441_v48 = vpop.f32.mrf.mxu1 }
 0x120   : > { %8015 = vst [vmem:[#allocation41_spill] sm:$0xff] %v5439_v47  ;;  %8016 = vst [vmem:[#allocation42_spill] sm:$0xff] %v5441_v48  ;;  %v832_v50 = vmax.f32 %v5435_v45, %v5439_v47  ;;  %v856_v55 = vmax.f32 %v5437_v46, %v5441_v48  ;;  %v5551_v48 = vld [vmem:[#allocation2 + $0x68] sm:$0xff]  ;;  %v5553_v46 = vld [vmem:[#allocation2 + $0x30] sm:$0xff]  ;;  %v5622_v47 = vmov 0   ;;  %v5624_v45 = vmov 0  }
 0x121   : > { %v5447_v51 = vpop.f32.mrf.mxu0  ;;  %v5449_v52 = vpop.f32.mrf.mxu1  ;;  %8052 = vst [vmem:[#allocation77_spill] sm:$0xff] %v5551_v48  ;;  %8053 = vst [vmem:[#allocation78_spill] sm:$0xff] %v5553_v46 }
 0x122   : > { %8017 = vst [vmem:[#allocation43_spill] sm:$0xff] %v5447_v51  ;;  %8018 = vst [vmem:[#allocation44_spill] sm:$0xff] %v5449_v52  ;;  %854 = vmax.xlane.f32.xlu0 %v853_v49  ;;  %833 = vmax.xlane.f32.xlu1 %v832_v50 }
 0x123   : > { %v5451_v53 = vpop.f32.mrf.mxu0  ;;  %v5453_v54 = vpop.f32.mrf.mxu1 }
 0x124   : > { %8019 = vst [vmem:[#allocation45_spill] sm:$0xff] %v5451_v53  ;;  %8020 = vst [vmem:[#allocation46_spill] sm:$0xff] %v5453_v54  ;;  %v835_v56 = vmax.f32 %v5447_v51, %v5451_v53  ;;  %v859_v61 = vmax.f32 %v5449_v52, %v5453_v54  ;;  %v5561_v54 = vld [vmem:[#allocation2 + $0x70] sm:$0xff]  ;;  %v5563_v52 = vld [vmem:[#allocation2 + $0x38] sm:$0xff]  ;;  %v5626_v53 = vmov 0   ;;  %v5628_v51 = vmov 0  }
 0x125   : > { %v5459_v57 = vpop.f32.mrf.mxu0  ;;  %v5461_v58 = vpop.f32.mrf.mxu1  ;;  %8056 = vst [vmem:[#allocation81_spill] sm:$0xff] %v5561_v54  ;;  %8057 = vst [vmem:[#allocation82_spill] sm:$0xff] %v5563_v52 }
 0x126   : > { %8021 = vst [vmem:[#allocation47_spill] sm:$0xff] %v5459_v57  ;;  %8022 = vst [vmem:[#allocation48_spill] sm:$0xff] %v5461_v58  ;;  %857 = vmax.xlane.f32.xlu1 %v856_v55  ;;  %836 = vmax.xlane.f32.xlu0 %v835_v56  ;;  %v5506_v56 = vld [vmem:[#allocation2 + $0x48] sm:$0xff] }
 0x127   : > { %v5463_v59 = vpop.f32.mrf.mxu0  ;;  %v5465_v60 = vpop.f32.mrf.mxu1  ;;  %8034 = vst [vmem:[#allocation59_spill] sm:$0xff] %v5506_v56 }
 0x128   : > { %8023 = vst [vmem:[#allocation49_spill] sm:$0xff] %v5463_v59  ;;  %8024 = vst [vmem:[#allocation50_spill] sm:$0xff] %v5465_v60  ;;  %v838_v62 = vmax.f32 %v5459_v57, %v5463_v59  ;;  %v862_v12 = vmax.f32 %v5461_v58, %v5465_v60  ;;  %v5614_v59 = vmov 0   ;;  %v5616_v57 = vmov 0  }
 0x129   : > { %v5471_v1 = vpop.f32.mrf.mxu0  ;;  %v5473_v2 = vpop.f32.mrf.mxu1 }
 0x12a   : > { %8025 = vst [vmem:[#allocation51_spill] sm:$0xff] %v5471_v1  ;;  %8026 = vst [vmem:[#allocation52_spill] sm:$0xff] %v5473_v2  ;;  %860 = vmax.xlane.f32.xlu0 %v859_v61  ;;  %839 = vmax.xlane.f32.xlu1 %v838_v62  ;;  %v5508_v61 = vld [vmem:[#allocation2 + $0x8] sm:$0xff] }
 0x12b   : > { %v5475_v3 = vpop.f32.mrf.mxu0  ;;  %v5481_v26 = vpop.f32.mrf.mxu1  ;;  %8035 = vst [vmem:[#allocation60_spill] sm:$0xff] %v5508_v61 }
 0x12c   : > { %8027 = vst [vmem:[#allocation53_spill] sm:$0xff] %v5475_v3  ;;  %v841_v13 = vmax.f32 %v5471_v1, %v5475_v3  ;;  %8028 = vst [vmem:[#allocation54_spill] sm:$0xff] %v5481_v26  ;;  %v865_v27 = vmax.f32 %v5473_v2, %v5481_v26  ;;  %v5618_v3 = vmov 0   ;;  %v5620_v1 = vmov 0  }
 0x12e   : > { %863 = vmax.xlane.f32.xlu1 %v862_v12  ;;  %842 = vmax.xlane.f32.xlu0 %v841_v13 }
 0x132   : > { %866 = vmax.xlane.f32.xlu0 %v865_v27 }
 0x13f   : > { %762 = vperm.xlu1 %3638, %v714_v32   ;;  %v5516_v32 = vld [vmem:[#allocation2 + $0x10] sm:$0xff] }
 0x140   : > { %8038 = vst [vmem:[#allocation63_spill] sm:$0xff] %v5516_v32 }
 0x148   : > { %759 = vperm.xlu0 %3637, %v713_v33   ;;  %v5518_v33 = vld [vmem:[#allocation2 + $0x50] sm:$0xff] }
 0x149   : > { %8039 = vst [vmem:[#allocation64_spill] sm:$0xff] %v5518_v33 }
 0x19b   : > { %v846_v44 = vpop.xlane.xlu1 %845  ;;  %v822_v49 = vpop.xlane.xlu0 %821 }
 0x19c   : > { %v5501_v50 = vmax.f32 %v5496_v38, %v846_v44  ;;  %v5504_v55 = vmax.f32 %v5498_v39, %v822_v49  ;;  %v5526_v39 = vld [vmem:[#allocation2 + $0x18] sm:$0xff] }
 0x19d   : > { %8042 = vst [vmem:[#allocation67_spill] sm:$0xff] %v5526_v39 }
 0x19e   : > { %8032 = vst [vmem:[#allocation57_spill] sm:$0xff] %v5501_v50  ;;  %8033 = vst [vmem:[#allocation58_spill] sm:$0xff] %v5504_v55  ;;  %v5690_v50 = vmov 0   ;;  %v5712_v55 = vmov 0  }
 0x19f   : > { %v849_v62 = vpop.xlane.xlu0 %848  ;;  %v825_v12 = vpop.xlane.xlu1 %824 }
 0x1a0   : > { %v5511_v13 = vmax.f32 %v5506_v56, %v849_v62  ;;  %v5514_v27 = vmax.f32 %v5508_v61, %v825_v12  ;;  %v5531_v12 = vld [vmem:[#allocation2 + $0x58] sm:$0xff]  ;;  %v5533_v56 = vld [vmem:[#allocation2 + $0x20] sm:$0xff] }
 0x1a1   : > { %8044 = vst [vmem:[#allocation69_spill] sm:$0xff] %v5531_v12  ;;  %8045 = vst [vmem:[#allocation70_spill] sm:$0xff] %v5533_v56 }
 0x1a2   : > { %8036 = vst [vmem:[#allocation61_spill] sm:$0xff] %v5511_v13  ;;  %8037 = vst [vmem:[#allocation62_spill] sm:$0xff] %v5514_v27  ;;  %v5692_v13 = vmov 0   ;;  %v5708_v27 = vmov 0  }
 0x1a3   : > { %v828_v44 = vpop.xlane.xlu0 %827  ;;  %v852_v63 = vpop.xlane.xlu1 %851 }
 0x1a4   : > { %v5521_v49 = vmax.f32 %v5516_v32, %v828_v44  ;;  %v5524_v38 = vmax.f32 %v5518_v33, %v852_v63  ;;  %v5541_v63 = vld [vmem:[#allocation2 + $0x60] sm:$0xff]  ;;  %v5543_v33 = vld [vmem:[#allocation2 + $0x28] sm:$0xff] }
 0x1a5   : > { %8048 = vst [vmem:[#allocation73_spill] sm:$0xff] %v5541_v63  ;;  %8049 = vst [vmem:[#allocation74_spill] sm:$0xff] %v5543_v33 }
 0x1a6   : > { %8040 = vst [vmem:[#allocation65_spill] sm:$0xff] %v5521_v49  ;;  %8041 = vst [vmem:[#allocation66_spill] sm:$0xff] %v5524_v38  ;;  %v5682_v38 = vmov 0   ;;  %v5714_v49 = vmov 0  }
 0x1a7   : > { %v831_v60 = vpop.xlane.xlu0 %830 }
 0x1a8   : > { %v5529_v62 = vmax.f32 %v5526_v39, %v831_v60 }
 0x1aa   : > { %8043 = vst [vmem:[#allocation68_spill] sm:$0xff] %v5529_v62  ;;  %v5710_v62 = vmov 0  }
 0x1ab   : > { %v855_v61 = vpop.xlane.xlu0 %854  ;;  %v834_v58 = vpop.xlane.xlu1 %833  ;;  %8064 = vst [vmem:[#allocation89_spill] sm:$0xff] %v5710_v62 }
 0x1ac   : > { %v5536_v26 = vmax.f32 %v5531_v12, %v855_v61  ;;  %v5539_v44 = vmax.f32 %v5533_v56, %v834_v58 }
 0x1ae   : > { %8046 = vst [vmem:[#allocation71_spill] sm:$0xff] %v5536_v26  ;;  %8047 = vst [vmem:[#allocation72_spill] sm:$0xff] %v5539_v44  ;;  %v5684_v26 = vmov 0   ;;  %v5702_v44 = vmov 0  }
 0x1af   : > { %v858_v32 = vpop.xlane.xlu1 %857  ;;  %v837_v2 = vpop.xlane.xlu0 %836 }
 0x1b0   : > { %v5546_v60 = vmax.f32 %v5541_v63, %v858_v32  ;;  %v5549_v39 = vmax.f32 %v5543_v33, %v837_v2 }
 0x1b2   : > { %8050 = vst [vmem:[#allocation75_spill] sm:$0xff] %v5546_v60  ;;  %8051 = vst [vmem:[#allocation76_spill] sm:$0xff] %v5549_v39  ;;  %v5674_v60 = vmov 0   ;;  %v5704_v39 = vmov 0  }
 0x1b3   : > { %v861_v61 = vpop.xlane.xlu0 %860  ;;  %v840_v12 = vpop.xlane.xlu1 %839 }
 0x1b4   : > { %v5556_v58 = vmax.f32 %v5551_v48, %v861_v61  ;;  %v5559_v56 = vmax.f32 %v5553_v46, %v840_v12  ;;  %v5594_v46 = vmov 0  }
 0x1b6   : > { %8054 = vst [vmem:[#allocation79_spill] sm:$0xff] %v5556_v58  ;;  %8055 = vst [vmem:[#allocation80_spill] sm:$0xff] %v5559_v56  ;;  %v5676_v58 = vmov 0   ;;  %v5698_v56 = vmov 0  }
 0x1b7   : > { %v864_v32 = vpop.xlane.xlu1 %863  ;;  %v843_v63 = vpop.xlane.xlu0 %842 }
 0x1b8   : > { %v5566_v2 = vmax.f32 %v5561_v54, %v864_v32  ;;  %v5569_v33 = vmax.f32 %v5563_v52, %v843_v63  ;;  %v5588_v63 = vmov 0   ;;  %v5590_v32 = vmov 0  }
 0x1b9   : > { %v5592_v54 = vmov 0   ;;  %v5596_v52 = vmov 0  }
 0x1ba   : > { %8058 = vst [vmem:[#allocation83_spill] sm:$0xff] %v5566_v2  ;;  %8059 = vst [vmem:[#allocation84_spill] sm:$0xff] %v5569_v33  ;;  %v5668_v2 = vmov 0   ;;  %v5700_v33 = vmov 0  }
 0x1bb   : > { %v5573_v35 = vpop.permute.xlu1 %762  ;;  %v867_v61 = vpop.xlane.xlu0 %866 }
 0x1bc   : > { %8061 = vst [vmem:[#allocation86_spill] sm:$0xff] %v5573_v35  ;;  %v5580_v12 = vmax.f32 %v5571_v37, %v867_v61  ;;  %v5598_v61 = vmov 0   ;;  %v5600_v37 = vmov 0   ;;  %v5648_v35 = vmov 0  }
 0x1be   : > { %8062 = vst [vmem:[#allocation87_spill] sm:$0xff] %v5580_v12  ;;  %v5670_v12 = vmov 0  }
 0x1c0   : > { %893 = sbr.rel (%p5491_p7) target bundleno = 638 (0x27e), region = 44 }
 0x1c3   : > { %v5582_v48 = vpop.permute.xlu0 %759 }
 0x1c4   : > { %8063 = vst [vmem:[#allocation88_spill] sm:$0xff] %v5582_v48  ;;  %v5646_v48 = vmov 0  }
 0x1c5   : > { %v4918_v0 = vmov 0   ;;  %v8065_v1 = vld [vmem:[#allocation65_spill] sm:$0xff]  ;;  %v8066_v2 = vld [vmem:[#allocation58_spill] sm:$0xff]  ;;  %v8067_v3 = vld [vmem:[#allocation68_spill] sm:$0xff]  ;;  %v5724_v7 = vstv %s5487_s12  ;;  %v8070_v8 = vlaneseq  ;;  %v4919_v24 = vmov 0.0  }
 0x1c6   : > { %3640 = vset.pattern.permute.xlu1 %v4918_v0  ;;  %3639 = vset.pattern.permute.xlu0 %v4918_v0  ;;  %v8068_v4 = vld [vmem:[#allocation62_spill] sm:$0xff]  ;;  %v8071_v10 = vld [vmem:[#allocation76_spill] sm:$0xff]  ;;  %v8076_v20 = vld [vmem:[#allocation7_spill] sm:$0xff] }
 0x1c7   : > { %978 = vperm.xlu1 %3640, %v8065_v1   ;;  %968 = vperm.xlu0 %3639, %v8066_v2   ;;  %v8069_v5 = vld [vmem:[#allocation6_spill] sm:$0xff]  ;;  %v5727_v9 = vand.u32 127, %v8070_v8  ;;  %v8072_v11 = vld [vmem:[#allocation72_spill] sm:$0xff]  ;;  %v8077_v21 = vld [vmem:[#allocation61_spill] sm:$0xff] }
 0x1c8   : > { %v897_v6 = vadd.s32 16, %v8069_v5  ;;  %v8073_v16 = vld [vmem:[#allocation84_spill] sm:$0xff]  ;;  %v5741_v18 = vadd.s32 %v5724_v7, %v8069_v5  ;;  %v8078_v22 = vld [vmem:[#allocation57_spill] sm:$0xff]  ;;  %v898_v25 = vadd.s32 24, %v8069_v5  ;;  %v896_v28 = vadd.s32 8, %v8069_v5  ;;  %v8085_v37 = vld [vmem:[#allocation71_spill] sm:$0xff] }
 0x1c9   : > { %v5735_v15 = vadd.s32 128, %v5727_v9  ;;  %v8074_v17 = vld [vmem:[#allocation80_spill] sm:$0xff]  ;;  %v8086_v40 = vld [vmem:[#allocation66_spill] sm:$0xff]  ;;  %v900_v42 = vadd.s32 40, %v8069_v5  ;;  %v899_v45 = vadd.s32 32, %v8069_v5  ;;  %v8091_v51 = vld [vmem:[#allocation79_spill] sm:$0xff] }
 0x1ca   : > { %v5732_v14 = vadd.s32 %v5724_v7, %v897_v6  ;;  %v8079_v23 = vld [vmem:[#allocation8_spill] sm:$0xff]  ;;  %vm934_vm10 = vcmp.ne.s32.totalorder %v5741_v18, %v5727_v9  ;;  %v5789_v31 = vadd.s32 %v5724_v7, %v898_v25  ;;  %v5795_v34 = vadd.s32 %v5724_v7, %v896_v28  ;;  %v8092_v52 = vld [vmem:[#allocation75_spill] sm:$0xff]  ;;  %v8104_v44 = vld [vmem:[#allocation13_spill] sm:$0xff] }
 0x1cb   : > { %983 = vperm.xlu1 %3640, %v8067_v3   ;;  %973 = vperm.xlu0 %3639, %v8068_v4   ;;  %v5834_v47 = vadd.s32 %v5724_v7, %v900_v42  ;;  %v5848_v54 = vadd.s32 %v5724_v7, %v899_v45  ;;  %v902_v50 = vadd.s32 56, %v8069_v5  ;;  %v8096_v55 = vld [vmem:[#allocation87_spill] sm:$0xff]  ;;  %v8098_v13 = vld [vmem:[#allocation16_spill] sm:$0xff]  ;;  %v901_v27 = vadd.s32 48, %v8069_v5  ;;  %v8107_v63 = vld [vmem:[#allocation18_spill] sm:$0xff] }
 0x1cc   : > { %vm938_vm11 = vcmp.ne.s32.totalorder %v5732_v14, %v5727_v9  ;;  %vm939_vm0 = vcmp.ne.s32.totalorder %v5732_v14, %v5735_v15  ;;  %v8097_v56 = vld [vmem:[#allocation83_spill] sm:$0xff]  ;;  %v904_v33 = vadd.s32 72, %v8069_v5  ;;  %v903_v12 = vadd.s32 64, %v8069_v5  ;;  %v8113_v2 = vld [vmem:[#allocation20_spill] sm:$0xff]  ;;  %v8115_v8 = vld [vmem:[#allocation22_spill] sm:$0xff] }
 0x1cd   : > { %vm1178_vm15 = vmand %vm7934_vm1, %vm938_vm11  ;;  %vm935_vm1 = vcmp.ne.s32.totalorder %v5741_v18, %v5735_v15  ;;  %v5900_v49 = vadd.s32 %v5724_v7, %v902_v50  ;;  %v5906_v62 = vadd.s32 %v5724_v7, %v901_v27  ;;  %v8110_v61 = vld [vmem:[#allocation15_spill] sm:$0xff]  ;;  %v906_v0 = vadd.s32 88, %v8069_v5  ;;  %v8122_v46 = vld [vmem:[#allocation21_spill] sm:$0xff] }
 0x1ce   : > { %vm1179_vm14 = vmand %vm7935_vm2, %vm939_vm0  ;;  %v5762_v36 = vsel %vm1178_vm15, 1.0, %v4919_v24   ;;  %v5919_v60 = vadd.s32 %v5724_v7, %v904_v33  ;;  %v5958_v32 = vadd.s32 %v5724_v7, %v903_v12  ;;  %v905_v6 = vadd.s32 80, %v8069_v5  ;;  %v8132_v12 = vld [vmem:[#allocation88_spill] sm:$0xff]  ;;  %v8140_v39 = vld [vmem:[#allocation35_spill] sm:$0xff] }
 0x1cf   : > { %993 = vperm.xlu1 %3640, %v8071_v10   ;;  %988 = vperm.xlu0 %3639, %v8072_v11   ;;  %8080 = vst [vmem:[#allocation89_spill] sm:$0xff] %v5762_v36  ;;  %vm1174_vm15 = vmand %vm7937_vm5, %vm934_vm10  ;;  %vm936_vm5 = vcmp.ne.s32.totalorder %v5795_v34, %v5727_v9  ;;  %v6002_v4 = vadd.s32 %v5724_v7, %v906_v0  ;;  %v908_v11 = vadd.s32 104, %v8069_v5  ;;  %v8141_v36 = vld [vmem:[#allocation37_spill] sm:$0xff]  ;;  %v8142_v48 = vld [vmem:[#allocation27_spill] sm:$0xff] }
 0x1d0   : > { %vm1175_vm2 = vmand %vm7936_vm6, %vm935_vm1  ;;  %v5786_v30 = vsel %vm1174_vm15, 1.0, %v4919_v24   ;;  %vm941_vm15 = vcmp.ne.s32.totalorder %v5789_v31, %v5735_v15  ;;  %8102 = vst [vmem:[#allocation98_spill] sm:$0xff] %v5900_v49  ;;  %v6019_v10 = vadd.s32 %v5724_v7, %v905_v6 }
 0x1d1   : > { %8083 = vst [vmem:[#allocation91_spill] sm:$0xff] %v5786_v30  ;;  %v5792_v35 = vsel %vm1175_vm2, 1.0, %v4919_v24   ;;  %vm1181_vm6 = vmand %vm7939_vm4, %vm941_vm15  ;;  %v6054_v19 = vadd.s32 %v5724_v7, %v908_v11 }
 0x1d2   : > { %8084 = vst [vmem:[#allocation92_spill] sm:$0xff] %v5792_v35  ;;  %vm1176_vm4 = vmand %vm7940_vm12, %vm936_vm5  ;;  %vm7945_vm12 = vcmp.ne.s32.totalorder %v5834_v47, %v5735_v15 }
 0x1d3   : > { %1003 = vperm.xlu1 %3640, %v8073_v16   ;;  %998 = vperm.xlu0 %3639, %v8074_v17   ;;  %v5845_v53 = vsel %vm1176_vm4, 1.0, %v4919_v24   ;;  %8103 = vst [vmem:[#allocation99_spill] sm:$0xff] %v5906_v62  ;;  %v8118_v16 = vld [vmem:[#allocation17_spill] sm:$0xff] }
 0x1d4   : > { %8093 = vst [vmem:[#allocation95_spill] sm:$0xff] %v5845_v53 }
 0x1d7   : > { %1013 = vperm.xlu1 %3640, %v8077_v21   ;;  %1008 = vperm.xlu0 %3639, %v8078_v22   ;;  %v5769_v22 = vsel %vm1179_vm14, 1.0, %v4919_v24   ;;  %vm940_vm14 = vcmp.ne.s32.totalorder %v5789_v31, %v5727_v9  ;;  %v907_v21 = vadd.s32 96, %v8069_v5 }
 0x1d8   : > { %8081 = vst [vmem:[#allocation90_spill] sm:$0xff] %v5769_v22  ;;  %vm1180_vm2 = vmand %vm7938_vm3, %vm940_vm14  ;;  %vm7942_vm3 = vcmp.ne.s32.totalorder %v5795_v34, %v5735_v15 }
 0x1d9   : > { %v5817_v43 = vsel %vm1180_vm2, 1.0, %v4919_v24   ;;  %vm7948_vm2 = vcmp.ne.s32.totalorder %v5834_v47, %v5727_v9 }
 0x1da   : > { %8088 = vst [vmem:[#allocation93_spill] sm:$0xff] %v5817_v43  ;;  %vm1184_vm4 = vmand %vm7944_vm7, %vm7948_vm2  ;;  %vm8100_vm7 = vcmp.eq.s32.totalorder %v8098_v13, %v8079_v23  ;;  %vm947_vm2 = vcmp.ne.s32.totalorder %v5906_v62, %v5735_v15  ;;  %v6061_v43 = vadd.s32 %v5724_v7, %v907_v21  ;;  %v8138_v21 = vld [vmem:[#allocation23_spill] sm:$0xff] }
 0x1db   : > { %1023 = vperm.xlu1 %3640, %v8085_v37   ;;  %1018 = vperm.xlu0 %3639, %v8086_v40   ;;  %v5823_v40 = vsel %vm1181_vm6, 1.0, %v4919_v24   ;;  %vm1177_vm6 = vmand %vm7941_vm13, %vm7942_vm3  ;;  %vm7947_vm13 = vcmp.ne.s32.totalorder %v5848_v54, %v5727_v9  ;;  %v5872_v30 = vsel %vm1184_vm4, 1.0, %v4919_v24   ;;  %vm7946_vm3 = vcmp.ne.s32.totalorder %v5848_v54, %v5735_v15 }
 0x1dc   : > { %8089 = vst [vmem:[#allocation94_spill] sm:$0xff] %v5823_v40  ;;  %v5851_v57 = vsel %vm1177_vm6, 1.0, %v4919_v24   ;;  %vm1185_vm6 = vmand %vm7943_vm8, %vm7945_vm12  ;;  %vm8099_vm8 = vcmp.eq.s32.totalorder %v8098_v13, %v8076_v20 }
 0x1dd   : > { %8094 = vst [vmem:[#allocation96_spill] sm:$0xff] %v5851_v57  ;;  %vm1182_vm4 = vmand %vm8099_vm8, %vm7947_vm13  ;;  %vm7950_vm8 = vcmp.ne.s32.totalorder %v5900_v49, %v5727_v9  ;;  %vm7951_vm13 = vcmp.ne.s32.totalorder %v5906_v62, %v5727_v9 }
 0x1de   : > { %vm1183_vm12 = vmand %vm8100_vm7, %vm7946_vm3  ;;  %v5897_v42 = vsel %vm1182_vm4, 1.0, %v4919_v24   ;;  %vm8105_vm7 = vcmp.eq.s32.totalorder %v8104_v44, %v8076_v20 }
 0x1df   : > { %1033 = vperm.xlu1 %3640, %v8091_v51   ;;  %1028 = vperm.xlu0 %3639, %v8092_v52   ;;  %v5880_v51 = vsel %vm1185_vm6, 1.0, %v4919_v24   ;;  %8101 = vst [vmem:[#allocation97_spill] sm:$0xff] %v5897_v42  ;;  %v5903_v28 = vsel %vm1183_vm12, 1.0, %v4919_v24   ;;  %vm7949_vm6 = vcmp.ne.s32.totalorder %v5900_v49, %v5735_v15  ;;  %vm1188_vm4 = vmand %vm8105_vm7, %vm7950_vm8  ;;  %vm8106_vm12 = vcmp.eq.s32.totalorder %v8104_v44, %v8079_v23  ;;  %v8146_v42 = vld [vmem:[#allocation39_spill] sm:$0xff] }
 0x1e0   : > { %vm1189_vm3 = vmand %vm8106_vm12, %vm7949_vm6  ;;  %v5928_v58 = vsel %vm1188_vm4, 1.0, %v4919_v24   ;;  %vm8108_vm7 = vcmp.eq.s32.totalorder %v8107_v63, %v8076_v20  ;;  %vm7952_vm4 = vcmp.ne.s32.totalorder %v5919_v60, %v5727_v9  ;;  %vm7961_vm6 = vcmp.ne.s32.totalorder %v5919_v60, %v5735_v15 }
 0x1e1   : > { %v5936_v1 = vsel %vm1189_vm3, 1.0, %v4919_v24   ;;  %vm1186_vm12 = vmand %vm8108_vm7, %vm7951_vm13  ;;  %vm8109_vm3 = vcmp.eq.s32.totalorder %v8107_v63, %v8079_v23  ;;  %vm8111_vm7 = vcmp.eq.s32.totalorder %v8110_v61, %v8076_v20  ;;  %v910_v52 = vadd.s32 120, %v8069_v5 }
 0x1e2   : > { %vm1187_vm8 = vmand %vm8109_vm3, %vm947_vm2  ;;  %v5955_v53 = vsel %vm1186_vm12, 1.0, %v4919_v24   ;;  %vm8112_vm12 = vcmp.eq.s32.totalorder %v8110_v61, %v8079_v23 }
 0x1e3   : > { %1043 = vperm.xlu1 %3640, %v8096_v55   ;;  %1038 = vperm.xlu0 %3639, %v8097_v56   ;;  %v5961_v45 = vsel %vm1187_vm8, 1.0, %v4919_v24   ;;  %vm1192_vm13 = vmand %vm8111_vm7, %vm7952_vm4  ;;  %vm7955_vm8 = vcmp.ne.s32.totalorder %v5958_v32, %v5727_v9  ;;  %vm7954_vm7 = vcmp.ne.s32.totalorder %v5958_v32, %v5735_v15  ;;  %v909_v55 = vadd.s32 112, %v8069_v5  ;;  %v8125_v5 = vld [vmem:[#allocation19_spill] sm:$0xff] }
 0x1e4   : > { %vm1193_vm3 = vmand %vm8112_vm12, %vm7961_vm6  ;;  %v5977_v59 = vsel %vm1192_vm13, 1.0, %v4919_v24   ;;  %vm8114_vm13 = vcmp.eq.s32.totalorder %v8113_v2, %v8079_v23  ;;  %v6098_v13 = vadd.s32 %v5724_v7, %v910_v52 }
 0x1e5   : > { %v5982_v29 = vsel %vm1193_vm3, 1.0, %v4919_v24   ;;  %vm1190_vm4 = vmand %vm7953_vm9, %vm7955_vm8  ;;  %vm7959_vm3 = vcmp.ne.s32.totalorder %v6002_v4, %v5727_v9  ;;  %vm7956_vm9 = vcmp.ne.s32.totalorder %v6002_v4, %v5735_v15  ;;  %vm7958_vm8 = vcmp.ne.s32.totalorder %v6019_v10, %v5727_v9 }
 0x1e6   : > { %vm1191_vm12 = vmand %vm8114_vm13, %vm7954_vm7  ;;  %v5999_v3 = vsel %vm1190_vm4, 1.0, %v4919_v24   ;;  %vm8116_vm4 = vcmp.eq.s32.totalorder %v8115_v8, %v8076_v20  ;;  %v6101_v27 = vadd.s32 %v5724_v7, %v909_v55  ;;  %v8129_v7 = vld [vmem:[#allocation86_spill] sm:$0xff]  ;;  %v8139_v55 = vld [vmem:[#allocation25_spill] sm:$0xff] }
 0x1e7   : > { %v6005_v57 = vsel %vm1191_vm12, 1.0, %v4919_v24   ;;  %vm1196_vm13 = vmand %vm8116_vm4, %vm7959_vm3  ;;  %vm8117_vm12 = vcmp.eq.s32.totalorder %v8115_v8, %v8079_v23  ;;  %vm7957_vm4 = vcmp.ne.s32.totalorder %v6019_v10, %v5735_v15  ;;  %vm7962_vm3 = vcmp.ne.s32.totalorder %v6061_v43, %v5727_v9  ;;  %v8136_v8 = vld [vmem:[#allocation31_spill] sm:$0xff] }
 0x1e8   : > { %vm1197_vm7 = vmand %vm8117_vm12, %vm7956_vm9  ;;  %v6028_v25 = vsel %vm1196_vm13, 1.0, %v4919_v24   ;;  %vm8119_vm12 = vcmp.eq.s32.totalorder %v8118_v16, %v8076_v20  ;;  %8127 = vst [vmem:[#allocation100_spill] sm:$0xff] %v6101_v27 }
 0x1e9   : > { %v6031_v41 = vsel %vm1197_vm7, 1.0, %v4919_v24   ;;  %vm1194_vm9 = vmand %vm8119_vm12, %vm7958_vm8  ;;  %vm8120_vm7 = vcmp.eq.s32.totalorder %v8118_v16, %v8079_v23  ;;  %vm7960_vm12 = vcmp.ne.s32.totalorder %v6054_v19, %v5727_v9  ;;  %v8137_v16 = vld [vmem:[#allocation33_spill] sm:$0xff] }
 0x1ea   : > { %vm1195_vm13 = vmand %vm8120_vm7, %vm7957_vm4  ;;  %v6051_v17 = vsel %vm1194_vm9, 1.0, %v4919_v24   ;;  %vm7963_vm7 = vcmp.ne.s32.totalorder %v6054_v19, %v5735_v15  ;;  %vm8123_vm9 = vcmp.eq.s32.totalorder %v8122_v46, %v8076_v20 }
 0x1eb   : > { %v6058_v37 = vsel %vm1195_vm13, 1.0, %v4919_v24   ;;  %vm1200_vm4 = vmand %vm8123_vm9, %vm7960_vm12  ;;  %vm8124_vm13 = vcmp.eq.s32.totalorder %v8122_v46, %v8079_v23  ;;  %vm7964_vm9 = vcmp.ne.s32.totalorder %v6061_v43, %v5735_v15  ;;  %vm8126_vm12 = vcmp.eq.s32.totalorder %v8125_v5, %v8076_v20 }
 0x1ec   : > { %v8121_v50 = vmov %v6058_v37  ;;  %vm1201_vm8 = vmand %vm8124_vm13, %vm7963_vm7  ;;  %v6082_v61 = vsel %vm1200_vm4, 1.0, %v4919_v24   ;;  %vm965_vm13 = vcmp.ne.s32.totalorder %v6098_v13, %v5735_v15 }
 0x1ed   : > { %v6089_v56 = vsel %vm1201_vm8, 1.0, %v4919_v24   ;;  %vm1198_vm6 = vmand %vm8126_vm12, %vm7962_vm3  ;;  %vm8128_vm8 = vcmp.eq.s32.totalorder %v8125_v5, %v8079_v23  ;;  %vm7965_vm12 = vcmp.ne.s32.totalorder %v6098_v13, %v5727_v9  ;;  %vm8130_vm3 = vcmp.eq.s32.totalorder %v8129_v7, %v8076_v20 }
 0x1ee   : > { %vm1199_vm4 = vmand %vm8128_vm8, %vm7964_vm9  ;;  %v6110_v33 = vsel %vm1198_vm6, 1.0, %v4919_v24   ;;  %vm962_vm6 = vcmp.ne.s32.totalorder %v6101_v27, %v5727_v9  ;;  %vm8131_vm8 = vcmp.eq.s32.totalorder %v8129_v7, %v8079_v23  ;;  %vm963_vm9 = vcmp.ne.s32.totalorder %v6101_v27, %v5735_v15 }
 0x1ef   : > { %v6113_v37 = vsel %vm1199_vm4, 1.0, %v4919_v24   ;;  %vm1204_vm7 = vmand %vm8130_vm3, %vm7965_vm12  ;;  %vm8133_vm3 = vcmp.eq.s32.totalorder %v8132_v12, %v8076_v20 }
 0x1f0   : > { %vm1205_vm4 = vmand %vm8131_vm8, %vm965_vm13  ;;  %v6134_v44 = vsel %vm1204_vm7, 1.0, %v4919_v24   ;;  %vm8134_vm7 = vcmp.eq.s32.totalorder %v8132_v12, %v8079_v23 }
 0x1f1   : > { %v6139_v63 = vsel %vm1205_vm4, 1.0, %v4919_v24   ;;  %vm1202_vm12 = vmand %vm8133_vm3, %vm962_vm6  ;;  %vm8183_vm4 = vcmp.ne.s32.totalorder %v5919_v60, %v5727_v9  ;;  %vm8184_vm3 = vcmp.ne.s32.totalorder %v5919_v60, %v5735_v15  ;;  %v8191_v60 = vld [vmem:[#allocation52_spill] sm:$0xff] }
 0x1f2   : > { %vm1203_vm8 = vmand %vm8134_vm7, %vm963_vm9  ;;  %v6154_v46 = vsel %vm1202_vm12, 1.0, %v4919_v24   ;;  %vm8192_vm7 = vcmp.ne.s32.totalorder %v5958_v32, %v5735_v15 }
 0x1f3   : > { %v6157_v0 = vsel %vm1203_vm8, 1.0, %v4919_v24   ;;  %vm8197_vm8 = vcmp.ne.s32.totalorder %v6002_v4, %v5727_v9 }
 0x1f4   : > { %8135 = vst [vmem:[#allocation101_spill] sm:$0xff] %v6157_v0 }
 0x242   : > { %v979_v2 = vpop.permute.xlu1 %978  ;;  %v969_v6 = vpop.permute.xlu0 %968 }
 0x243   : > { %v1050_v11 = vsub.f32 %v8136_v8, %v979_v2  ;;  %v1051_v20 = vsub.f32 %v8137_v16, %v979_v2  ;;  %v1046_v52 = vsub.f32 %v8138_v21, %v969_v6  ;;  %v1047_v5 = vsub.f32 %v8139_v55, %v969_v6  ;;  %v8143_v8 = vld [vmem:[#allocation29_spill] sm:$0xff]  ;;  %v8144_v55 = vld [vmem:[#allocation43_spill] sm:$0xff] }
 0x245   : > { %v1086_v7 = vmul.f32 1.442695, %v1050_v11  ;;  %v1088_v26 = vmul.f32 1.442695, %v1051_v20  ;;  %v1078_v23 = vmul.f32 1.442695, %v1046_v52 }
 0x246   : > { %v1080_v12 = vmul.f32 1.442695, %v1047_v5  ;;  %v984_v35 = vpop.permute.xlu1 %983  ;;  %v974_v38 = vpop.permute.xlu0 %973 }
 0x247   : > { %3641 = vpow2.f32 %v1086_v7  ;;  %v1052_v24 = vsub.f32 %v8140_v39, %v984_v35  ;;  %v1053_v22 = vsub.f32 %v8141_v36, %v984_v35  ;;  %v1048_v40 = vsub.f32 %v8142_v48, %v974_v38  ;;  %v8145_v7 = vld [vmem:[#allocation45_spill] sm:$0xff] }
 0x248   : > { %3643 = vpow2.f32 %v1088_v26  ;;  %v1049_v2 = vsub.f32 %v8143_v8, %v974_v38  ;;  %v8147_v36 = vld [vmem:[#allocation41_spill] sm:$0xff] }
 0x249   : > { %3645 = vpow2.f32 %v1078_v23  ;;  %v1090_v16 = vmul.f32 1.442695, %v1052_v24  ;;  %v1092_v21 = vmul.f32 1.442695, %v1053_v22  ;;  %v1082_v6 = vmul.f32 1.442695, %v1048_v40 }
 0x24a   : > { %3647 = vpow2.f32 %v1080_v12  ;;  %v1084_v11 = vmul.f32 1.442695, %v1049_v2  ;;  %v994_v20 = vpop.permute.xlu1 %993  ;;  %v989_v52 = vpop.permute.xlu0 %988  ;;  %v8148_v24 = vld [vmem:[#allocation51_spill] sm:$0xff]  ;;  %v8149_v2 = vld [vmem:[#allocation53_spill] sm:$0xff] }
 0x24b   : > { %3649 = vpow2.f32 %v1090_v16  ;;  %v1056_v5 = vsub.f32 %v8144_v55, %v994_v20  ;;  %v1057_v39 = vsub.f32 %v8145_v7, %v994_v20  ;;  %v1054_v35 = vsub.f32 %v8146_v42, %v989_v52  ;;  %v8150_v55 = vld [vmem:[#allocation47_spill] sm:$0xff]  ;;  %v8151_v42 = vld [vmem:[#allocation49_spill] sm:$0xff] }
 0x24c   : > { %3651 = vpow2.f32 %v1092_v21  ;;  %v1055_v26 = vsub.f32 %v8147_v36, %v989_v52 }
 0x24d   : > { %3653 = vpow2.f32 %v1082_v6  ;;  %v1098_v48 = vmul.f32 1.442695, %v1056_v5  ;;  %v1100_v38 = vmul.f32 1.442695, %v1057_v39  ;;  %v1094_v23 = vmul.f32 1.442695, %v1054_v35 }
 0x24e   : > { %3655 = vpow2.f32 %v1084_v11  ;;  %v1096_v22 = vmul.f32 1.442695, %v1055_v26  ;;  %v1004_v40 = vpop.permute.xlu1 %1003  ;;  %v999_v12 = vpop.permute.xlu0 %998  ;;  %v8152_v35 = vld [vmem:[#allocation28_spill] sm:$0xff]  ;;  %v8153_v26 = vld [vmem:[#allocation30_spill] sm:$0xff] }
 0x24f   : > { %3657 = vpow2.f32 %v1098_v48  ;;  %v1060_v8 = vsub.f32 %v8148_v24, %v1004_v40  ;;  %v1061_v16 = vsub.f32 %v8149_v2, %v1004_v40  ;;  %v1058_v20 = vsub.f32 %v8150_v55, %v999_v12  ;;  %v8154_v24 = vld [vmem:[#allocation24_spill] sm:$0xff] }
 0x250   : > { %3659 = vpow2.f32 %v1100_v38  ;;  %v1059_v21 = vsub.f32 %v8151_v42, %v999_v12  ;;  %v8155_v38 = vld [vmem:[#allocation26_spill] sm:$0xff] }
 0x251   : > { %3661 = vpow2.f32 %v1094_v23  ;;  %v1106_v52 = vmul.f32 1.442695, %v1060_v8  ;;  %v1108_v6 = vmul.f32 1.442695, %v1061_v16  ;;  %v1102_v5 = vmul.f32 1.442695, %v1058_v20 }
 0x252   : > { %3663 = vpow2.f32 %v1096_v22  ;;  %v1104_v7 = vmul.f32 1.442695, %v1059_v21  ;;  %v1014_v11 = vpop.permute.xlu1 %1013  ;;  %v1009_v39 = vpop.permute.xlu0 %1008 }
 0x253   : > { %3665 = vpow2.f32 %v1106_v52  ;;  %v1064_v36 = vsub.f32 %v8152_v35, %v1014_v11  ;;  %v1065_v48 = vsub.f32 %v8153_v26, %v1014_v11  ;;  %v1062_v40 = vsub.f32 %v8154_v24, %v1009_v39 }
 0x254   : > { %v3642_v2 = vpop.eup %3641  ;;  %3667 = vpow2.f32 %v1108_v6  ;;  %v1063_v55 = vsub.f32 %v8155_v38, %v1009_v39 }
 0x255   : > { %v3644_v12 = vpop.eup %3643  ;;  %v6182_v23 = vsel %vm938_vm11, %v3642_v2, 0.0   ;;  %3669 = vpow2.f32 %v1102_v5  ;;  %v1114_v22 = vmul.f32 1.442695, %v1064_v36  ;;  %v1116_v8 = vmul.f32 1.442695, %v1065_v48  ;;  %v8163_v48 = vld [vmem:[#allocation36_spill] sm:$0xff] }
 0x256   : > { %8156 = vst [vmem:[#allocation102_spill] sm:$0xff] %v6182_v23  ;;  %v3646_v16 = vpop.eup %3645  ;;  %v6187_v39 = vsel %vm939_vm0, %v3644_v12, 0.0   ;;  %3671 = vpow2.f32 %v1104_v7  ;;  %v1110_v20 = vmul.f32 1.442695, %v1062_v40  ;;  %v1024_v5 = vpop.permute.xlu1 %1023  ;;  %v1112_v36 = vmul.f32 1.442695, %v1063_v55 }
 0x257   : > { %8157 = vst [vmem:[#allocation103_spill] sm:$0xff] %v6187_v39  ;;  %v3648_v42 = vpop.eup %3647  ;;  %v6192_v21 = vsel %vm934_vm10, %v3646_v16, 0.0   ;;  %3673 = vpow2.f32 %v1114_v22  ;;  %v1068_v24 = vsub.f32 %v8163_v48, %v1024_v5  ;;  %vm8166_vm10 = vcmp.ne.s32.totalorder %v5834_v47, %v5727_v9  ;;  %v8168_v12 = vld [vmem:[#allocation38_spill] sm:$0xff]  ;;  %v1019_v22 = vpop.permute.xlu0 %1018 }
 0x258   : > { %8158 = vst [vmem:[#allocation104_spill] sm:$0xff] %v6192_v21  ;;  %v3650_v52 = vpop.eup %3649  ;;  %v6197_v6 = vsel %vm935_vm1, %v3648_v42, 0.0   ;;  %3675 = vpow2.f32 %v1116_v8  ;;  %vm8164_vm1 = vcmp.ne.s32.totalorder %v5795_v34, %v5735_v15  ;;  %v1069_v23 = vsub.f32 %v8168_v12, %v1024_v5 }
 0x259   : > { %8159 = vst [vmem:[#allocation105_spill] sm:$0xff] %v6197_v6  ;;  %v3652_v14 = vpop.eup %3651  ;;  %v6202_v7 = vsel %vm940_vm14, %v3650_v52, 0.0   ;;  %3677 = vpow2.f32 %v1110_v20  ;;  %v1122_v20 = vmul.f32 1.442695, %v1068_v24  ;;  %vm8171_vm11 = vcmp.ne.s32.totalorder %v5848_v54, %v5727_v9  ;;  %v8182_v24 = vld [vmem:[#allocation34_spill] sm:$0xff] }
 0x25a   : > { %8160 = vst [vmem:[#allocation106_spill] sm:$0xff] %v6202_v7  ;;  %v3654_v11 = vpop.eup %3653  ;;  %v6207_v35 = vsel %vm941_vm15, %v3652_v14, 0.0   ;;  %3679 = vpow2.f32 %v1112_v36  ;;  %v1124_v21 = vmul.f32 1.442695, %v1069_v23  ;;  %vm8173_vm0 = vcmp.ne.s32.totalorder %v5848_v54, %v5735_v15  ;;  %v1034_v14 = vpop.permute.xlu1 %1033 }
 0x25b   : > { %8161 = vst [vmem:[#allocation107_spill] sm:$0xff] %v6207_v35  ;;  %v3656_v26 = vpop.eup %3655  ;;  %v6212_v18 = vsel %vm936_vm5, %v3654_v11, 0.0   ;;  %vm8169_vm5 = vcmp.ne.s32.totalorder %v5834_v47, %v5735_v15  ;;  %3681 = vpow2.f32 %v1122_v20  ;;  %v8175_v47 = vmov %v5900_v49  ;;  %v8178_v35 = vld [vmem:[#allocation32_spill] sm:$0xff] }
 0x25c   : > { %8162 = vst [vmem:[#allocation108_spill] sm:$0xff] %v6212_v18  ;;  %v3658_v40 = vpop.eup %3657  ;;  %v6218_v2 = vsel %vm8164_vm1, %v3656_v26, 0.0   ;;  %vm8176_vm14 = vcmp.ne.s32.totalorder %v8175_v47, %v5727_v9  ;;  %3683 = vpow2.f32 %v1124_v21  ;;  %vm8177_vm15 = vcmp.ne.s32.totalorder %v8175_v47, %v5735_v15  ;;  %v8188_v21 = vld [vmem:[#allocation46_spill] sm:$0xff] }
 0x25d   : > { %8165 = vst [vmem:[#allocation109_spill] sm:$0xff] %v6218_v2  ;;  %v3660_v38 = vpop.eup %3659  ;;  %v6223_v31 = vsel %vm8166_vm10, %v3658_v40, 0.0   ;;  %v1066_v36 = vsub.f32 %v8178_v35, %v1019_v22  ;;  %v8179_v18 = vmov %v5906_v62  ;;  %v1067_v40 = vsub.f32 %v8182_v24, %v1019_v22  ;;  %v1029_v2 = vpop.permute.xlu0 %1028  ;;  %v8189_v35 = vld [vmem:[#allocation40_spill] sm:$0xff] }
 0x25e   : > { %v8167_v55 = vmov %v6223_v31  ;;  %v3662_v8 = vpop.eup %3661  ;;  %v6229_v16 = vsel %vm8169_vm5, %v3660_v38, 0.0   ;;  %vm8180_vm12 = vcmp.ne.s32.totalorder %v8179_v18, %v5727_v9  ;;  %v1044_v20 = vpop.permute.xlu1 %1043  ;;  %vm8198_vm1 = vcmp.ne.s32.totalorder %v6002_v4, %v5735_v15 }
 0x25f   : > { %v8170_v6 = vmov %v6229_v16  ;;  %v3664_v34 = vpop.eup %3663  ;;  %v6234_v42 = vsel %vm8171_vm11, %v3662_v8, 0.0   ;;  %v1118_v31 = vmul.f32 1.442695, %v1066_v36  ;;  %v1120_v23 = vmul.f32 1.442695, %v1067_v40 }
 0x260   : > { %8172 = vst [vmem:[#allocation110_spill] sm:$0xff] %v6234_v42  ;;  %v3666_v52 = vpop.eup %3665  ;;  %v6239_v5 = vsel %vm8173_vm0, %v3664_v34, 0.0   ;;  %v8187_v34 = vld [vmem:[#allocation44_spill] sm:$0xff]  ;;  %v1070_v36 = vsub.f32 %v8189_v35, %v1029_v2  ;;  %vm8200_vm10 = vcmp.ne.s32.totalorder %v6019_v10, %v5727_v9  ;;  %vm8201_vm5 = vcmp.ne.s32.totalorder %v6019_v10, %v5735_v15 }
 0x261   : > { %8174 = vst [vmem:[#allocation111_spill] sm:$0xff] %v6239_v5  ;;  %v3668_v7 = vpop.eup %3667  ;;  %v6244_v8 = vsel %vm8176_vm14, %v3666_v52, 0.0   ;;  %3685 = vpow2.f32 %v1118_v31  ;;  %v1072_v42 = vsub.f32 %v8187_v34, %v1034_v14  ;;  %v1073_v52 = vsub.f32 %v8188_v21, %v1034_v14  ;;  %v1039_v24 = vpop.permute.xlu0 %1038  ;;  %v8195_v21 = vld [vmem:[#allocation48_spill] sm:$0xff] }
 0x262   : > { %v3670_v11 = vpop.eup %3669  ;;  %v6249_v26 = vsel %vm8177_vm15, %v3668_v7, 0.0   ;;  %3687 = vpow2.f32 %v1120_v23  ;;  %v8194_v23 = vld [vmem:[#allocation54_spill] sm:$0xff]  ;;  %v1074_v35 = vsub.f32 %v8195_v21, %v1039_v24  ;;  %vm8202_vm11 = vcmp.ne.s32.totalorder %v6054_v19, %v5727_v9 }
 0x263   : > { %v3672_v54 = vpop.eup %3671  ;;  %v6255_v48 = vsel %vm8180_vm12, %v3670_v11, 0.0   ;;  %v1130_v31 = vmul.f32 1.442695, %v1072_v42  ;;  %vm8203_vm0 = vcmp.ne.s32.totalorder %v6054_v19, %v5735_v15  ;;  %vm8204_vm14 = vcmp.ne.s32.totalorder %v6061_v43, %v5727_v9 }
 0x264   : > { %v8181_v39 = vmov %v6255_v48  ;;  %v3674_v38 = vpop.eup %3673  ;;  %v6261_v5 = vsel %vm947_vm2, %v3672_v54, 0.0   ;;  %vm8186_vm2 = vcmp.ne.s32.totalorder %v5958_v32, %v5727_v9  ;;  %v8190_v54 = vld [vmem:[#allocation42_spill] sm:$0xff]  ;;  %v1076_v48 = vsub.f32 %v8191_v60, %v1044_v20 }
 0x265   : > { %v3676_v12 = vpop.eup %3675  ;;  %v6266_v11 = vsel %vm8183_vm4, %v3674_v38, 0.0   ;;  %v1071_v18 = vsub.f32 %v8190_v54, %v1029_v2  ;;  %3689 = vpow2.f32 %v1130_v31  ;;  %v8196_v54 = vld [vmem:[#allocation50_spill] sm:$0xff]  ;;  %v1134_v32 = vmul.f32 1.442695, %v1074_v35  ;;  %v8222_v35 = vld [vmem:[#allocation92_spill] sm:$0xff] }
 0x266   : > { %v3678_v16 = vpop.eup %3677  ;;  %v6271_v22 = vsel %vm8184_vm3, %v3676_v12, 0.0   ;;  %v1132_v12 = vmul.f32 1.442695, %v1073_v52  ;;  %v1138_v14 = vmul.f32 1.442695, %v1076_v48  ;;  %v1075_v60 = vsub.f32 %v8196_v54, %v1039_v24  ;;  %v8209_v54 = vld [vmem:[#allocation101_spill] sm:$0xff] }
 0x267   : > { %v8185_v7 = vmov %v6271_v22  ;;  %v6276_v38 = vsel %vm8186_vm2, %v3678_v16, 0.0   ;;  %v3680_v47 = vpop.eup %3679  ;;  %v1077_v16 = vsub.f32 %v8194_v23, %v1044_v20  ;;  %v1126_v22 = vmul.f32 1.442695, %v1070_v36 }
 0x268   : > { %v6286_v40 = vsel %vm8192_vm7, %v3680_v47, 0.0   ;;  %v1128_v34 = vmul.f32 1.442695, %v1071_v18  ;;  %v3682_v49 = vpop.eup %3681  ;;  %3691 = vpow2.f32 %v1132_v12  ;;  %v1136_v42 = vmul.f32 1.442695, %v1075_v60 }
 0x269   : > { %v8193_v0 = vmov %v6286_v40  ;;  %v1140_v2 = vmul.f32 1.442695, %v1077_v16  ;;  %v3684_v62 = vpop.eup %3683  ;;  %v6294_v12 = vsel %vm8197_vm8, %v3682_v49, 0.0   ;;  %3693 = vpow2.f32 %v1126_v22  ;;  %v8218_v22 = vld [vmem:[#allocation90_spill] sm:$0xff] }
 0x26a   : > { %v6299_v20 = vsel %vm8198_vm1, %v3684_v62, 0.0   ;;  %3695 = vpow2.f32 %v1128_v34  ;;  %vm8205_vm15 = vcmp.ne.s32.totalorder %v6061_v43, %v5735_v15  ;;  %vm8206_vm12 = vcmp.ne.s32.totalorder %v6098_v13, %v5727_v9  ;;  %v8220_v34 = vld [vmem:[#allocation96_spill] sm:$0xff] }
 0x26b   : > { %v8199_v27 = vmov %v6299_v20  ;;  %3697 = vpow2.f32 %v1138_v14  ;;  %v8211_v43 = vmov %v6110_v33  ;;  %v8212_v23 = vmov %v8121_v50  ;;  %v8236_v33 = vld [vmem:[#allocation107_spill] sm:$0xff] }
 0x26c   : > { %3699 = vpow2.f32 %v1140_v2  ;;  %v8231_v50 = vmov %v8181_v39  ;;  %v8232_v13 = vmov %v8170_v6  ;;  %v8234_v6 = vld [vmem:[#allocation111_spill] sm:$0xff] }
 0x26d   : > { %3701 = vpow2.f32 %v1134_v32  ;;  %v8208_v32 = vmov %v6134_v44  ;;  %v8237_v44 = vld [vmem:[#allocation106_spill] sm:$0xff]  ;;  %v8238_v39 = vld [vmem:[#allocation103_spill] sm:$0xff] }
 0x26e   : > { %v3686_v52 = vpop.eup %3685  ;;  %3703 = vpow2.f32 %v1136_v42  ;;  %v8215_v42 = vld [vmem:[#allocation97_spill] sm:$0xff] }
 0x26f   : > { %v3688_v47 = vpop.eup %3687  ;;  %v1162_v60 = vsel %vm8200_vm10, %v3686_v52, 0.0   ;;  %v8210_v52 = vmov %v6089_v56  ;;  %v8235_v56 = vld [vmem:[#allocation110_spill] sm:$0xff] }
 0x270   : > { %v1163_v49 = vsel %vm8201_vm5, %v3688_v47, 0.0   ;;  %v8214_v47 = vmov %v5928_v58  ;;  %v8229_v58 = vmov %v8185_v7  ;;  %v8230_v7 = vmov %v8193_v0  ;;  %v8239_v0 = vld [vmem:[#allocation102_spill] sm:$0xff] }
 0x271   : > { %v8228_v9 = vmov %v1163_v49  ;;  %v8244_v49 = vld [vmem:[#allocation104_spill] sm:$0xff] }
 0x272   : > { %v3690_v36 = vpop.eup %3689 }
 0x273   : > { %v1168_v62 = vsel %vm8202_vm11, %v3690_v36, 0.0   ;;  %v8219_v36 = vld [vmem:[#allocation89_spill] sm:$0xff] }
 0x275   : > { %v3692_v4 = vpop.eup %3691 }
 0x276   : > { %v3694_v18 = vpop.eup %3693  ;;  %v1169_v14 = vsel %vm8203_vm0, %v3692_v4, 0.0  }
 0x277   : > { %v3696_v48 = vpop.eup %3695  ;;  %v1166_v2 = vsel %vm8204_vm14, %v3694_v18, 0.0   ;;  %v8223_v18 = vld [vmem:[#allocation91_spill] sm:$0xff] }
 0x278   : > { %v3698_v24 = vpop.eup %3697  ;;  %v1167_v10 = vsel %vm8205_vm15, %v3696_v48, 0.0   ;;  %v8221_v48 = vld [vmem:[#allocation95_spill] sm:$0xff]  ;;  %v8226_v15 = vmov %v1166_v2  ;;  %v8227_v2 = vmov %v8199_v27  ;;  %v8240_v27 = vld [vmem:[#allocation109_spill] sm:$0xff] }
 0x279   : > { %v3700_v40 = vpop.eup %3699  ;;  %v1172_v16 = vsel %vm8206_vm12, %v3698_v24, 0.0   ;;  %v8217_v24 = vld [vmem:[#allocation93_spill] sm:$0xff] }
 0x27a   : > { %v3702_v31 = vpop.eup %3701  ;;  %v1173_v20 = vsel %vm965_vm13, %v3700_v40, 0.0   ;;  %v8216_v40 = vld [vmem:[#allocation94_spill] sm:$0xff] }
 0x27b   : > { %v3704_v19 = vpop.eup %3703  ;;  %v1170_v4 = vsel %vm962_vm6, %v3702_v31, 0.0   ;;  %v8213_v31 = vmov %v6051_v17  ;;  %v8225_v17 = vmov %v1168_v62 }
 0x27c   : > { %v1171_v21 = vsel %vm963_vm9, %v3704_v19, 0.0   ;;  %v8224_v19 = vmov %v1170_v4  ;;  %v8233_v4 = vmov %v8167_v55  ;;  %v8241_v55 = vld [vmem:[#allocation108_spill] sm:$0xff] }
 0x27d   : > { %8242 = vst [vmem:[#allocation89_spill] sm:$0xff] %v8241_v55  ;;  %v8243_v55 = vld [vmem:[#allocation105_spill] sm:$0xff] }
 0x27e PF: > { %8247 = vst [vmem:[#allocation6_spill] sm:$0xff] %v4629_v33  ;;  %8249 = vst [vmem:[#allocation112_spill] sm:$0xff] %v4653_v55  ;;  %v4657_v49 = vphi %v5714_v49, %v8244_v49   ;;  %v4653_v55 = vphi %v5712_v55, %v8243_v55   ;;  %v4645_v27 = vphi %v5708_v27, %v8240_v27   ;;  %v4641_v0 = vphi %v5706_v0, %v8239_v0   ;;  %v4637_v39 = vphi %v5704_v39, %v8238_v39   ;;  %v4633_v44 = vphi %v5702_v44, %v8237_v44   ;;  %v4629_v33 = vphi %v5700_v33, %v8236_v33   ;;  %v4625_v56 = vphi %v5698_v56, %v8235_v56   ;;  %v4621_v6 = vphi %v5696_v6, %v8234_v6   ;;  %v4617_v4 = vphi %v5694_v4, %v8233_v4   ;;  %v4613_v13 = vphi %v5692_v13, %v8232_v13   ;;  %v4609_v50 = vphi %v5690_v50, %v8231_v50   ;;  %v4605_v5 = vphi %v5688_v5, %v6261_v5   ;;  %v4601_v8 = vphi %v5686_v8, %v6244_v8   ;;  %v4597_v26 = vphi %v5684_v26, %v6249_v26   ;;  %v4593_v38 = vphi %v5682_v38, %v6276_v38   ;;  %v4589_v7 = vphi %v5680_v7, %v8230_v7   ;;  %v4585_v11 = vphi %v5678_v11, %v6266_v11   ;;  %v4581_v58 = vphi %v5676_v58, %v8229_v58   ;;  %v4577_v60 = vphi %v5674_v60, %v1162_v60   ;;  %v4573_v9 = vphi %v5672_v9, %v8228_v9   ;;  %v4569_v12 = vphi %v5670_v12, %v6294_v12   ;;  %v4565_v2 = vphi %v5668_v2, %v8227_v2   ;;  %v4561_v15 = vphi %v5666_v15, %v8226_v15   ;;  %v4557_v10 = vphi %v5664_v10, %v1167_v10   ;;  %v4553_v17 = vphi %v5662_v17, %v8225_v17   ;;  %v4549_v14 = vphi %v5660_v14, %v1169_v14   ;;  %v4545_v19 = vphi %v5658_v19, %v8224_v19   ;;  %v4541_v21 = vphi %v5656_v21, %v1171_v21   ;;  %v4537_v16 = vphi %v5654_v16, %v1172_v16   ;;  %v4533_v20 = vphi %v5652_v20, %v1173_v20   ;;  %v4529_v18 = vphi %v5650_v18, %v8223_v18   ;;  %v4525_v35 = vphi %v5648_v35, %v8222_v35   ;;  %v4521_v48 = vphi %v5646_v48, %v8221_v48   ;;  %v4517_v34 = vphi %v5644_v34, %v8220_v34   ;;  %v4513_v36 = vphi %v5642_v36, %v8219_v36   ;;  %v4509_v22 = vphi %v5640_v22, %v8218_v22   ;;  %v4505_v24 = vphi %v5638_v24, %v8217_v24   ;;  %v4501_v40 = vphi %v5636_v40, %v8216_v40   ;;  %v4497_v42 = vphi %v5634_v42, %v8215_v42   ;;  %v4493_v28 = vphi %v5632_v28, %v5903_v28   ;;  %v4489_v30 = vphi %v5630_v30, %v5872_v30   ;;  %v4485_v51 = vphi %v5628_v51, %v5880_v51   ;;  %v4481_v53 = vphi %v5626_v53, %v5955_v53   ;;  %v4477_v45 = vphi %v5624_v45, %v5961_v45   ;;  %v4473_v47 = vphi %v5622_v47, %v8214_v47   ;;  %v4469_v1 = vphi %v5620_v1, %v5936_v1   ;;  %v4465_v3 = vphi %v5618_v3, %v5999_v3   ;;  %v4461_v57 = vphi %v5616_v57, %v6005_v57   ;;  %v4457_v59 = vphi %v5614_v59, %v5977_v59   ;;  %v4453_v29 = vphi %v5612_v29, %v5982_v29   ;;  %v4449_v31 = vphi %v5610_v31, %v8213_v31   ;;  %v4445_v23 = vphi %v5608_v23, %v8212_v23   ;;  %v4441_v25 = vphi %v5606_v25, %v6028_v25   ;;  %v4437_v41 = vphi %v5604_v41, %v6031_v41   ;;  %v4433_v43 = vphi %v5602_v43, %v8211_v43   ;;  %v4429_v37 = vphi %v5600_v37, %v6113_v37   ;;  %v4425_v61 = vphi %v5598_v61, %v6082_v61   ;;  %v4421_v52 = vphi %v5596_v52, %v8210_v52   ;;  %v4417_v46 = vphi %v5594_v46, %v6154_v46   ;;  %v4413_v54 = vphi %v5592_v54, %v8209_v54   ;;  %v4409_v32 = vphi %v5590_v32, %v8208_v32   ;;  %v4405_v63 = vphi %v5588_v63, %v6139_v63  }
 0x281   : > { %1336 = sbr.rel (!%p5491_p7) target bundleno = 821 (0x335), region = 48 }
 0x284   : > { %v8246_v62 = vld [vmem:[#allocation89_spill] sm:$0xff] }
 0x285   : > { %8248 = vst [vmem:[#allocation89_spill] sm:$0xff] %v4633_v44 }
 0x286   : > { %v4920_v0 = vmov 0   ;;  %v8250_v1 = vld [vmem:[#allocation65_spill] sm:$0xff]  ;;  %v8251_v2 = vld [vmem:[#allocation58_spill] sm:$0xff]  ;;  %v8252_v3 = vld [vmem:[#allocation68_spill] sm:$0xff]  ;;  %v4921_v51 = vmov 0.0  }
 0x287   : > { %3706 = vset.pattern.permute.xlu1 %v4920_v0  ;;  %3705 = vset.pattern.permute.xlu0 %v4920_v0  ;;  %v8253_v4 = vld [vmem:[#allocation62_spill] sm:$0xff]  ;;  %v8254_v5 = vld [vmem:[#allocation76_spill] sm:$0xff]  ;;  %v8258_v9 = vld [vmem:[#allocation61_spill] sm:$0xff] }
 0x288   : > { %1349 = vperm.xlu1 %3706, %v8250_v1   ;;  %1339 = vperm.xlu0 %3705, %v8251_v2   ;;  %v8255_v6 = vld [vmem:[#allocation72_spill] sm:$0xff]  ;;  %v8259_v15 = vld [vmem:[#allocation57_spill] sm:$0xff]  ;;  %v8260_v25 = vld [vmem:[#allocation71_spill] sm:$0xff] }
 0x289   : > { %v8256_v7 = vld [vmem:[#allocation84_spill] sm:$0xff]  ;;  %v8261_v28 = vld [vmem:[#allocation66_spill] sm:$0xff]  ;;  %v8262_v29 = vld [vmem:[#allocation79_spill] sm:$0xff] }
 0x28a   : > { %v8257_v8 = vld [vmem:[#allocation80_spill] sm:$0xff]  ;;  %v8263_v30 = vld [vmem:[#allocation75_spill] sm:$0xff]  ;;  %v8271_v58 = vld [vmem:[#allocation14_spill] sm:$0xff] }
 0x28b   : > { %v8264_v41 = vld [vmem:[#allocation87_spill] sm:$0xff]  ;;  %v8269_v59 = vld [vmem:[#allocation8_spill] sm:$0xff]  ;;  %v8274_v63 = vld [vmem:[#allocation9_spill] sm:$0xff] }
 0x28c   : > { %1354 = vperm.xlu1 %3706, %v8252_v3   ;;  %1344 = vperm.xlu0 %3705, %v8253_v4   ;;  %v8265_v45 = vld [vmem:[#allocation83_spill] sm:$0xff]  ;;  %vm8273_vm4 = vcmp.eq.s32.totalorder %v8271_v58, %v8269_v59  ;;  %vm8276_vm2 = vcmp.eq.s32.totalorder %v8274_v63, %v8269_v59  ;;  %v8277_v61 = vld [vmem:[#allocation10_spill] sm:$0xff]  ;;  %v8280_v10 = vld [vmem:[#allocation16_spill] sm:$0xff] }
 0x28d   : > { %v8266_v53 = vld [vmem:[#allocation11_spill] sm:$0xff]  ;;  %v6933_v34 = vsel %vm8273_vm4, 1.0, %v4921_v51   ;;  %v6943_v22 = vsel %vm8276_vm2, 1.0, %v4921_v51   ;;  %vm8279_vm8 = vcmp.eq.s32.totalorder %v8277_v61, %v8269_v59  ;;  %vm8282_vm10 = vcmp.eq.s32.totalorder %v8280_v10, %v8269_v59  ;;  %v8283_v17 = vld [vmem:[#allocation12_spill] sm:$0xff]  ;;  %v8287_v43 = vld [vmem:[#allocation18_spill] sm:$0xff] }
 0x28e   : > { %v8267_v57 = vld [vmem:[#allocation7_spill] sm:$0xff]  ;;  %vm8270_vm13 = vcmp.eq.s32.totalorder %v8266_v53, %v8269_v59  ;;  %v6953_v40 = vsel %vm8279_vm8, 1.0, %v4921_v51   ;;  %vm8285_vm11 = vcmp.eq.s32.totalorder %v8283_v17, %v8269_v59  ;;  %vm8289_vm14 = vcmp.eq.s32.totalorder %v8287_v43, %v8269_v59  ;;  %v8290_v46 = vld [vmem:[#allocation13_spill] sm:$0xff]  ;;  %v8293_v56 = vld [vmem:[#allocation20_spill] sm:$0xff] }
 0x28f   : > { %vm8268_vm9 = vcmp.eq.s32.totalorder %v8266_v53, %v8267_v57  ;;  %v6923_v35 = vsel %vm8270_vm13, 1.0, %v4921_v51   ;;  %vm8272_vm6 = vcmp.eq.s32.totalorder %v8271_v58, %v8267_v57  ;;  %vm8275_vm3 = vcmp.eq.s32.totalorder %v8274_v63, %v8267_v57  ;;  %v8296_v27 = vld [vmem:[#allocation15_spill] sm:$0xff]  ;;  %v8300_v44 = vld [vmem:[#allocation17_spill] sm:$0xff]  ;;  %v8303_v39 = vld [vmem:[#allocation22_spill] sm:$0xff] }
 0x290   : > { %1364 = vperm.xlu1 %3706, %v8254_v5   ;;  %1359 = vperm.xlu0 %3705, %v8255_v6   ;;  %v6918_v18 = vsel %vm8268_vm9, 1.0, %v4921_v51   ;;  %v6928_v48 = vsel %vm8272_vm6, 1.0, %v4921_v51   ;;  %v6938_v36 = vsel %vm8275_vm3, 1.0, %v4921_v51   ;;  %vm8278_vm7 = vcmp.eq.s32.totalorder %v8277_v61, %v8267_v57  ;;  %v8306_v26 = vld [vmem:[#allocation19_spill] sm:$0xff]  ;;  %v8309_v11 = vld [vmem:[#allocation21_spill] sm:$0xff]  ;;  %v8312_v38 = vld [vmem:[#allocation88_spill] sm:$0xff] }
 0x291   : > { %v6948_v24 = vsel %vm8278_vm7, 1.0, %v4921_v51   ;;  %vm8281_vm1 = vcmp.eq.s32.totalorder %v8280_v10, %v8267_v57  ;;  %vm8284_vm5 = vcmp.eq.s32.totalorder %v8283_v17, %v8267_v57  ;;  %v6973_v37 = vsel %vm8285_vm11, 1.0, %v4921_v51   ;;  %v8315_v12 = vld [vmem:[#allocation86_spill] sm:$0xff]  ;;  %v8318_v21 = vld [vmem:[#allocation31_spill] sm:$0xff]  ;;  %v8319_v20 = vld [vmem:[#allocation33_spill] sm:$0xff] }
 0x292   : > { %v6958_v42 = vsel %vm8281_vm1, 1.0, %v4921_v51   ;;  %v8286_v50 = vmov %v6973_v37  ;;  %vm8288_vm0 = vcmp.eq.s32.totalorder %v8287_v43, %v8267_v57  ;;  %vm8291_vm15 = vcmp.eq.s32.totalorder %v8290_v46, %v8267_v57  ;;  %v8320_v19 = vld [vmem:[#allocation23_spill] sm:$0xff]  ;;  %v8321_v62 = vld [vmem:[#allocation25_spill] sm:$0xff] }
 0x293   : > { %v6978_v53 = vsel %vm8288_vm0, 1.0, %v4921_v51   ;;  %v6988_v47 = vsel %vm8291_vm15, 1.0, %v4921_v51   ;;  %vm8292_vm12 = vcmp.eq.s32.totalorder %v8290_v46, %v8269_v59  ;;  %vm8294_vm9 = vcmp.eq.s32.totalorder %v8293_v56, %v8267_v57  ;;  %v8325_v10 = vld [vmem:[#allocation29_spill] sm:$0xff] }
 0x294   : > { %1374 = vperm.xlu1 %3706, %v8256_v7   ;;  %1369 = vperm.xlu0 %3705, %v8257_v8   ;;  %v6993_v1 = vsel %vm8292_vm12, 1.0, %v4921_v51   ;;  %v6998_v3 = vsel %vm8294_vm9, 1.0, %v4921_v51   ;;  %vm8295_vm13 = vcmp.eq.s32.totalorder %v8293_v56, %v8269_v59  ;;  %vm8297_vm6 = vcmp.eq.s32.totalorder %v8296_v27, %v8267_v57 }
 0x295   : > { %v7003_v13 = vsel %vm8295_vm13, 1.0, %v4921_v51   ;;  %v7008_v33 = vsel %vm8297_vm6, 1.0, %v4921_v51   ;;  %vm8299_vm4 = vcmp.eq.s32.totalorder %v8296_v27, %v8269_v59  ;;  %vm8301_vm3 = vcmp.eq.s32.totalorder %v8300_v44, %v8267_v57 }
 0x296   : > { %8298 = vst [vmem:[#allocation6_spill] sm:$0xff] %v7008_v33  ;;  %v7018_v31 = vsel %vm8301_vm3, 1.0, %v4921_v51   ;;  %vm8302_vm2 = vcmp.eq.s32.totalorder %v8300_v44, %v8269_v59  ;;  %vm8304_vm7 = vcmp.eq.s32.totalorder %v8303_v39, %v8267_v57  ;;  %vm8305_vm8 = vcmp.eq.s32.totalorder %v8303_v39, %v8269_v59 }
 0x297   : > { %v7023_v23 = vsel %vm8302_vm2, 1.0, %v4921_v51   ;;  %vm8307_vm1 = vcmp.eq.s32.totalorder %v8306_v26, %v8267_v57  ;;  %vm8311_vm11 = vcmp.eq.s32.totalorder %v8309_v11, %v8269_v59  ;;  %vm8313_vm0 = vcmp.eq.s32.totalorder %v8312_v38, %v8267_v57 }
 0x298   : > { %1384 = vperm.xlu1 %3706, %v8258_v9   ;;  %1379 = vperm.xlu0 %3705, %v8259_v15   ;;  %v7038_v43 = vsel %vm8307_vm1, 1.0, %v4921_v51   ;;  %v7053_v52 = vsel %vm8311_vm11, 1.0, %v4921_v51   ;;  %v7058_v46 = vsel %vm8313_vm0, 1.0, %v4921_v51   ;;  %vm8316_vm15 = vcmp.eq.s32.totalorder %v8315_v12, %v8267_v57  ;;  %v8322_v9 = vld [vmem:[#allocation35_spill] sm:$0xff] }
 0x299   : > { %v7068_v32 = vsel %vm8316_vm15, 1.0, %v4921_v51   ;;  %vm8317_vm12 = vcmp.eq.s32.totalorder %v8315_v12, %v8269_v59 }
 0x29a   : > { %v7073_v63 = vsel %vm8317_vm12, 1.0, %v4921_v51  }
 0x29c   : > { %1394 = vperm.xlu1 %3706, %v8260_v25   ;;  %1389 = vperm.xlu0 %3705, %v8261_v28   ;;  %v6963_v28 = vsel %vm8282_vm10, 1.0, %v4921_v51   ;;  %v7028_v25 = vsel %vm8304_vm7, 1.0, %v4921_v51   ;;  %vm8308_vm10 = vcmp.eq.s32.totalorder %v8306_v26, %v8269_v59 }
 0x29d   : > { %v7043_v37 = vsel %vm8308_vm10, 1.0, %v4921_v51  }
 0x2a0   : > { %1404 = vperm.xlu1 %3706, %v8262_v29   ;;  %1399 = vperm.xlu0 %3705, %v8263_v30   ;;  %v6968_v30 = vsel %vm8284_vm5, 1.0, %v4921_v51   ;;  %v7013_v29 = vsel %vm8299_vm4, 1.0, %v4921_v51   ;;  %vm8310_vm5 = vcmp.eq.s32.totalorder %v8309_v11, %v8267_v57 }
 0x2a1   : > { %v7048_v61 = vsel %vm8310_vm5, 1.0, %v4921_v51  }
 0x2a4   : > { %1414 = vperm.xlu1 %3706, %v8264_v41   ;;  %1409 = vperm.xlu0 %3705, %v8265_v45   ;;  %v6983_v45 = vsel %vm8289_vm14, 1.0, %v4921_v51   ;;  %v7033_v41 = vsel %vm8305_vm8, 1.0, %v4921_v51   ;;  %vm8314_vm14 = vcmp.eq.s32.totalorder %v8312_v38, %v8269_v59  ;;  %v8324_v59 = vld [vmem:[#allocation27_spill] sm:$0xff] }
 0x2a5   : > { %v7063_v54 = vsel %vm8314_vm14, 1.0, %v4921_v51   ;;  %v8323_v51 = vld [vmem:[#allocation37_spill] sm:$0xff]  ;;  %v8326_v38 = vld [vmem:[#allocation43_spill] sm:$0xff] }
 0x303   : > { %v1350_v16 = vpop.permute.xlu1 %1349  ;;  %v1340_v14 = vpop.permute.xlu0 %1339 }
 0x304   : > { %v1421_v60 = vsub.f32 %v8318_v21, %v1350_v16  ;;  %v1422_v49 = vsub.f32 %v8319_v20, %v1350_v16  ;;  %v1417_v55 = vsub.f32 %v8320_v19, %v1340_v14  ;;  %v1418_v0 = vsub.f32 %v8321_v62, %v1340_v14  ;;  %v8327_v16 = vld [vmem:[#allocation45_spill] sm:$0xff]  ;;  %v8328_v21 = vld [vmem:[#allocation39_spill] sm:$0xff] }
 0x305   : > { %v8329_v20 = vld [vmem:[#allocation41_spill] sm:$0xff] }
 0x306   : > { %v1457_v2 = vmul.f32 1.442695, %v1421_v60  ;;  %v1459_v4 = vmul.f32 1.442695, %v1422_v49  ;;  %v1449_v5 = vmul.f32 1.442695, %v1417_v55 }
 0x307   : > { %v1451_v6 = vmul.f32 1.442695, %v1418_v0  ;;  %v1355_v7 = vpop.permute.xlu1 %1354  ;;  %v1345_v8 = vpop.permute.xlu0 %1344 }
 0x308   : > { %3707 = vpow2.f32 %v1457_v2  ;;  %v1423_v15 = vsub.f32 %v8322_v9, %v1355_v7  ;;  %v1424_v57 = vsub.f32 %v8323_v51, %v1355_v7  ;;  %v1419_v58 = vsub.f32 %v8324_v59, %v1345_v8  ;;  %v8331_v7 = vld [vmem:[#allocation53_spill] sm:$0xff]  ;;  %v8332_v9 = vld [vmem:[#allocation47_spill] sm:$0xff] }
 0x309   : > { %3709 = vpow2.f32 %v1459_v4  ;;  %v1420_v17 = vsub.f32 %v8325_v10, %v1345_v8  ;;  %v8333_v51 = vld [vmem:[#allocation49_spill] sm:$0xff] }
 0x30a   : > { %3711 = vpow2.f32 %v1449_v5  ;;  %v1461_v56 = vmul.f32 1.442695, %v1423_v15  ;;  %v1463_v27 = vmul.f32 1.442695, %v1424_v57  ;;  %v1453_v44 = vmul.f32 1.442695, %v1419_v58 }
 0x30b   : > { %3713 = vpow2.f32 %v1451_v6  ;;  %v1455_v39 = vmul.f32 1.442695, %v1420_v17  ;;  %v1365_v26 = vpop.permute.xlu1 %1364  ;;  %v1360_v11 = vpop.permute.xlu0 %1359  ;;  %v8330_v5 = vld [vmem:[#allocation51_spill] sm:$0xff] }
 0x30c   : > { %3715 = vpow2.f32 %v1461_v56  ;;  %v1427_v12 = vsub.f32 %v8326_v38, %v1365_v26  ;;  %v1428_v14 = vsub.f32 %v8327_v16, %v1365_v26  ;;  %v1425_v60 = vsub.f32 %v8328_v21, %v1360_v11  ;;  %v8335_v26 = vld [vmem:[#allocation30_spill] sm:$0xff]  ;;  %v8336_v38 = vld [vmem:[#allocation24_spill] sm:$0xff] }
 0x30d   : > { %3717 = vpow2.f32 %v1463_v27  ;;  %v1426_v49 = vsub.f32 %v8329_v20, %v1360_v11  ;;  %v8337_v16 = vld [vmem:[#allocation26_spill] sm:$0xff] }
 0x30e   : > { %3719 = vpow2.f32 %v1453_v44  ;;  %v1469_v19 = vmul.f32 1.442695, %v1427_v12  ;;  %v1471_v55 = vmul.f32 1.442695, %v1428_v14  ;;  %v1465_v62 = vmul.f32 1.442695, %v1425_v60 }
 0x30f   : > { %3721 = vpow2.f32 %v1455_v39  ;;  %v1467_v0 = vmul.f32 1.442695, %v1426_v49  ;;  %v1375_v2 = vpop.permute.xlu1 %1374  ;;  %v1370_v4 = vpop.permute.xlu0 %1369  ;;  %v8334_v44 = vld [vmem:[#allocation28_spill] sm:$0xff] }
 0x310   : > { %3723 = vpow2.f32 %v1469_v19  ;;  %v1431_v6 = vsub.f32 %v8330_v5, %v1375_v2  ;;  %v1432_v8 = vsub.f32 %v8331_v7, %v1375_v2  ;;  %v1429_v15 = vsub.f32 %v8332_v9, %v1370_v4  ;;  %v8342_v7 = vld [vmem:[#allocation36_spill] sm:$0xff] }
 0x311   : > { %3725 = vpow2.f32 %v1471_v55  ;;  %v1430_v57 = vsub.f32 %v8333_v51, %v1370_v4  ;;  %v8344_v51 = vld [vmem:[#allocation38_spill] sm:$0xff] }
 0x312   : > { %3727 = vpow2.f32 %v1465_v62  ;;  %v1477_v59 = vmul.f32 1.442695, %v1431_v6  ;;  %v1479_v58 = vmul.f32 1.442695, %v1432_v8  ;;  %v1473_v10 = vmul.f32 1.442695, %v1429_v15 }
 0x313   : > { %3729 = vpow2.f32 %v1467_v0  ;;  %v1475_v17 = vmul.f32 1.442695, %v1430_v57  ;;  %v1385_v56 = vpop.permute.xlu1 %1384  ;;  %v1380_v27 = vpop.permute.xlu0 %1379 }
 0x314   : > { %3731 = vpow2.f32 %v1477_v59  ;;  %v1435_v39 = vsub.f32 %v8334_v44, %v1385_v56  ;;  %v1436_v11 = vsub.f32 %v8335_v26, %v1385_v56  ;;  %v1433_v12 = vsub.f32 %v8336_v38, %v1380_v27  ;;  %v8348_v26 = vld [vmem:[#allocation34_spill] sm:$0xff] }
 0x315   : > { %v7094_v0 = vpop.eup %3707   ;;  %3733 = vpow2.f32 %v1479_v58  ;;  %v1434_v14 = vsub.f32 %v8337_v16, %v1380_v27 }
 0x316   : > { %v7097_v21 = vpop.eup %3709   ;;  %3735 = vpow2.f32 %v1473_v10  ;;  %v1485_v60 = vmul.f32 1.442695, %v1435_v39  ;;  %v1487_v20 = vmul.f32 1.442695, %v1436_v11  ;;  %v1481_v62 = vmul.f32 1.442695, %v1433_v12 }
 0x317   : > { %v8338_v49 = vmov %v7097_v21  ;;  %v7099_v19 = vpop.eup %3711   ;;  %3737 = vpow2.f32 %v1475_v17  ;;  %v1395_v2 = vpop.permute.xlu1 %1394  ;;  %v1483_v5 = vmul.f32 1.442695, %v1434_v14  ;;  %v8347_v17 = vld [vmem:[#allocation32_spill] sm:$0xff] }
 0x318   : > { %8339 = vst [vmem:[#allocation113_spill] sm:$0xff] %v7099_v19  ;;  %v7101_v4 = vpop.eup %3713   ;;  %3739 = vpow2.f32 %v1485_v60  ;;  %v1439_v8 = vsub.f32 %v8342_v7, %v1395_v2  ;;  %v1390_v9 = vpop.permute.xlu0 %1389  ;;  %v1440_v57 = vsub.f32 %v8344_v51, %v1395_v2  ;;  %v8350_v14 = vld [vmem:[#allocation44_spill] sm:$0xff]  ;;  %v8352_v19 = vld [vmem:[#allocation46_spill] sm:$0xff] }
 0x319   : > { %8340 = vst [vmem:[#allocation112_spill] sm:$0xff] %v7101_v4  ;;  %v7103_v6 = vpop.eup %3715   ;;  %3741 = vpow2.f32 %v1487_v20  ;;  %v1437_v56 = vsub.f32 %v8347_v17, %v1390_v9  ;;  %v1438_v11 = vsub.f32 %v8348_v26, %v1390_v9  ;;  %v8353_v9 = vld [vmem:[#allocation40_spill] sm:$0xff] }
 0x31a   : > { %v8341_v33 = vmov %v7103_v6  ;;  %v7106_v15 = vpop.eup %3717   ;;  %3743 = vpow2.f32 %v1481_v62  ;;  %v1493_v59 = vmul.f32 1.442695, %v1439_v8  ;;  %v1495_v10 = vmul.f32 1.442695, %v1440_v57 }
 0x31b   : > { %v8343_v27 = vmov %v7106_v15  ;;  %v7109_v62 = vpop.eup %3719   ;;  %3745 = vpow2.f32 %v1483_v5  ;;  %v1405_v39 = vpop.permute.xlu1 %1404  ;;  %v1489_v12 = vmul.f32 1.442695, %v1437_v56  ;;  %v1491_v16 = vmul.f32 1.442695, %v1438_v11  ;;  %8369 = vst [vmem:[#allocation89_spill] sm:$0xff] %v8341_v33 }
 0x31c   : > { %8345 = vst [vmem:[#allocation114_spill] sm:$0xff] %v7109_v62  ;;  %v7111_v58 = vpop.eup %3721   ;;  %3747 = vpow2.f32 %v1493_v59  ;;  %v1443_v21 = vsub.f32 %v8350_v14, %v1405_v39  ;;  %v1400_v60 = vpop.permute.xlu0 %1399  ;;  %v1444_v2 = vsub.f32 %v8352_v19, %v1405_v39  ;;  %v8355_v59 = vld [vmem:[#allocation42_spill] sm:$0xff]  ;;  %v8356_v39 = vld [vmem:[#allocation52_spill] sm:$0xff] }
 0x31d   : > { %8346 = vst [vmem:[#allocation115_spill] sm:$0xff] %v7111_v58  ;;  %v7114_v4 = vpop.eup %3723   ;;  %3749 = vpow2.f32 %v1495_v10  ;;  %v1441_v15 = vsub.f32 %v8353_v9, %v1400_v60  ;;  %v1442_v58 = vsub.f32 %v8355_v59, %v1400_v60  ;;  %v8359_v19 = vld [vmem:[#allocation48_spill] sm:$0xff]  ;;  %v8360_v9 = vld [vmem:[#allocation50_spill] sm:$0xff] }
 0x31e   : > { %v7117_v38 = vpop.eup %3725   ;;  %3751 = vpow2.f32 %v1489_v12  ;;  %v1501_v5 = vmul.f32 1.442695, %v1443_v21  ;;  %v1503_v7 = vmul.f32 1.442695, %v1444_v2 }
 0x31f   : > { %v8349_v6 = vmov %v7117_v38  ;;  %v7119_v56 = vpop.eup %3727   ;;  %3753 = vpow2.f32 %v1491_v16  ;;  %v1415_v51 = vpop.permute.xlu1 %1414  ;;  %v1497_v10 = vmul.f32 1.442695, %v1441_v15  ;;  %v1499_v17 = vmul.f32 1.442695, %v1442_v58  ;;  %v8357_v16 = vld [vmem:[#allocation54_spill] sm:$0xff] }
 0x320   : > { %v7122_v20 = vpop.eup %3729   ;;  %3755 = vpow2.f32 %v1501_v5  ;;  %v1447_v38 = vsub.f32 %v8356_v39, %v1415_v51  ;;  %v1410_v12 = vpop.permute.xlu0 %1409  ;;  %v1448_v14 = vsub.f32 %v8357_v16, %v1415_v51  ;;  %v8363_v51 = vmov %v8286_v50 }
 0x321   : > { %v8351_v44 = vmov %v7122_v20  ;;  %v7125_v8 = vpop.eup %3731   ;;  %3757 = vpow2.f32 %v1503_v7  ;;  %v1445_v2 = vsub.f32 %v8359_v19, %v1410_v12  ;;  %v1446_v15 = vsub.f32 %v8360_v9, %v1410_v12 }
 0x322   : > { %v7127_v26 = vpop.eup %3733   ;;  %3759 = vpow2.f32 %v1497_v10  ;;  %v1509_v20 = vmul.f32 1.442695, %v1447_v38  ;;  %v1511_v60 = vmul.f32 1.442695, %v1448_v14  ;;  %v8370_v39 = vmov %v8338_v49  ;;  %v8375_v49 = vld [vmem:[#allocation113_spill] sm:$0xff] }
 0x323   : > { %v7130_v57 = vpop.eup %3735   ;;  %3761 = vpow2.f32 %v1499_v17  ;;  %v1507_v59 = vmul.f32 1.442695, %v1446_v15 }
 0x324   : > { %v8354_v62 = vmov %v7130_v57  ;;  %v7133_v5 = vpop.eup %3737   ;;  %3763 = vpow2.f32 %v1509_v20  ;;  %v1505_v57 = vmul.f32 1.442695, %v1445_v2 }
 0x325   : > { %v7135_v11 = vpop.eup %3739   ;;  %3765 = vpow2.f32 %v1511_v60  ;;  %v8365_v50 = vmov %v8354_v62  ;;  %v8372_v62 = vld [vmem:[#allocation114_spill] sm:$0xff] }
 0x326   : > { %v7138_v58 = vpop.eup %3741   ;;  %3767 = vpow2.f32 %v1505_v57  ;;  %v8362_v57 = vmov %v7003_v13  ;;  %v8366_v13 = vmov %v8349_v6  ;;  %v8367_v6 = vmov %v8351_v44 }
 0x327   : > { %v7141_v21 = vpop.eup %3743   ;;  %3769 = vpow2.f32 %v1507_v59  ;;  %v8361_v59 = vld [vmem:[#allocation6_spill] sm:$0xff] }
 0x328   : > { %v8358_v55 = vmov %v7141_v21  ;;  %v7143_v7 = vpop.eup %3745   ;;  %8368 = vst [vmem:[#allocation6_spill] sm:$0xff] %v8343_v27  ;;  %v8371_v27 = vld [vmem:[#allocation115_spill] sm:$0xff] }
 0x329   : > { %v3748_v12 = vpop.eup %3747   ;;  %v8364_v38 = vmov %v8358_v55  ;;  %v8373_v55 = vld [vmem:[#allocation112_spill] sm:$0xff] }
 0x32a   : > { %v3750_v2 = vpop.eup %3749   ;;  %8374 = vst [vmem:[#allocation112_spill] sm:$0xff] %v8373_v55 }
 0x32b   : > { %v3752_v60 = vpop.eup %3751  }
 0x32c   : > { %v3754_v9 = vpop.eup %3753  }
 0x32d   : > { %v3756_v17 = vpop.eup %3755  }
 0x32e   : > { %v3758_v14 = vpop.eup %3757  }
 0x32f   : > { %v3760_v15 = vpop.eup %3759  }
 0x330   : > { %v3762_v10 = vpop.eup %3761  }
 0x331   : > { %v3764_v16 = vpop.eup %3763  }
 0x332   : > { %v3766_v20 = vpop.eup %3765  }
 0x333   : > { %v3768_v19 = vpop.eup %3767  }
 0x334   : > { %v3770_v21 = vpop.eup %3769  }
 0x335 PF: > { %8379 = vst [vmem:[#allocation11_spill] sm:$0xff] %v4661_v63  ;;  %8380 = vst [vmem:[#allocation7_spill] sm:$0xff] %v4665_v32  ;;  %v8387_v33 = vld [vmem:[#allocation6_spill] sm:$0xff]  ;;  %vm8391_vm9 = vcmask 7168   ;;  %v4913_v49 = vphi %v4657_v49, %v8375_v49   ;;  %v4905_v62 = vphi %v8246_v62, %v8372_v62   ;;  %v4901_v27 = vphi %v4645_v27, %v8371_v27   ;;  %v4897_v0 = vphi %v4641_v0, %v7094_v0   ;;  %v4893_v39 = vphi %v4637_v39, %v8370_v39   ;;  %v4881_v56 = vphi %v4625_v56, %v7119_v56   ;;  %v4877_v6 = vphi %v4621_v6, %v8367_v6   ;;  %v4873_v4 = vphi %v4617_v4, %v7114_v4   ;;  %v4869_v13 = vphi %v4613_v13, %v8366_v13   ;;  %v4865_v50 = vphi %v4609_v50, %v8365_v50   ;;  %v4861_v5 = vphi %v4605_v5, %v7133_v5   ;;  %v4857_v8 = vphi %v4601_v8, %v7125_v8   ;;  %v4853_v26 = vphi %v4597_v26, %v7127_v26   ;;  %v4849_v38 = vphi %v4593_v38, %v8364_v38   ;;  %v4845_v7 = vphi %v4589_v7, %v7143_v7   ;;  %v4841_v11 = vphi %v4585_v11, %v7135_v11   ;;  %v4837_v58 = vphi %v4581_v58, %v7138_v58   ;;  %v4833_v60 = vphi %v4577_v60, %v3752_v60   ;;  %v4829_v9 = vphi %v4573_v9, %v3754_v9   ;;  %v4825_v12 = vphi %v4569_v12, %v3748_v12   ;;  %v4821_v2 = vphi %v4565_v2, %v3750_v2   ;;  %v4817_v15 = vphi %v4561_v15, %v3760_v15   ;;  %v4813_v10 = vphi %v4557_v10, %v3762_v10   ;;  %v4809_v17 = vphi %v4553_v17, %v3756_v17   ;;  %v4805_v14 = vphi %v4549_v14, %v3758_v14   ;;  %v4801_v19 = vphi %v4545_v19, %v3768_v19   ;;  %v4797_v21 = vphi %v4541_v21, %v3770_v21   ;;  %v4793_v16 = vphi %v4537_v16, %v3764_v16   ;;  %v4789_v20 = vphi %v4533_v20, %v3766_v20   ;;  %v4785_v18 = vphi %v4529_v18, %v6918_v18   ;;  %v4781_v35 = vphi %v4525_v35, %v6923_v35   ;;  %v4777_v48 = vphi %v4521_v48, %v6928_v48   ;;  %v4773_v34 = vphi %v4517_v34, %v6933_v34   ;;  %v4769_v36 = vphi %v4513_v36, %v6938_v36   ;;  %v4765_v22 = vphi %v4509_v22, %v6943_v22   ;;  %v4761_v24 = vphi %v4505_v24, %v6948_v24   ;;  %v4757_v40 = vphi %v4501_v40, %v6953_v40   ;;  %v4753_v42 = vphi %v4497_v42, %v6958_v42   ;;  %v4749_v28 = vphi %v4493_v28, %v6963_v28   ;;  %v4745_v30 = vphi %v4489_v30, %v6968_v30   ;;  %v4741_v51 = vphi %v4485_v51, %v8363_v51   ;;  %v4737_v53 = vphi %v4481_v53, %v6978_v53   ;;  %v4733_v45 = vphi %v4477_v45, %v6983_v45   ;;  %v4729_v47 = vphi %v4473_v47, %v6988_v47   ;;  %v4725_v1 = vphi %v4469_v1, %v6993_v1   ;;  %v4721_v3 = vphi %v4465_v3, %v6998_v3   ;;  %v4717_v57 = vphi %v4461_v57, %v8362_v57   ;;  %v4713_v59 = vphi %v4457_v59, %v8361_v59   ;;  %v4709_v29 = vphi %v4453_v29, %v7013_v29   ;;  %v4705_v31 = vphi %v4449_v31, %v7018_v31   ;;  %v4701_v23 = vphi %v4445_v23, %v7023_v23   ;;  %v4697_v25 = vphi %v4441_v25, %v7028_v25   ;;  %v4693_v41 = vphi %v4437_v41, %v7033_v41   ;;  %v4689_v43 = vphi %v4433_v43, %v7038_v43   ;;  %v4685_v37 = vphi %v4429_v37, %v7043_v37   ;;  %v4681_v61 = vphi %v4425_v61, %v7048_v61   ;;  %v4677_v52 = vphi %v4421_v52, %v7053_v52   ;;  %v4673_v46 = vphi %v4417_v46, %v7058_v46   ;;  %v4669_v54 = vphi %v4413_v54, %v7063_v54   ;;  %v4665_v32 = vphi %v4409_v32, %v7068_v32   ;;  %v4661_v63 = vphi %v4405_v63, %v7073_v63  }
 0x336   : > { %8381 = vst [vmem:[#allocation8_spill] sm:$0xff] %v4669_v54  ;;  %8382 = vst [vmem:[#allocation14_spill] sm:$0xff] %v4673_v46  ;;  %v8389_v55 = vld [vmem:[#allocation112_spill] sm:$0xff]  ;;  %v1727_v54 = vadd.f32 %v4893_v39, %v4897_v0  ;;  %v8402_v0 = vld [vmem:[#allocation84_spill] sm:$0xff] }
 0x337   : > { %8383 = vst [vmem:[#allocation9_spill] sm:$0xff] %v4677_v52  ;;  %8384 = vst [vmem:[#allocation10_spill] sm:$0xff] %v4681_v61  ;;  %v1721_v46 = vadd.f32 %v8389_v55, %v4913_v49  ;;  %v8390_v63 = vld [vmem:[#allocation62_spill] sm:$0xff]  ;;  %v8398_v52 = vld [vmem:[#allocation76_spill] sm:$0xff] }
 0x338   : > { %8385 = vst [vmem:[#allocation16_spill] sm:$0xff] %v4685_v37  ;;  %8386 = vst [vmem:[#allocation12_spill] sm:$0xff] %v4689_v43  ;;  %v8392_v32 = vld [vmem:[#allocation58_spill] sm:$0xff]  ;;  %v8394_v37 = vld [vmem:[#allocation68_spill] sm:$0xff]  ;;  %1728 = vadd.xlane.f32.xlu1 %v1727_v54  ;;  %v1760_v54 = vadd.f32 %v4805_v14, %v4809_v17 }
 0x339   : > { %1803 = vst.msk [vmem:[#allocation2 + $0x8] sm:$0xff] %vm8391_vm9, %v8390_v63  ;;  %vm8393_vm13 = vmmov %vm8391_vm9  ;;  %v8396_v43 = vld [vmem:[#allocation65_spill] sm:$0xff]  ;;  %v8400_v61 = vld [vmem:[#allocation72_spill] sm:$0xff]  ;;  %1722 = vadd.xlane.f32.xlu0 %v1721_v46  ;;  %v1757_v46 = vadd.f32 %v4813_v10, %v4817_v15 }
 0x33a   : > { %1802 = vst.msk [vmem:[#allocation2] sm:$0xff] %vm8393_vm13, %v8392_v32  ;;  %vm8395_vm6 = vmmov %vm8391_vm9  ;;  %v8404_v49 = vld [vmem:[#allocation80_spill] sm:$0xff]  ;;  %v8406_v39 = vld [vmem:[#allocation61_spill] sm:$0xff]  ;;  %v1739_v32 = vadd.f32 %v4861_v5, %v4865_v50  ;;  %v1968_v50 = vadd.f32 %v4765_v22, %v4769_v36 }
 0x33b   : > { %v8388_v44 = vld [vmem:[#allocation89_spill] sm:$0xff]  ;;  %1805 = vst.msk [vmem:[#allocation2 + $0x18] sm:$0xff] %vm8395_vm6, %v8394_v37  ;;  %vm8397_vm4 = vmmov %vm8395_vm6  ;;  %v8410_v63 = vld [vmem:[#allocation71_spill] sm:$0xff] }
 0x33c   : > { %1804 = vst.msk [vmem:[#allocation2 + $0x10] sm:$0xff] %vm8397_vm4, %v8396_v43  ;;  %vm8399_vm3 = vmmov %vm8397_vm4  ;;  %v8408_v55 = vld [vmem:[#allocation57_spill] sm:$0xff]  ;;  %v8412_v37 = vld [vmem:[#allocation66_spill] sm:$0xff]  ;;  %v1745_v43 = vadd.f32 %v4845_v7, %v4849_v38 }
 0x33d   : > { %1807 = vst.msk [vmem:[#allocation2 + $0x28] sm:$0xff] %vm8399_vm3, %v8398_v52  ;;  %vm8401_vm2 = vmmov %vm8399_vm3  ;;  %v8414_v52 = vld [vmem:[#allocation79_spill] sm:$0xff] }
 0x33e   : > { %1806 = vst.msk [vmem:[#allocation2 + $0x20] sm:$0xff] %vm8401_vm2, %v8400_v61  ;;  %vm8403_vm7 = vmmov %vm8401_vm2  ;;  %v8416_v61 = vld [vmem:[#allocation75_spill] sm:$0xff] }
 0x33f   : > { %1809 = vst.msk [vmem:[#allocation2 + $0x38] sm:$0xff] %vm8403_vm7, %v8402_v0  ;;  %vm8405_vm8 = vmmov %vm8401_vm2  ;;  %v8418_v0 = vld [vmem:[#allocation87_spill] sm:$0xff]  ;;  %v8424_v7 = vld [vmem:[#allocation12_spill] sm:$0xff] }
 0x340   : > { %1808 = vst.msk [vmem:[#allocation2 + $0x30] sm:$0xff] %vm8405_vm8, %v8404_v49  ;;  %vm8407_vm1 = vmmov %vm8401_vm2  ;;  %v8420_v49 = vld [vmem:[#allocation83_spill] sm:$0xff] }
 0x341   : > { %1811 = vst.msk [vmem:[#allocation2 + $0x48] sm:$0xff] %vm8407_vm1, %v8406_v39  ;;  %vm8409_vm10 = vmmov %vm8407_vm1  ;;  %v1724_v39 = vadd.f32 %v4901_v27, %v4905_v62  ;;  %v1983_v62 = vadd.f32 %v4725_v1, %v4729_v47  ;;  %v1986_v27 = vadd.f32 %v4717_v57, %v4721_v3  ;;  %v8426_v17 = vld [vmem:[#allocation7_spill] sm:$0xff] }
 0x342   : > { %1810 = vst.msk [vmem:[#allocation2 + $0x40] sm:$0xff] %vm8409_vm10, %v8408_v55  ;;  %vm8411_vm5 = vmmov %vm8407_vm1  ;;  %v1730_v55 = vadd.f32 %v8387_v33, %v8388_v44  ;;  %v8427_v38 = vld [vmem:[#allocation11_spill] sm:$0xff]  ;;  %v8433_v33 = vld [vmem:[#allocation25_spill] sm:$0xff] }
 0x343   : > { %1813 = vst.msk [vmem:[#allocation2 + $0x58] sm:$0xff] %vm8411_vm5, %v8410_v63  ;;  %vm8413_vm11 = vmmov %vm8407_vm1  ;;  %1725 = vadd.xlane.f32.xlu0 %v1724_v39  ;;  %v1736_v63 = vadd.f32 %v4869_v13, %v4873_v4  ;;  %v1974_v13 = vadd.f32 %v4749_v28, %v4753_v42  ;;  %v1980_v4 = vadd.f32 %v4733_v45, %v4737_v53 }
 0x344   : > { %1812 = vst.msk [vmem:[#allocation2 + $0x50] sm:$0xff] %vm8413_vm11, %v8412_v37  ;;  %vm8415_vm0 = vmmov %vm8407_vm1  ;;  %1731 = vadd.xlane.f32.xlu1 %v1730_v55  ;;  %v1733_v37 = vadd.f32 %v4877_v6, %v4881_v56  ;;  %v1995_v56 = vadd.f32 %v4693_v41, %v4697_v25  ;;  %v8423_v6 = vld [vmem:[#allocation9_spill] sm:$0xff]  ;;  %v1835_v44 = vmul.f32 %v4781_v35, %v8433_v33  ;;  %v8453_v33 = vld [vmem:[#allocation34_spill] sm:$0xff] }
 0x345   : > { %1815 = vst.msk [vmem:[#allocation2 + $0x68] sm:$0xff] %vm8415_vm0, %v8414_v52  ;;  %vm8417_vm14 = vmmov %vm8415_vm0  ;;  %v1742_v52 = vadd.f32 %v4853_v26, %v4857_v8  ;;  %v1989_v8 = vadd.f32 %v4709_v29, %v4713_v59  ;;  %v1992_v26 = vadd.f32 %v4701_v23, %v4705_v31  ;;  %v8435_v55 = vld [vmem:[#allocation37_spill] sm:$0xff] }
 0x346   : > { %1814 = vst.msk [vmem:[#allocation2 + $0x60] sm:$0xff] %vm8417_vm14, %v8416_v61  ;;  %vm8419_vm15 = vmmov %vm8415_vm0  ;;  %v1748_v61 = vadd.f32 %v4837_v58, %v4841_v11  ;;  %v8422_v11 = vld [vmem:[#allocation10_spill] sm:$0xff]  ;;  %v8425_v58 = vld [vmem:[#allocation16_spill] sm:$0xff] }
 0x347   : > { %1817 = vst.msk [vmem:[#allocation2 + $0x78] sm:$0xff] %vm8419_vm15, %v8418_v0  ;;  %vm8421_vm12 = vmmov %vm8415_vm0  ;;  %1734 = vadd.xlane.f32.xlu0 %v1733_v37  ;;  %v1754_v0 = vadd.f32 %v4821_v2, %v4825_v12  ;;  %v1971_v37 = vadd.f32 %v4757_v40, %v4761_v24  ;;  %v2001_v5 = vadd.f32 %v8423_v6, %v8422_v11 }
 0x348   : > { %1816 = vst.msk [vmem:[#allocation2 + $0x70] sm:$0xff] %vm8421_vm12, %v8420_v49  ;;  %1737 = vadd.xlane.f32.xlu1 %v1736_v63  ;;  %v1751_v49 = vadd.f32 %v4829_v9, %v4833_v60  ;;  %v1965_v63 = vadd.f32 %v4773_v34, %v4777_v48  ;;  %v1998_v10 = vadd.f32 %v8425_v58, %v8424_v7  ;;  %v8430_v60 = vld [vmem:[#allocation14_spill] sm:$0xff]  ;;  %v8432_v9 = vld [vmem:[#allocation23_spill] sm:$0xff]  ;;  %vm8494_vm9 = vmmov %vm8415_vm0 }
 0x349   : > { %v2007_v12 = vadd.f32 %v8427_v38, %v8426_v17  ;;  %v1834_v15 = vmul.f32 %v4785_v18, %v8432_v9  ;;  %vm8495_vm13 = vmmov %vm8415_vm0 }
 0x34a   : > { %vm8496_vm6 = vmmov %vm8415_vm0 }
 0x34b   : > { %1740 = vadd.xlane.f32.xlu0 %v1739_v32  ;;  %v1763_v32 = vadd.f32 %v4797_v21, %v4801_v19  ;;  %v8429_v21 = vld [vmem:[#allocation29_spill] sm:$0xff]  ;;  %v8431_v19 = vld [vmem:[#allocation8_spill] sm:$0xff]  ;;  %vm8497_vm4 = vmmov %vm8415_vm0 }
 0x34c   : > { %1743 = vadd.xlane.f32.xlu1 %v1742_v52  ;;  %v1766_v52 = vadd.f32 %v4789_v20, %v4793_v16  ;;  %v8428_v16 = vld [vmem:[#allocation27_spill] sm:$0xff]  ;;  %v1837_v20 = vmul.f32 %v4773_v34, %v8429_v21  ;;  %v2004_v2 = vadd.f32 %v8431_v19, %v8430_v60  ;;  %v1866_v34 = vadd.f32 %v1835_v44, %v1834_v15  ;;  %vm8498_vm3 = vmmov %vm8415_vm0 }
 0x34d   : > { %v1836_v14 = vmul.f32 %v4777_v48, %v8428_v16  ;;  %v1841_v48 = vmul.f32 %v4757_v40, %v8435_v55  ;;  %v8440_v40 = vld [vmem:[#allocation39_spill] sm:$0xff]  ;;  %v1855_v44 = vmul.f32 %v4701_v23, %v8453_v33  ;;  %vm8499_vm2 = vmmov %vm8415_vm0 }
 0x34e   : > { %vm8500_vm7 = vmmov %vm8415_vm0 }
 0x34f   : > { %1746 = vadd.xlane.f32.xlu0 %v1745_v43  ;;  %v1977_v43 = vadd.f32 %v4741_v51, %v4745_v30  ;;  %vm8501_vm8 = vmmov %vm8415_vm0 }
 0x350   : > { %1749 = vadd.xlane.f32.xlu1 %v1748_v61  ;;  %v1962_v61 = vadd.f32 %v4781_v35, %v4785_v18  ;;  %vm8502_vm1 = vmmov %vm8415_vm0 }
 0x351   : > { %vm8503_vm10 = vmmov %vm8415_vm0 }
 0x352   : > { %vm8504_vm5 = vmmov %vm8415_vm0 }
 0x353   : > { %1752 = vadd.xlane.f32.xlu0 %v1751_v49  ;;  %v8434_v49 = vld [vmem:[#allocation35_spill] sm:$0xff]  ;;  %vm8505_vm11 = vmmov %vm8415_vm0 }
 0x354   : > { %1755 = vadd.xlane.f32.xlu1 %v1754_v0  ;;  %v1869_v0 = vadd.f32 %v1837_v20, %v1836_v14  ;;  %v1840_v39 = vmul.f32 %v4761_v24, %v8434_v49  ;;  %v8449_v14 = vld [vmem:[#allocation26_spill] sm:$0xff]  ;;  %v8450_v20 = vld [vmem:[#allocation36_spill] sm:$0xff]  ;;  %vm8506_vm14 = vmmov %vm8415_vm0 }
 0x355   : > { %v1851_v21 = vmul.f32 %v4717_v57, %v8449_v14  ;;  %v8455_v49 = vld [vmem:[#allocation46_spill] sm:$0xff]  ;;  %vm8507_vm15 = vmmov %vm8415_vm0 }
 0x356   : > { %v1875_v18 = vadd.f32 %v1841_v48, %v1840_v39  ;;  %v1861_v39 = vmul.f32 %v8423_v6, %v8455_v49  ;;  %v8457_v48 = vld [vmem:[#allocation42_spill] sm:$0xff]  ;;  %v8460_v6 = vld [vmem:[#allocation48_spill] sm:$0xff]  ;;  %vm8508_vm12 = vmmov %vm8415_vm0 }
 0x357   : > { %1758 = vadd.xlane.f32.xlu0 %v1757_v46 }
 0x358   : > { %1761 = vadd.xlane.f32.xlu1 %v1760_v54  ;;  %v8436_v54 = vld [vmem:[#allocation31_spill] sm:$0xff] }
 0x359   : > { %v1838_v46 = vmul.f32 %v4769_v36, %v8436_v54  ;;  %v8458_v54 = vld [vmem:[#allocation52_spill] sm:$0xff] }
 0x35a   : > { %v1864_v23 = vmul.f32 %v8426_v17, %v8458_v54  ;;  %v8463_v17 = vld [vmem:[#allocation63_spill] sm:$0xff] }
 0x35b   : > { %1764 = vadd.xlane.f32.xlu0 %v1763_v32 }
 0x35c   : > { %1767 = vadd.xlane.f32.xlu1 %v1766_v52  ;;  %v8437_v52 = vld [vmem:[#allocation33_spill] sm:$0xff] }
 0x35d   : > { %v1839_v32 = vmul.f32 %v4765_v22, %v8437_v52 }
 0x35f   : > { %1963 = vadd.xlane.f32.xlu0 %v1962_v61  ;;  %v8439_v61 = vld [vmem:[#allocation45_spill] sm:$0xff]  ;;  %v1872_v24 = vadd.f32 %v1839_v32, %v1838_v46  ;;  %v8459_v46 = vld [vmem:[#allocation54_spill] sm:$0xff]  ;;  %v1862_v32 = vmul.f32 %v8430_v60, %v8460_v6 }
 0x360   : > { %1966 = vadd.xlane.f32.xlu1 %v1965_v63  ;;  %v8438_v63 = vld [vmem:[#allocation43_spill] sm:$0xff]  ;;  %v1865_v52 = vmul.f32 %v8427_v38, %v8459_v46  ;;  %v8465_v38 = vld [vmem:[#allocation56_spill] sm:$0xff] }
 0x361   : > { %v1844_v35 = vmul.f32 %v4745_v30, %v8438_v63  ;;  %v8488_v46 = vld [vmem:[#allocation75_spill] sm:$0xff] }
 0x363   : > { %1969 = vadd.xlane.f32.xlu0 %v1968_v50  ;;  %v1842_v50 = vmul.f32 %v4753_v42, %v8440_v40 }
 0x364   : > { %1972 = vadd.xlane.f32.xlu1 %v1971_v37  ;;  %v1845_v37 = vmul.f32 %v4741_v51, %v8439_v61  ;;  %v8444_v51 = vld [vmem:[#allocation47_spill] sm:$0xff] }
 0x366   : > { %v1881_v36 = vadd.f32 %v1845_v37, %v1844_v35  ;;  %v8462_v35 = vld [vmem:[#allocation65_spill] sm:$0xff]  ;;  %v8464_v37 = vld [vmem:[#allocation58_spill] sm:$0xff] }
 0x367   : > { %1975 = vadd.xlane.f32.xlu0 %v1974_v13  ;;  %v1643_v61 = vsub.f32 %v8463_v17, %v8462_v35  ;;  %v8490_v17 = vld [vmem:[#allocation87_spill] sm:$0xff] }
 0x368   : > { %1978 = vadd.xlane.f32.xlu1 %v1977_v43  ;;  %v8441_v43 = vld [vmem:[#allocation41_spill] sm:$0xff] }
 0x369   : > { %v1843_v13 = vmul.f32 %v4749_v28, %v8441_v43  ;;  %v1661_v40 = vmul.f32 1.442695, %v1643_v61  ;;  %v8467_v43 = vld [vmem:[#allocation67_spill] sm:$0xff]  ;;  %v8491_v61 = vld [vmem:[#allocation85_spill] sm:$0xff] }
 0x36b   : > { %1981 = vadd.xlane.f32.xlu0 %v1980_v4  ;;  %v8443_v4 = vld [vmem:[#allocation53_spill] sm:$0xff]  ;;  %v1878_v30 = vadd.f32 %v1843_v13, %v1842_v50  ;;  %v8466_v50 = vld [vmem:[#allocation68_spill] sm:$0xff]  ;;  %3771 = vpow2.f32 %v1661_v40 }
 0x36c   : > { %1984 = vadd.xlane.f32.xlu1 %v1983_v62  ;;  %v8442_v62 = vld [vmem:[#allocation51_spill] sm:$0xff]  ;;  %v1644_v13 = vsub.f32 %v8467_v43, %v8466_v50  ;;  %v8493_v43 = vld [vmem:[#allocation81_spill] sm:$0xff] }
 0x36d   : > { %v1848_v22 = vmul.f32 %v4729_v47, %v8442_v62  ;;  %v8469_v62 = vld [vmem:[#allocation60_spill] sm:$0xff]  ;;  %v8492_v50 = vld [vmem:[#allocation83_spill] sm:$0xff] }
 0x36f   : > { %1987 = vadd.xlane.f32.xlu0 %v1986_v27  ;;  %v1846_v27 = vmul.f32 %v4737_v53, %v8444_v51 }
 0x370   : > { %1990 = vadd.xlane.f32.xlu1 %v1989_v8  ;;  %v1849_v8 = vmul.f32 %v4725_v1, %v8443_v4  ;;  %v8448_v1 = vld [vmem:[#allocation24_spill] sm:$0xff] }
 0x371   : > { %v1850_v16 = vmul.f32 %v4721_v3, %v8448_v1  ;;  %v8470_v4 = vld [vmem:[#allocation76_spill] sm:$0xff]  ;;  %v8477_v1 = vld [vmem:[#allocation78_spill] sm:$0xff] }
 0x372   : > { %v1887_v42 = vadd.f32 %v1849_v8, %v1848_v22  ;;  %v1663_v22 = vmul.f32 1.442695, %v1644_v13  ;;  %v8471_v8 = vld [vmem:[#allocation74_spill] sm:$0xff]  ;;  %v1655_v13 = vsub.f32 %v8493_v43, %v8492_v50 }
 0x373   : > { %1993 = vadd.xlane.f32.xlu0 %v1992_v26 }
 0x374   : > { %1996 = vadd.xlane.f32.xlu1 %v1995_v56  ;;  %v8445_v56 = vld [vmem:[#allocation49_spill] sm:$0xff] }
 0x375   : > { %v1847_v26 = vmul.f32 %v4733_v45, %v8445_v56  ;;  %v1856_v45 = vmul.f32 %v4697_v25, %v8450_v20  ;;  %v8473_v56 = vld [vmem:[#allocation70_spill] sm:$0xff] }
 0x377   : > { %1999 = vadd.xlane.f32.xlu0 %v1998_v10  ;;  %v8447_v10 = vld [vmem:[#allocation30_spill] sm:$0xff]  ;;  %v1884_v47 = vadd.f32 %v1847_v26, %v1846_v27  ;;  %v8472_v27 = vld [vmem:[#allocation72_spill] sm:$0xff] }
 0x378   : > { %2002 = vadd.xlane.f32.xlu1 %v2001_v5  ;;  %v8446_v5 = vld [vmem:[#allocation28_spill] sm:$0xff]  ;;  %v1645_v26 = vsub.f32 %v8473_v56, %v8472_v27  ;;  %v3772_v49 = vpop.eup %3771 }
 0x379   : > { %v1852_v28 = vmul.f32 %v4713_v59, %v8446_v5  ;;  %v1890_v59 = vadd.f32 %v1851_v21, %v1850_v16  ;;  %v8474_v5 = vld [vmem:[#allocation84_spill] sm:$0xff]  ;;  %v8478_v21 = vld [vmem:[#allocation61_spill] sm:$0xff] }
 0x37b   : > { %2005 = vadd.xlane.f32.xlu0 %v2004_v2  ;;  %v8451_v2 = vld [vmem:[#allocation38_spill] sm:$0xff] }
 0x37c   : > { %2008 = vadd.xlane.f32.xlu1 %v2007_v12  ;;  %v1853_v12 = vmul.f32 %v4709_v29, %v8447_v10  ;;  %v1857_v9 = vmul.f32 %v4693_v41, %v8451_v2  ;;  %v8452_v29 = vld [vmem:[#allocation32_spill] sm:$0xff]  ;;  %v8480_v2 = vld [vmem:[#allocation57_spill] sm:$0xff] }
 0x37d   : > { %v1854_v15 = vmul.f32 %v4705_v31, %v8452_v29  ;;  %v8456_v41 = vld [vmem:[#allocation40_spill] sm:$0xff]  ;;  %v8482_v29 = vld [vmem:[#allocation71_spill] sm:$0xff] }
 0x37e   : > { %v1893_v53 = vadd.f32 %v1853_v12, %v1852_v28  ;;  %v1899_v3 = vadd.f32 %v1857_v9, %v1856_v45  ;;  %v1858_v55 = vmul.f32 %v8424_v7, %v8456_v41  ;;  %v1911_v7 = vadd.f32 %v1865_v52, %v1864_v23  ;;  %v8475_v28 = vld [vmem:[#allocation82_spill] sm:$0xff]  ;;  %v8481_v9 = vld [vmem:[#allocation55_spill] sm:$0xff]  ;;  %v1691_v41 = vld [vmem:[#allocation3 + $0x10] sm:$0xff] }
 0x37f   : > { %1867 = vadd.xlane.f32.xlu0 %v1866_v34  ;;  %v1896_v25 = vadd.f32 %v1855_v44, %v1854_v15  ;;  %v1859_v34 = vmul.f32 %v8425_v58, %v8457_v48  ;;  %v1648_v10 = vsub.f32 %v8475_v28, %v8474_v5  ;;  %v1665_v12 = vmul.f32 1.442695, %v1645_v26  ;;  %v8483_v15 = vld [vmem:[#allocation69_spill] sm:$0xff] }
 0x380   : > { %1870 = vadd.xlane.f32.xlu1 %v1869_v0  ;;  %v8454_v0 = vld [vmem:[#allocation44_spill] sm:$0xff]  ;;  %v1652_v33 = vsub.f32 %v8483_v15, %v8482_v29  ;;  %v8489_v52 = vld [vmem:[#allocation73_spill] sm:$0xff]  ;;  %v1685_v26 = vmul.f32 1.442695, %v1655_v13  ;;  %v1698_v29 = vld [vmem:[#allocation3 + $0x48] sm:$0xff] }
 0x381   : > { %v1860_v57 = vmul.f32 %v8422_v11, %v8454_v0  ;;  %v1902_v11 = vadd.f32 %v1859_v34, %v1858_v55  ;;  %v1671_v14 = vmul.f32 1.442695, %v1648_v10  ;;  %v8485_v0 = vld [vmem:[#allocation64_spill] sm:$0xff]  ;;  %v1689_v55 = vld [vmem:[#allocation3] sm:$0xff]  ;;  %v8486_v34 = vld [vmem:[#allocation79_spill] sm:$0xff] }
 0x382   : > { %v1679_v48 = vmul.f32 1.442695, %v1652_v33  ;;  %v1697_v15 = vld [vmem:[#allocation3 + $0x40] sm:$0xff] }
 0x383   : > { %1873 = vadd.xlane.f32.xlu0 %v1872_v24  ;;  %v1905_v31 = vadd.f32 %v1861_v39, %v1860_v57  ;;  %v1641_v24 = vsub.f32 %v8465_v38, %v8464_v37  ;;  %v1656_v37 = vsub.f32 %v8491_v61, %v8490_v17 }
 0x384   : > { %1876 = vadd.xlane.f32.xlu1 %v1875_v18  ;;  %v8461_v18 = vld [vmem:[#allocation50_spill] sm:$0xff] }
 0x385   : > { %v1863_v63 = vmul.f32 %v8431_v19, %v8461_v18  ;;  %v1657_v60 = vmul.f32 1.442695, %v1641_v24 }
 0x387   : > { %1879 = vadd.xlane.f32.xlu0 %v1878_v30  ;;  %v1908_v58 = vadd.f32 %v1863_v63, %v1862_v32  ;;  %v1646_v30 = vsub.f32 %v8471_v8, %v8470_v4  ;;  %3773 = vpow2.f32 %v1657_v60  ;;  %v1707_v32 = vmul.f32 %v3772_v49, %v1691_v41  ;;  %v1694_v8 = vld [vmem:[#allocation3 + $0x28] sm:$0xff]  ;;  %v1700_v41 = vld [vmem:[#allocation3 + $0x58] sm:$0xff] }
 0x388   : > { %1882 = vadd.xlane.f32.xlu1 %v1881_v36  ;;  %v8468_v36 = vld [vmem:[#allocation62_spill] sm:$0xff]  ;;  %3775 = vpow2.f32 %v1663_v22 }
 0x389   : > { %v1642_v19 = vsub.f32 %v8469_v62, %v8468_v36 }
 0x38b   : > { %1885 = vadd.xlane.f32.xlu0 %v1884_v47  ;;  %v1659_v51 = vmul.f32 1.442695, %v1642_v19  ;;  %v8476_v47 = vld [vmem:[#allocation80_spill] sm:$0xff] }
 0x38c   : > { %1888 = vadd.xlane.f32.xlu1 %v1887_v42  ;;  %v1667_v42 = vmul.f32 1.442695, %v1646_v30  ;;  %v1647_v16 = vsub.f32 %v8477_v1, %v8476_v47  ;;  %v1693_v30 = vld [vmem:[#allocation3 + $0x20] sm:$0xff]  ;;  %v1696_v1 = vld [vmem:[#allocation3 + $0x38] sm:$0xff] }
 0x38d   : > { %3777 = vpow2.f32 %v1659_v51  ;;  %v1687_v51 = vmul.f32 1.442695, %v1656_v37 }
 0x38e   : > { %3779 = vpow2.f32 %v1667_v42  ;;  %v1669_v45 = vmul.f32 1.442695, %v1647_v16  ;;  %v1695_v16 = vld [vmem:[#allocation3 + $0x30] sm:$0xff] }
 0x38f   : > { %1891 = vadd.xlane.f32.xlu0 %v1890_v59  ;;  %3781 = vpow2.f32 %v1665_v12  ;;  %v1649_v59 = vsub.f32 %v8481_v9, %v8480_v2 }
 0x390   : > { %1894 = vadd.xlane.f32.xlu1 %v1893_v53  ;;  %v8479_v53 = vld [vmem:[#allocation59_spill] sm:$0xff]  ;;  %3783 = vpow2.f32 %v1671_v14 }
 0x391   : > { %v1650_v20 = vsub.f32 %v8479_v53, %v8478_v21  ;;  %3785 = vpow2.f32 %v1669_v45  ;;  %v1673_v39 = vmul.f32 1.442695, %v1649_v59 }
 0x393   : > { %1897 = vadd.xlane.f32.xlu0 %v1896_v25  ;;  %v1675_v44 = vmul.f32 1.442695, %v1650_v20 }
 0x394   : > { %1900 = vadd.xlane.f32.xlu1 %v1899_v3  ;;  %v8484_v3 = vld [vmem:[#allocation66_spill] sm:$0xff]  ;;  %v3774_v25 = vpop.eup %3773 }
 0x395   : > { %v1651_v57 = vsub.f32 %v8485_v0, %v8484_v3  ;;  %3787 = vpow2.f32 %v1675_v44  ;;  %v3776_v6 = vpop.eup %3775  ;;  %v1705_v18 = vmul.f32 %v3774_v25, %v1689_v55  ;;  %v1699_v55 = vld [vmem:[#allocation3 + $0x50] sm:$0xff] }
 0x396   : > { %3789 = vpow2.f32 %v1673_v39 }
 0x397   : > { %1903 = vadd.xlane.f32.xlu0 %v1902_v11  ;;  %v1677_v23 = vmul.f32 1.442695, %v1651_v57  ;;  %v1653_v11 = vsub.f32 %v8489_v52, %v8488_v46  ;;  %3791 = vpow2.f32 %v1679_v48 }
 0x398   : > { %1906 = vadd.xlane.f32.xlu1 %v1905_v31  ;;  %v8487_v31 = vld [vmem:[#allocation77_spill] sm:$0xff] }
 0x399   : > { %v1654_v54 = vsub.f32 %v8487_v31, %v8486_v34  ;;  %3793 = vpow2.f32 %v1677_v23  ;;  %v1681_v40 = vmul.f32 1.442695, %v1653_v11 }
 0x39a   : > { %v3778_v63 = vpop.eup %3777 }
 0x39b   : > { %1909 = vadd.xlane.f32.xlu0 %v1908_v58  ;;  %v1690_v58 = vld [vmem:[#allocation3 + $0x8] sm:$0xff]  ;;  %v1683_v35 = vmul.f32 1.442695, %v1654_v54  ;;  %v3780_v60 = vpop.eup %3779 }
 0x39c   : > { %1912 = vadd.xlane.f32.xlu1 %v1911_v7  ;;  %v1692_v7 = vld [vmem:[#allocation3 + $0x18] sm:$0xff]  ;;  %v1706_v22 = vmul.f32 %v3778_v63, %v1690_v58  ;;  %v3782_v4 = vpop.eup %3781  ;;  %v1710_v10 = vmul.f32 %v3780_v60, %v1694_v8  ;;  %v1947_v8 = vld [vmem:[#allocation5 + $0x8] sm:$0xff] }
 0x39d   : > { %v1708_v19 = vmul.f32 %v3776_v6, %v1692_v7  ;;  %3795 = vpow2.f32 %v1683_v35  ;;  %v3784_v42 = vpop.eup %3783  ;;  %v1709_v12 = vmul.f32 %v3782_v4, %v1693_v30  ;;  %v1702_v6 = vld [vmem:[#allocation3 + $0x68] sm:$0xff]  ;;  %v1946_v30 = vld [vmem:[#allocation5] sm:$0xff] }
 0x39e   : > { %3797 = vpow2.f32 %v1681_v40  ;;  %v3786_v47 = vpop.eup %3785  ;;  %v1712_v2 = vmul.f32 %v3784_v42, %v1696_v1  ;;  %v1949_v42 = vld [vmem:[#allocation5 + $0x18] sm:$0xff]  ;;  %v1951_v1 = vld [vmem:[#allocation5 + $0x28] sm:$0xff] }
 0x39f   : > { %3799 = vpow2.f32 %v1687_v51  ;;  %v1711_v9 = vmul.f32 %v3786_v47, %v1695_v16  ;;  %v1950_v16 = vld [vmem:[#allocation5 + $0x20] sm:$0xff] }
 0x3a0   : > { %3801 = vpow2.f32 %v1685_v26 }
 0x3a2   : > { %v3788_v53 = vpop.eup %3787 }
 0x3a3   : > { %v3790_v59 = vpop.eup %3789  ;;  %v1714_v39 = vmul.f32 %v3788_v53, %v1698_v29 }
 0x3a4   : > { %v3792_v33 = vpop.eup %3791  ;;  %v1713_v25 = vmul.f32 %v3790_v59, %v1697_v15 }
 0x3a5   : > { %v1716_v52 = vmul.f32 %v3792_v33, %v1700_v41 }
 0x3a6   : > { %v3794_v0 = vpop.eup %3793 }
 0x3a7   : > { %v1715_v11 = vmul.f32 %v3794_v0, %v1699_v55 }
 0x3aa   : > { %v3796_v48 = vpop.eup %3795 }
 0x3ab   : > { %v3798_v54 = vpop.eup %3797  ;;  %v1718_v61 = vmul.f32 %v3796_v48, %v1702_v6  ;;  %v1957_v48 = vld [vmem:[#allocation5 + $0x58] sm:$0xff]  ;;  %v1959_v6 = vld [vmem:[#allocation5 + $0x68] sm:$0xff] }
 0x3c1   : > { %v1729_v38 = vpop.xlane.xlu1 %1728 }
 0x3c2   : > { %v1723_v24 = vpop.xlane.xlu0 %1722  ;;  %v1771_v36 = vadd.f32 %v1729_v38, %v1707_v32  ;;  %v1701_v32 = vld [vmem:[#allocation3 + $0x60] sm:$0xff]  ;;  %v1704_v38 = vld [vmem:[#allocation3 + $0x78] sm:$0xff] }
 0x3c3   : > { %v1769_v62 = vadd.f32 %v1723_v24, %v1705_v18  ;;  %v3800_v18 = vpop.eup %3799  ;;  %v1717_v37 = vmul.f32 %v3798_v54, %v1701_v32  ;;  %v1703_v24 = vld [vmem:[#allocation3 + $0x70] sm:$0xff]  ;;  %v1958_v32 = vld [vmem:[#allocation5 + $0x60] sm:$0xff] }
 0x3c4   : > { %1788 = vst.msk [vmem:[#allocation3 + $0x10] sm:$0xff] %vm8494_vm9, %v1771_v36  ;;  %v3802_v58 = vpop.eup %3801  ;;  %v1720_v60 = vmul.f32 %v3800_v18, %v1704_v38  ;;  %vm8509_vm9 = vmmov %vm8415_vm0 }
 0x3c5   : > { %1786 = vst.msk [vmem:[#allocation3] sm:$0xff] %vm8495_vm13, %v1769_v62  ;;  %v1719_v36 = vmul.f32 %v3802_v58, %v1703_v24  ;;  %vm8510_vm13 = vmmov %vm8415_vm0 }
 0x3cb   : > { %v2063_v33 = vld [vmem:[#allocation3 + $0x10] sm:$0xff] }
 0x3cc   : > { %v1726_v56 = vpop.xlane.xlu0 %1725  ;;  %v2061_v0 = vld [vmem:[#allocation3] sm:$0xff]  ;;  %3803 = vlog2.f32 %v2063_v33 }
 0x3cd   : > { %v1732_v27 = vpop.xlane.xlu1 %1731  ;;  %v1770_v28 = vadd.f32 %v1726_v56, %v1706_v22  ;;  %3805 = vlog2.f32 %v2061_v0  ;;  %v2045_v33 = vld [vmem:[#allocation2] sm:$0xff] }
 0x3ce   : > { %v1772_v5 = vadd.f32 %v1732_v27, %v1708_v19 }
 0x3cf   : > { %1787 = vst.msk [vmem:[#allocation3 + $0x8] sm:$0xff] %vm8497_vm4, %v1770_v28  ;;  %vm8512_vm4 = vmmov %vm8415_vm0 }
 0x3d0   : > { %1789 = vst.msk [vmem:[#allocation3 + $0x18] sm:$0xff] %vm8496_vm6, %v1772_v5  ;;  %v1735_v21 = vpop.xlane.xlu0 %1734  ;;  %v1948_v5 = vld [vmem:[#allocation5 + $0x10] sm:$0xff]  ;;  %vm8511_vm6 = vmmov %vm8415_vm0 }
 0x3d1   : > { %v1738_v14 = vpop.xlane.xlu1 %1737  ;;  %v1773_v45 = vadd.f32 %v1735_v21, %v1709_v12 }
 0x3d2   : > { %v1774_v20 = vadd.f32 %v1738_v14, %v1710_v10 }
 0x3d3   : > { %1790 = vst.msk [vmem:[#allocation3 + $0x20] sm:$0xff] %vm8499_vm2, %v1773_v45  ;;  %v1953_v45 = vld [vmem:[#allocation5 + $0x38] sm:$0xff]  ;;  %vm8514_vm2 = vmmov %vm8415_vm0 }
 0x3d4   : > { %1791 = vst.msk [vmem:[#allocation3 + $0x28] sm:$0xff] %vm8498_vm3, %v1774_v20  ;;  %v1741_v3 = vpop.xlane.xlu0 %1740  ;;  %vm8513_vm3 = vmmov %vm8415_vm0 }
 0x3d5   : > { %v1744_v44 = vpop.xlane.xlu1 %1743  ;;  %v1775_v49 = vadd.f32 %v1741_v3, %v1711_v9  ;;  %v1954_v3 = vld [vmem:[#allocation5 + $0x40] sm:$0xff] }
 0x3d6   : > { %v1776_v57 = vadd.f32 %v1744_v44, %v1712_v2  ;;  %v1952_v2 = vld [vmem:[#allocation5 + $0x30] sm:$0xff]  ;;  %v1955_v44 = vld [vmem:[#allocation5 + $0x48] sm:$0xff] }
 0x3d7   : > { %1792 = vst.msk [vmem:[#allocation3 + $0x30] sm:$0xff] %vm8501_vm8, %v1775_v49  ;;  %vm8516_vm8 = vmmov %vm8415_vm0 }
 0x3d8   : > { %1793 = vst.msk [vmem:[#allocation3 + $0x38] sm:$0xff] %vm8500_vm7, %v1776_v57  ;;  %v1747_v31 = vpop.xlane.xlu0 %1746  ;;  %vm8515_vm7 = vmmov %vm8415_vm0  ;;  %v2062_v57 = vld [vmem:[#allocation3 + $0x8] sm:$0xff] }
 0x3d9   : > { %v1750_v34 = vpop.xlane.xlu1 %1749  ;;  %v1777_v46 = vadd.f32 %v1747_v31, %v1713_v25  ;;  %v2064_v25 = vld [vmem:[#allocation3 + $0x18] sm:$0xff]  ;;  %3807 = vlog2.f32 %v2062_v57 }
 0x3da   : > { %v1778_v23 = vadd.f32 %v1750_v34, %v1714_v39  ;;  %v1956_v34 = vld [vmem:[#allocation5 + $0x50] sm:$0xff]  ;;  %3809 = vlog2.f32 %v2064_v25 }
 0x3db   : > { %1794 = vst.msk [vmem:[#allocation3 + $0x40] sm:$0xff] %vm8503_vm10, %v1777_v46  ;;  %v2066_v31 = vld [vmem:[#allocation3 + $0x28] sm:$0xff]  ;;  %vm8518_vm10 = vmmov %vm8415_vm0 }
 0x3dc   : > { %1795 = vst.msk [vmem:[#allocation3 + $0x48] sm:$0xff] %vm8502_vm1, %v1778_v23  ;;  %v1753_v7 = vpop.xlane.xlu0 %1752  ;;  %vm8517_vm1 = vmmov %vm8415_vm0  ;;  %3811 = vlog2.f32 %v2066_v31 }
 0x3dd   : > { %v1756_v63 = vpop.xlane.xlu1 %1755  ;;  %v1779_v17 = vadd.f32 %v1753_v7, %v1715_v11  ;;  %v2065_v11 = vld [vmem:[#allocation3 + $0x20] sm:$0xff] }
 0x3de   : > { %v1780_v35 = vadd.f32 %v1756_v63, %v1716_v52  ;;  %v2067_v7 = vld [vmem:[#allocation3 + $0x30] sm:$0xff]  ;;  %3813 = vlog2.f32 %v2065_v11  ;;  %v1823_v11 = vld [vmem:[#allocation4 + $0x28] sm:$0xff] }
 0x3df   : > { %1796 = vst.msk [vmem:[#allocation3 + $0x50] sm:$0xff] %vm8505_vm11, %v1779_v17  ;;  %v2068_v18 = vld [vmem:[#allocation3 + $0x38] sm:$0xff]  ;;  %vm8520_vm11 = vmmov %vm8415_vm0 }
 0x3e0   : > { %1797 = vst.msk [vmem:[#allocation3 + $0x58] sm:$0xff] %vm8504_vm5, %v1780_v35  ;;  %v1759_v50 = vpop.xlane.xlu0 %1758  ;;  %vm8519_vm5 = vmmov %vm8415_vm0  ;;  %3815 = vlog2.f32 %v2068_v18 }
 0x3e1   : > { %v1762_v40 = vpop.xlane.xlu1 %1761  ;;  %v1781_v13 = vadd.f32 %v1759_v50, %v1717_v37  ;;  %v1961_v50 = vld [vmem:[#allocation5 + $0x78] sm:$0xff]  ;;  %3817 = vlog2.f32 %v2067_v7 }
 0x3e2   : > { %v1782_v43 = vadd.f32 %v1762_v40, %v1718_v61  ;;  %v2069_v24 = vld [vmem:[#allocation3 + $0x40] sm:$0xff] }
 0x3e3   : > { %1798 = vst.msk [vmem:[#allocation3 + $0x60] sm:$0xff] %vm8506_vm14, %v1781_v13  ;;  %v2070_v61 = vld [vmem:[#allocation3 + $0x48] sm:$0xff]  ;;  %vm8521_vm14 = vmmov %vm8415_vm0 }
 0x3e4   : > { %1799 = vst.msk [vmem:[#allocation3 + $0x68] sm:$0xff] %vm8415_vm0, %v1782_v43  ;;  %v1765_v19 = vpop.xlane.xlu0 %1764  ;;  %v1960_v43 = vld [vmem:[#allocation5 + $0x70] sm:$0xff]  ;;  %3819 = vlog2.f32 %v2070_v61 }
 0x3e5   : > { %v1768_v62 = vpop.xlane.xlu1 %1767  ;;  %v1783_v4 = vadd.f32 %v1765_v19, %v1719_v36  ;;  %3821 = vlog2.f32 %v2069_v24 }
 0x3e6   : > { %v1784_v22 = vadd.f32 %v1768_v62, %v1720_v60 }
 0x3e7   : > { %1800 = vst.msk [vmem:[#allocation3 + $0x70] sm:$0xff] %vm8508_vm12, %v1783_v4  ;;  %vm8523_vm12 = vmmov %vm8415_vm0 }
 0x3e8   : > { %1801 = vst.msk [vmem:[#allocation3 + $0x78] sm:$0xff] %vm8507_vm15, %v1784_v22  ;;  %v1964_v27 = vpop.xlane.xlu0 %1963  ;;  %v2072_v22 = vld [vmem:[#allocation3 + $0x58] sm:$0xff]  ;;  %vm8522_vm15 = vmmov %vm8415_vm0 }
 0x3e9   : > { %v1967_v51 = vpop.xlane.xlu1 %1966  ;;  %v2010_v26 = vadd.f32 %v1964_v27, %v1946_v30  ;;  %v3804_v30 = vpop.eup %3803 }
 0x3ea   : > { %v2011_v56 = vadd.f32 %v1967_v51, %v1947_v8  ;;  %v2071_v51 = vld [vmem:[#allocation3 + $0x50] sm:$0xff]  ;;  %v2082_v0 = vmul.f32 0.6931472, %v3804_v30  ;;  %v1825_v30 = vld [vmem:[#allocation4 + $0x38] sm:$0xff] }
 0x3eb   : > { %2026 = vst.msk [vmem:[#allocation5] sm:$0xff] %vm8510_vm13, %v2010_v26  ;;  %v1818_v26 = vld [vmem:[#allocation4] sm:$0xff]  ;;  %vm8525_vm13 = vmmov %vm8415_vm0 }
 0x3ec   : > { %2027 = vst.msk [vmem:[#allocation5 + $0x8] sm:$0xff] %vm8509_vm9, %v2011_v56  ;;  %v1970_v10 = vpop.xlane.xlu0 %1969  ;;  %v1819_v56 = vld [vmem:[#allocation4 + $0x8] sm:$0xff]  ;;  %vm8524_vm9 = vmmov %vm8415_vm0 }
 0x3ed   : > { %v1973_v28 = vpop.xlane.xlu1 %1972  ;;  %v2012_v47 = vadd.f32 %v1970_v10, %v1948_v5 }
 0x3ee   : > { %v2013_v12 = vadd.f32 %v1973_v28, %v1949_v42  ;;  %v3806_v42 = vpop.eup %3805 }
 0x3ef   : > { %2028 = vst.msk [vmem:[#allocation5 + $0x10] sm:$0xff] %vm8512_vm4, %v2012_v47  ;;  %v3808_v10 = vpop.eup %3807  ;;  %vm8527_vm4 = vmmov %vm8415_vm0 }
 0x3f0   : > { %2029 = vst.msk [vmem:[#allocation5 + $0x18] sm:$0xff] %vm8511_vm6, %v2013_v12  ;;  %v1976_v21 = vpop.xlane.xlu0 %1975  ;;  %vm8526_vm6 = vmmov %vm8415_vm0 }
 0x3f1   : > { %v1979_v14 = vpop.xlane.xlu1 %1978  ;;  %v2014_v20 = vadd.f32 %v1976_v21, %v1950_v16  ;;  %v3810_v16 = vpop.eup %3809 }
 0x3f2   : > { %v2015_v53 = vadd.f32 %v1979_v14, %v1951_v1  ;;  %v7669_v58 = vld [vmem:[#allocation5] sm:$0xff]  ;;  %v2074_v14 = vld [vmem:[#allocation3 + $0x68] sm:$0xff]  ;;  %v2084_v57 = vmul.f32 0.6931472, %v3810_v16 }
 0x3f3   : > { %2030 = vst.msk [vmem:[#allocation5 + $0x20] sm:$0xff] %vm8514_vm2, %v2014_v20  ;;  %v7665_v63 = vld [vmem:[#allocation5 + $0x8] sm:$0xff]  ;;  %v2189_v13 = vadd.f32 1e-08, %v7669_v58  ;;  %v1821_v20 = vld [vmem:[#allocation4 + $0x18] sm:$0xff]  ;;  %vm8529_vm2 = vmmov %vm8415_vm0 }
 0x3f4   : > { %2031 = vst.msk [vmem:[#allocation5 + $0x28] sm:$0xff] %vm8513_vm3, %v2015_v53  ;;  %v1982_v59 = vpop.xlane.xlu0 %1981  ;;  %v2190_v40 = vadd.f32 1e-08, %v7665_v63  ;;  %vm8528_vm3 = vmmov %vm8415_vm0 }
 0x3f5   : > { %v1985_v9 = vpop.xlane.xlu1 %1984  ;;  %v2016_v15 = vadd.f32 %v1982_v59, %v1952_v2  ;;  %v2073_v2 = vld [vmem:[#allocation3 + $0x60] sm:$0xff]  ;;  %v1820_v59 = vld [vmem:[#allocation4 + $0x10] sm:$0xff] }
 0x3f6   : > { %v2017_v29 = vadd.f32 %v1985_v9, %v1953_v45  ;;  %v7677_v36 = vld [vmem:[#allocation5 + $0x10] sm:$0xff]  ;;  %3823 = vrcp.f32 %v2190_v40  ;;  %v2078_v45 = vmul.f32 0.6931472, %v3806_v42 }
 0x3f7   : > { %2032 = vst.msk [vmem:[#allocation5 + $0x30] sm:$0xff] %vm8516_vm8, %v2016_v15  ;;  %v7673_v60 = vld [vmem:[#allocation5 + $0x18] sm:$0xff]  ;;  %3825 = vrcp.f32 %v2189_v13  ;;  %v2191_v5 = vadd.f32 1e-08, %v7677_v36  ;;  %v2080_v15 = vmul.f32 0.6931472, %v3808_v10  ;;  %vm8531_vm8 = vmmov %vm8415_vm0 }
 0x3f8   : > { %2033 = vst.msk [vmem:[#allocation5 + $0x38] sm:$0xff] %vm8515_vm7, %v2017_v29  ;;  %v1988_v39 = vpop.xlane.xlu0 %1987  ;;  %v2192_v27 = vadd.f32 1e-08, %v7673_v60  ;;  %3827 = vlog2.f32 %v2072_v22  ;;  %v3812_v29 = vpop.eup %3811  ;;  %v2109_v7 = vadd.f32 %v2078_v45, %v2045_v33  ;;  %vm8530_vm7 = vmmov %vm8415_vm0 }
 0x3f9   : > { %v1991_v49 = vpop.xlane.xlu1 %1990  ;;  %v2018_v55 = vadd.f32 %v1988_v39, %v1954_v3  ;;  %3829 = vlog2.f32 %v2071_v51  ;;  %v1824_v51 = vld [vmem:[#allocation4 + $0x30] sm:$0xff] }
 0x3fa   : > { %v2019_v41 = vadd.f32 %v1991_v49, %v1955_v44  ;;  %v7685_v12 = vld [vmem:[#allocation5 + $0x20] sm:$0xff]  ;;  %3831 = vrcp.f32 %v2192_v27  ;;  %v2046_v49 = vld [vmem:[#allocation2 + $0x8] sm:$0xff]  ;;  %v2157_v22 = vmul.f32 %v7669_v58, %v2109_v7 }
 0x3fb   : > { %2034 = vst.msk [vmem:[#allocation5 + $0x40] sm:$0xff] %vm8518_vm10, %v2018_v55  ;;  %v7681_v28 = vld [vmem:[#allocation5 + $0x28] sm:$0xff]  ;;  %3833 = vrcp.f32 %v2191_v5  ;;  %v2193_v44 = vadd.f32 1e-08, %v7685_v12  ;;  %v2076_v55 = vld [vmem:[#allocation3 + $0x78] sm:$0xff]  ;;  %v2110_v18 = vadd.f32 %v2080_v15, %v2046_v49  ;;  %vm8533_vm10 = vmmov %vm8415_vm0 }
 0x3fc   : > { %2035 = vst.msk [vmem:[#allocation5 + $0x48] sm:$0xff] %vm8517_vm1, %v2019_v41  ;;  %v1994_v23 = vpop.xlane.xlu0 %1993  ;;  %v2194_v9 = vadd.f32 1e-08, %v7681_v28  ;;  %3835 = vlog2.f32 %v2074_v14  ;;  %v2052_v15 = vld [vmem:[#allocation2 + $0x38] sm:$0xff]  ;;  %v1827_v49 = vld [vmem:[#allocation4 + $0x48] sm:$0xff]  ;;  %vm8532_vm1 = vmmov %vm8415_vm0 }
 0x3fd   : > { %v1997_v54 = vpop.xlane.xlu1 %1996  ;;  %v2020_v52 = vadd.f32 %v1994_v23, %v1956_v34  ;;  %3837 = vlog2.f32 %v2073_v2  ;;  %v2047_v34 = vld [vmem:[#allocation2 + $0x10] sm:$0xff]  ;;  %v3814_v23 = vpop.eup %3813 }
 0x3fe   : > { %v2021_v46 = vadd.f32 %v1997_v54, %v1957_v48  ;;  %v7693_v39 = vld [vmem:[#allocation5 + $0x30] sm:$0xff]  ;;  %v2048_v48 = vld [vmem:[#allocation2 + $0x18] sm:$0xff]  ;;  %3839 = vrcp.f32 %v2194_v9  ;;  %v2111_v24 = vadd.f32 %v2082_v0, %v2047_v34 }
 0x3ff   : > { %2036 = vst.msk [vmem:[#allocation5 + $0x50] sm:$0xff] %vm8520_vm11, %v2020_v52  ;;  %v7689_v3 = vld [vmem:[#allocation5 + $0x38] sm:$0xff]  ;;  %3841 = vrcp.f32 %v2193_v44  ;;  %vm8535_vm11 = vmmov %vm8415_vm0 }
 0x400   : > { %2037 = vst.msk [vmem:[#allocation5 + $0x58] sm:$0xff] %vm8519_vm5, %v2021_v46  ;;  %v2000_v17 = vpop.xlane.xlu0 %1999  ;;  %v2088_v46 = vmul.f32 0.6931472, %v3812_v29  ;;  %v2196_v52 = vadd.f32 1e-08, %v7689_v3  ;;  %3843 = vlog2.f32 %v2076_v55  ;;  %v2159_v45 = vmul.f32 %v7677_v36, %v2111_v24  ;;  %vm8534_vm5 = vmmov %vm8415_vm0 }
 0x401   : > { %v2003_v35 = vpop.xlane.xlu1 %2002  ;;  %v2022_v38 = vadd.f32 %v2000_v17, %v1958_v32  ;;  %v3816_v32 = vpop.eup %3815  ;;  %v2195_v17 = vadd.f32 1e-08, %v7693_v39 }
 0x402   : > { %v2023_v37 = vadd.f32 %v2003_v35, %v1959_v6  ;;  %v1822_v6 = vld [vmem:[#allocation4 + $0x20] sm:$0xff]  ;;  %v2050_v35 = vld [vmem:[#allocation2 + $0x28] sm:$0xff]  ;;  %3845 = vrcp.f32 %v2196_v52 }
 0x403   : > { %2038 = vst.msk [vmem:[#allocation5 + $0x60] sm:$0xff] %vm8521_vm14, %v2022_v38  ;;  %v7697_v61 = vld [vmem:[#allocation5 + $0x48] sm:$0xff]  ;;  %v2112_v38 = vadd.f32 %v2084_v57, %v2048_v48  ;;  %v7701_v40 = vld [vmem:[#allocation5 + $0x40] sm:$0xff]  ;;  %3847 = vrcp.f32 %v2195_v17  ;;  %vm8536_vm14 = vmmov %vm8415_vm0 }
 0x404   : > { %2039 = vst.msk [vmem:[#allocation5 + $0x68] sm:$0xff] %vm8415_vm0, %v2023_v37  ;;  %v2006_v19 = vpop.xlane.xlu0 %2005  ;;  %v3818_v37 = vpop.eup %3817  ;;  %v2198_v42 = vadd.f32 1e-08, %v7697_v61 }
 0x405   : > { %v2009_v62 = vpop.xlane.xlu1 %2008  ;;  %v2024_v8 = vadd.f32 %v2006_v19, %v1960_v43  ;;  %v3820_v13 = vpop.eup %3819  ;;  %v2158_v19 = vmul.f32 %v7665_v63, %v2110_v18  ;;  %v2197_v63 = vadd.f32 1e-08, %v7701_v40  ;;  %v2090_v55 = vmul.f32 0.6931472, %v3818_v37 }
 0x406   : > { %v2025_v4 = vadd.f32 %v2009_v62, %v1961_v50  ;;  %v2075_v62 = vld [vmem:[#allocation3 + $0x70] sm:$0xff]  ;;  %v7705_v27 = vpop.eup %3821 }
 0x407   : > { %2040 = vst.msk [vmem:[#allocation5 + $0x70] sm:$0xff] %vm8523_vm12, %v2024_v8  ;;  %v7709_v16 = vld [vmem:[#allocation5 + $0x58] sm:$0xff]  ;;  %3849 = vlog2.f32 %v2075_v62  ;;  %v7715_v2 = vld [vmem:[#allocation5 + $0x50] sm:$0xff]  ;;  %vm8538_vm12 = vmmov %vm8415_vm0 }
 0x408   : > { %2041 = vst.msk [vmem:[#allocation5 + $0x78] sm:$0xff] %vm8522_vm15, %v2025_v4  ;;  %v1868_v1 = vpop.xlane.xlu0 %1867  ;;  %3851 = vrcp.f32 %v2198_v42  ;;  %v2200_v36 = vadd.f32 1e-08, %v7709_v16  ;;  %v2053_v42 = vld [vmem:[#allocation2 + $0x40] sm:$0xff]  ;;  %vm8537_vm15 = vmmov %vm8415_vm0 }
 0x409   : > { %v1871_v47 = vpop.xlane.xlu1 %1870  ;;  %v1914_v53 = vadd.f32 %v1868_v1, %v1818_v26  ;;  %v2114_v26 = vadd.f32 %v2088_v46, %v2050_v35  ;;  %v2049_v1 = vld [vmem:[#allocation2 + $0x20] sm:$0xff]  ;;  %3853 = vrcp.f32 %v2197_v63 }
 0x40a   : > { %v1915_v21 = vadd.f32 %v1871_v47, %v1819_v56  ;;  %v2086_v56 = vmul.f32 0.6931472, %v3814_v23  ;;  %v3824_v47 = vpop.eup %3823  ;;  %v2199_v23 = vadd.f32 1e-08, %v7715_v2  ;;  %v7731_v17 = vld [vmem:[#allocation5 + $0x60] sm:$0xff]  ;;  %3855 = vrcp.f32 %v2200_v36  ;;  %v2055_v36 = vld [vmem:[#allocation2 + $0x50] sm:$0xff] }
 0x40b   : > { %1930 = vst.msk [vmem:[#allocation4] sm:$0xff] %vm8525_vm13, %v1914_v53  ;;  %v2092_v53 = vmul.f32 0.6931472, %v3816_v32  ;;  %v7721_v46 = vld [vmem:[#allocation5 + $0x68] sm:$0xff]  ;;  %v2096_v32 = vmul.f32 0.6931472, %v3820_v13  ;;  %v2162_v18 = vmul.f32 %v7681_v28, %v2114_v26  ;;  %vm8540_vm13 = vmmov %vm8415_vm0 }
 0x40c   : > { %1931 = vst.msk [vmem:[#allocation4 + $0x8] sm:$0xff] %vm8524_vm9, %v1915_v21  ;;  %v1874_v41 = vpop.xlane.xlu0 %1873  ;;  %v3826_v21 = vpop.eup %3825  ;;  %v1828_v13 = vld [vmem:[#allocation4 + $0x50] sm:$0xff]  ;;  %v2094_v28 = vmul.f32 0.6931472, %v7705_v27  ;;  %3857 = vrcp.f32 %v2199_v23  ;;  %vm8539_vm9 = vmmov %vm8415_vm0 }
 0x40d   : > { %v1877_v25 = vpop.xlane.xlu1 %1876  ;;  %v1916_v54 = vadd.f32 %v1874_v41, %v1820_v59  ;;  %v3828_v29 = vpop.eup %3827  ;;  %v2116_v35 = vadd.f32 %v2092_v53, %v2052_v15 }
 0x40e   : > { %v1917_v31 = vadd.f32 %v1877_v25, %v1821_v20  ;;  %v2160_v20 = vmul.f32 %v7673_v60, %v2112_v38  ;;  %v1826_v25 = vld [vmem:[#allocation4 + $0x40] sm:$0xff]  ;;  %v7717_v41 = vpop.eup %3829  ;;  %v2113_v60 = vadd.f32 %v2086_v56, %v2049_v1  ;;  %v2100_v63 = vmul.f32 0.6931472, %v3828_v29  ;;  %v7750_v53 = vld [vmem:[#allocation5 + $0x70] sm:$0xff] }
 0x40f   : > { %1932 = vst.msk [vmem:[#allocation4 + $0x10] sm:$0xff] %vm8527_vm4, %v1916_v54  ;;  %v2051_v54 = vld [vmem:[#allocation2 + $0x30] sm:$0xff]  ;;  %v1830_v29 = vld [vmem:[#allocation4 + $0x60] sm:$0xff]  ;;  %vm8542_vm4 = vmmov %vm8415_vm0 }
 0x410   : > { %1933 = vst.msk [vmem:[#allocation4 + $0x18] sm:$0xff] %vm8526_vm6, %v1917_v31  ;;  %v1880_v43 = vpop.xlane.xlu0 %1879  ;;  %v3832_v31 = vpop.eup %3831  ;;  %v2161_v7 = vmul.f32 %v7685_v12, %v2113_v60  ;;  %v2115_v12 = vadd.f32 %v2090_v55, %v2051_v54  ;;  %vm8541_vm6 = vmmov %vm8415_vm0 }
 0x411   : > { %v1883_v50 = vpop.xlane.xlu1 %1882  ;;  %v1918_v8 = vadd.f32 %v1880_v43, %v1822_v6  ;;  %v3834_v6 = vpop.eup %3833 }
 0x412   : > { %v1919_v4 = vadd.f32 %v1883_v50, %v1823_v11  ;;  %v2125_v10 = vld [vmem:[#allocation4] sm:$0xff]  ;;  %v7733_v24 = vpop.eup %3835  ;;  %v2054_v50 = vld [vmem:[#allocation2 + $0x48] sm:$0xff] }
 0x413   : > { %v2126_v5 = vld [vmem:[#allocation4 + $0x8] sm:$0xff]  ;;  %v2173_v14 = vsub.f32 %v2125_v10, %v2157_v22  ;;  %1934 = vst.msk [vmem:[#allocation4 + $0x20] sm:$0xff] %vm8529_vm2, %v1918_v8  ;;  %v7735_v8 = vpop.eup %3837  ;;  %v7740_v10 = vld [vmem:[#allocation5 + $0x78] sm:$0xff]  ;;  %vm8544_vm2 = vmmov %vm8415_vm0 }
 0x414   : > { %v2174_v58 = vsub.f32 %v2126_v5, %v2158_v19  ;;  %1935 = vst.msk [vmem:[#allocation4 + $0x28] sm:$0xff] %vm8528_vm3, %v1919_v4  ;;  %v1886_v59 = vpop.xlane.xlu0 %1885  ;;  %v1829_v4 = vld [vmem:[#allocation4 + $0x58] sm:$0xff]  ;;  %v3840_v26 = vpop.eup %3839  ;;  %v2201_v5 = vadd.f32 1e-08, %v7731_v17  ;;  %vm8543_vm3 = vmmov %vm8415_vm0 }
 0x415   : > { %v1889_v9 = vpop.xlane.xlu1 %1888  ;;  %v2221_v44 = vmul.f32 %v3826_v21, %v2173_v14  ;;  %v1920_v57 = vadd.f32 %v1886_v59, %v1824_v51  ;;  %v3842_v27 = vpop.eup %3841  ;;  %v2163_v14 = vmul.f32 %v7693_v39, %v2115_v12  ;;  %v2118_v21 = vadd.f32 %v2096_v32, %v2054_v50  ;;  %v2056_v59 = vld [vmem:[#allocation2 + $0x58] sm:$0xff]  ;;  %v1832_v50 = vld [vmem:[#allocation4 + $0x70] sm:$0xff] }
 0x416   : > { %v2222_v33 = vmul.f32 %v3824_v47, %v2174_v58  ;;  %v1921_v0 = vadd.f32 %v1889_v9, %v1825_v30  ;;  %v2127_v34 = vld [vmem:[#allocation4 + $0x10] sm:$0xff]  ;;  %v2202_v30 = vadd.f32 1e-08, %v7721_v46  ;;  %v2164_v58 = vmul.f32 %v7689_v3, %v2116_v35  ;;  %v7752_v9 = vpop.eup %3843 }
 0x417   : > { %v2128_v48 = vld [vmem:[#allocation4 + $0x18] sm:$0xff]  ;;  %2237 = vst.msk [vmem:[%s4994_s7] sm:$0xff] %vm8531_vm8, %v2221_v44  ;;  %v2175_v11 = vsub.f32 %v2127_v34, %v2159_v45  ;;  %v2098_v3 = vmul.f32 0.6931472, %v7717_v41  ;;  %v2204_v39 = vadd.f32 1e-08, %v7740_v10  ;;  %v3846_v60 = vpop.eup %3845  ;;  %v2166_v54 = vmul.f32 %v7697_v61, %v2118_v21  ;;  %vm8546_vm8 = vmmov %vm8415_vm0 }
 0x418   : > { %2238 = vst.msk [vmem:[%s4994_s7 + $0x8] sm:$0xff] %vm8530_vm7, %v2222_v33  ;;  %v2176_v52 = vsub.f32 %v2128_v48, %v2160_v20  ;;  %v1892_v38 = vpop.xlane.xlu0 %1891  ;;  %3859 = vrcp.f32 %v2202_v30  ;;  %v2203_v48 = vadd.f32 1e-08, %v7750_v53  ;;  %v3848_v41 = vpop.eup %3847  ;;  %v2108_v21 = vmul.f32 0.6931472, %v7752_v9  ;;  %vm8545_vm7 = vmmov %vm8415_vm0 }
 0x419   : > { %1937 = vst.msk [vmem:[#allocation4 + $0x38] sm:$0xff] %vm8532_vm1, %v1921_v0  ;;  %v1895_v37 = vpop.xlane.xlu1 %1894  ;;  %v2223_v62 = vmul.f32 %v3834_v6, %v2175_v11  ;;  %v1922_v22 = vadd.f32 %v1892_v38, %v1826_v25  ;;  %3861 = vrcp.f32 %v2201_v5  ;;  %v3850_v32 = vpop.eup %3849  ;;  %v1833_v38 = vld [vmem:[#allocation4 + $0x78] sm:$0xff]  ;;  %vm8547_vm1 = vmmov %vm8415_vm0 }
 0x41a   : > { %1936 = vst.msk [vmem:[#allocation4 + $0x30] sm:$0xff] %vm8533_vm10, %v1920_v57  ;;  %v2224_v43 = vmul.f32 %v3832_v31, %v2176_v52  ;;  %v1923_v19 = vadd.f32 %v1895_v37, %v1827_v49  ;;  %v2129_v56 = vld [vmem:[#allocation4 + $0x20] sm:$0xff]  ;;  %v1831_v57 = vld [vmem:[#allocation4 + $0x68] sm:$0xff]  ;;  %v2117_v49 = vadd.f32 %v2094_v28, %v2053_v42  ;;  %v2120_v52 = vadd.f32 %v2100_v63, %v2056_v59  ;;  %vm8548_vm10 = vmmov %vm8415_vm0 }
 0x41b   : > { %v2130_v51 = vld [vmem:[#allocation4 + $0x28] sm:$0xff]  ;;  %2239 = vst.msk [vmem:[%s4994_s7 + $0x10] sm:$0xff] %vm8535_vm11, %v2223_v62  ;;  %v2177_v1 = vsub.f32 %v2129_v56, %v2161_v7  ;;  %v2102_v62 = vmul.f32 0.6931472, %v7735_v8  ;;  %3863 = vrcp.f32 %v2204_v39  ;;  %v2060_v59 = vld [vmem:[#allocation2 + $0x78] sm:$0xff]  ;;  %vm8550_vm11 = vmmov %vm8415_vm0 }
 0x41c   : > { %2240 = vst.msk [vmem:[%s4994_s7 + $0x18] sm:$0xff] %vm8534_vm5, %v2224_v43  ;;  %v2178_v47 = vsub.f32 %v2130_v51, %v2162_v18  ;;  %v1898_v45 = vpop.xlane.xlu0 %1897  ;;  %v2165_v23 = vmul.f32 %v7701_v40, %v2117_v49  ;;  %v2104_v43 = vmul.f32 0.6931472, %v7733_v24  ;;  %3865 = vrcp.f32 %v2203_v48  ;;  %vm8549_vm5 = vmmov %vm8415_vm0 }
 0x41d   : > { %1939 = vst.msk [vmem:[#allocation4 + $0x48] sm:$0xff] %vm8415_vm0, %v1923_v19  ;;  %v1901_v20 = vpop.xlane.xlu1 %1900  ;;  %v2225_v33 = vmul.f32 %v3842_v27, %v2177_v1  ;;  %v1924_v0 = vadd.f32 %v1898_v45, %v1828_v13  ;;  %v2119_v19 = vadd.f32 %v2098_v3, %v2055_v36  ;;  %v2057_v13 = vld [vmem:[#allocation2 + $0x60] sm:$0xff]  ;;  %v2168_v8 = vmul.f32 %v7709_v16, %v2120_v52 }
 0x41e   : > { %1938 = vst.msk [vmem:[#allocation4 + $0x40] sm:$0xff] %vm8536_vm14, %v1922_v22  ;;  %v2226_v15 = vmul.f32 %v3840_v26, %v2178_v47  ;;  %v1925_v44 = vadd.f32 %v1901_v20, %v1829_v4  ;;  %v3852_v22 = vpop.eup %3851  ;;  %v2058_v4 = vld [vmem:[#allocation2 + $0x68] sm:$0xff]  ;;  %v2121_v27 = vadd.f32 %v2102_v62, %v2057_v13  ;;  %v2106_v20 = vmul.f32 0.6931472, %v3850_v32  ;;  %vm8551_vm14 = vmmov %vm8415_vm0 }
 0x41f   : > { %2241 = vst.msk [vmem:[%s4994_s7 + $0x20] sm:$0xff] %vm8538_vm12, %v2225_v33  ;;  %v3854_v24 = vpop.eup %3853  ;;  %v2167_v30 = vmul.f32 %v7715_v2, %v2119_v19  ;;  %v2122_v1 = vadd.f32 %v2104_v43, %v2058_v4  ;;  %v2124_v49 = vadd.f32 %v2108_v21, %v2060_v59  ;;  %vm8553_vm12 = vmmov %vm8415_vm0 }
 0x420   : > { %v2132_v25 = vld [vmem:[#allocation4 + $0x38] sm:$0xff]  ;;  %2242 = vst.msk [vmem:[%s4994_s7 + $0x28] sm:$0xff] %vm8537_vm15, %v2226_v15  ;;  %v1904_v6 = vpop.xlane.xlu0 %1903  ;;  %v2059_v15 = vld [vmem:[#allocation2 + $0x70] sm:$0xff]  ;;  %v2169_v9 = vmul.f32 %v7731_v17, %v2121_v27  ;;  %vm8552_vm15 = vmmov %vm8415_vm0 }
 0x421   : > { %v2131_v55 = vld [vmem:[#allocation4 + $0x30] sm:$0xff]  ;;  %v2180_v34 = vsub.f32 %v2132_v25, %v2164_v58  ;;  %1941 = vst.msk [vmem:[#allocation4 + $0x58] sm:$0xff] %vm8539_vm9, %v1925_v44  ;;  %v1907_v11 = vpop.xlane.xlu1 %1906  ;;  %v1926_v37 = vadd.f32 %v1904_v6, %v1830_v29  ;;  %v2170_v33 = vmul.f32 %v7721_v46, %v2122_v1  ;;  %v2123_v39 = vadd.f32 %v2106_v20, %v2059_v15 }
 0x422   : > { %v2179_v31 = vsub.f32 %v2131_v55, %v2163_v14  ;;  %1940 = vst.msk [vmem:[#allocation4 + $0x50] sm:$0xff] %vm8540_vm13, %v1924_v0  ;;  %v1927_v35 = vadd.f32 %v1907_v11, %v1831_v57  ;;  %v3856_v14 = vpop.eup %3855  ;;  %v2172_v46 = vmul.f32 %v7740_v10, %v2124_v49 }
 0x423   : > { %v2228_v18 = vmul.f32 %v3846_v60, %v2180_v34  ;;  %1942 = vst.msk [vmem:[#allocation4 + $0x60] sm:$0xff] %vm8544_vm2, %v1926_v37  ;;  %v3858_v45 = vpop.eup %3857  ;;  %v2171_v17 = vmul.f32 %v7750_v53, %v2123_v39 }
 0x424   : > { %v2227_v7 = vmul.f32 %v3848_v41, %v2179_v31  ;;  %v2134_v61 = vld [vmem:[#allocation4 + $0x48] sm:$0xff]  ;;  %1943 = vst.msk [vmem:[#allocation4 + $0x68] sm:$0xff] %vm8543_vm3, %v1927_v35  ;;  %v1910_v56 = vpop.xlane.xlu0 %1909 }
 0x425   : > { %v2133_v40 = vld [vmem:[#allocation4 + $0x40] sm:$0xff]  ;;  %2244 = vst.msk [vmem:[%s4994_s7 + $0x38] sm:$0xff] %vm8541_vm6, %v2228_v18  ;;  %v2182_v28 = vsub.f32 %v2134_v61, %v2166_v54  ;;  %v1913_v51 = vpop.xlane.xlu1 %1912  ;;  %v1928_v47 = vadd.f32 %v1910_v56, %v1832_v50  ;;  %v3860_v3 = vpop.eup %3859 }
 0x426   : > { %2243 = vst.msk [vmem:[%s4994_s7 + $0x30] sm:$0xff] %vm8542_vm4, %v2227_v7  ;;  %v2181_v12 = vsub.f32 %v2133_v40, %v2165_v23  ;;  %v1929_v5 = vadd.f32 %v1913_v51, %v1833_v38  ;;  %v3862_v60 = vpop.eup %3861 }
 0x427   : > { %v2230_v26 = vmul.f32 %v3852_v22, %v2182_v28  ;;  %1944 = vst.msk [vmem:[#allocation4 + $0x70] sm:$0xff] %vm8548_vm10, %v1928_v47 }
 0x428   : > { %v2229_v42 = vmul.f32 %v3854_v24, %v2181_v12  ;;  %v2136_v63 = vld [vmem:[#allocation4 + $0x58] sm:$0xff]  ;;  %1945 = vst.msk [vmem:[#allocation4 + $0x78] sm:$0xff] %vm8547_vm1, %v1929_v5  ;;  %v3864_v41 = vpop.eup %3863 }
 0x429   : > { %v2135_v58 = vld [vmem:[#allocation4 + $0x50] sm:$0xff]  ;;  %2246 = vst.msk [vmem:[%s4994_s7 + $0x48] sm:$0xff] %vm8545_vm7, %v2230_v26  ;;  %v2184_v16 = vsub.f32 %v2136_v63, %v2168_v8  ;;  %v3866_v52 = vpop.eup %3865 }
 0x42a   : > { %2245 = vst.msk [vmem:[%s4994_s7 + $0x40] sm:$0xff] %vm8546_vm8, %v2229_v42  ;;  %v2183_v2 = vsub.f32 %v2135_v58, %v2167_v30  ;;  %v2137_v29 = vld [vmem:[#allocation4 + $0x60] sm:$0xff] }
 0x42b   : > { %v2232_v44 = vmul.f32 %v3856_v14, %v2184_v16  ;;  %v2138_v57 = vld [vmem:[#allocation4 + $0x68] sm:$0xff]  ;;  %v2185_v55 = vsub.f32 %v2137_v29, %v2169_v9 }
 0x42c   : > { %v2231_v0 = vmul.f32 %v3858_v45, %v2183_v2  ;;  %v2186_v25 = vsub.f32 %v2138_v57, %v2170_v33 }
 0x42d   : > { %2248 = vst.msk [vmem:[%s4994_s7 + $0x58] sm:$0xff] %vm8549_vm5, %v2232_v44  ;;  %v2233_v48 = vmul.f32 %v3862_v60, %v2185_v55 }
 0x42e   : > { %2247 = vst.msk [vmem:[%s4994_s7 + $0x50] sm:$0xff] %vm8550_vm11, %v2231_v0  ;;  %v2234_v36 = vmul.f32 %v3860_v3, %v2186_v25  ;;  %v2139_v31 = vld [vmem:[#allocation4 + $0x70] sm:$0xff] }
 0x42f   : > { %v2140_v34 = vld [vmem:[#allocation4 + $0x78] sm:$0xff]  ;;  %2249 = vst.msk [vmem:[%s4994_s7 + $0x60] sm:$0xff] %vm8551_vm14, %v2233_v48  ;;  %v2187_v23 = vsub.f32 %v2139_v31, %v2171_v17 }
 0x430   : > { %2250 = vst.msk [vmem:[%s4994_s7 + $0x68] sm:$0xff] %vm8415_vm0, %v2234_v36  ;;  %v2188_v54 = vsub.f32 %v2140_v34, %v2172_v46 }
 0x431   : > { %v2235_v6 = vmul.f32 %v3866_v52, %v2187_v23 }
 0x432   : > { %v2236_v11 = vmul.f32 %v3864_v41, %v2188_v54 }
 0x433   : > { %2251 = vst.msk [vmem:[%s4994_s7 + $0x70] sm:$0xff] %vm8553_vm12, %v2235_v6 }
 0x434   : > { %2252 = vst.msk [vmem:[%s4994_s7 + $0x78] sm:$0xff] %vm8552_vm15, %v2236_v11 }
 0x435 PF: > { %s14_s17 = sadd.s32 1, %s4401_s17   ;;  %s8554_s15 = smov %s4397_s16 }
 0x436   : > { %p11_p8 = scmp.ge.s32.totalorder %s14_s17, 4   ;;  %s8555_s16 = smov %s8557_s18 }
 0x438   :  { %13 = sbr.rel (!%p11_p8) target bundleno = 2 (0x2), region = 91 }

</bundles_post_ra>
